<compile_context>
chip_gen: v7x
topology: tpu7x:2x2x1
jax: 0.10.0
libtpu: 0.0.40
codegen_flags: <defaults>
</compile_context>

<pallas_src>
import functools

import jax
import jax.numpy as jnp
from jax.experimental import pallas as pl
from jax.experimental.pallas import tpu as pltpu


# ----------------------------------------------------------------------------
# helpers
# ----------------------------------------------------------------------------
def _full_spec(shape):
    nd = len(shape)
    return pl.BlockSpec(shape, lambda i, _nd=nd: (0,) * _nd)


def _block_diag(a_mat, b_mat):
    r1, c1 = a_mat.shape
    r2, c2 = b_mat.shape
    top = jnp.concatenate([a_mat, jnp.zeros((r1, c2), a_mat.dtype)], axis=1)
    bot = jnp.concatenate([jnp.zeros((r2, c1), b_mat.dtype), b_mat], axis=1)
    return jnp.concatenate([top, bot], axis=0)


# ----------------------------------------------------------------------------
# Pallas kernel: per-layer 3x3 conv as im2col-matmul (+ bias + ReLU)
# ----------------------------------------------------------------------------
def _conv_matmul_kernel(x_ref, w_ref, b_ref, o_ref):
    y = jnp.dot(x_ref[...], w_ref[...], preferred_element_type=jnp.float32)
    o_ref[...] = jnp.maximum(y + b_ref[...], 0.0)


def conv3x3_relu(x_nhwc, w_mat, b_row, stride):
    """3x3, pad=1 conv in NHWC with fused ReLU. Patch extraction is plain JAX
    (XLA-fused slices + concat); the matmul runs in Pallas on bf16 operands."""
    n, h, w, c = x_nhwc.shape
    cout = w_mat.shape[1]
    xp = jnp.pad(x_nhwc, ((0, 0), (1, 1), (1, 1), (0, 0)))
    oh = (h + 2 - 3) // stride + 1
    ow = (w + 2 - 3) // stride + 1
    cols = []
    for di in range(3):
        for dj in range(3):
            cols.append(jax.lax.slice(
                xp,
                (0, di, dj, 0),
                (n, di + (oh - 1) * stride + 1, dj + (ow - 1) * stride + 1, c),
                (1, stride, stride, 1)))
    patches = jnp.concatenate(cols, axis=-1).reshape(n * oh * ow, 9 * c)
    patches = patches.astype(jnp.bfloat16)           # halve DMA into the kernel

    y = pl.pallas_call(
        _conv_matmul_kernel,
        grid=(1,),
        in_specs=[_full_spec(patches.shape), _full_spec(w_mat.shape),
                  _full_spec(b_row.shape)],
        out_specs=_full_spec((n * oh * ow, cout)),
        out_shape=jax.ShapeDtypeStruct((n * oh * ow, cout), jnp.float32),
        compiler_params=pltpu.CompilerParams(dimension_semantics=("arbitrary",)),
    )(patches, w_mat, b_row)
    return y.reshape(n, oh, ow, cout)


# ----------------------------------------------------------------------------
# Pallas kernel: fully fused SynPo head
# ----------------------------------------------------------------------------
def _synpo_head_kernel(n_actions,
                       x_ref, toh_ref, soh_ref,
                       sfc_w_ref, sfc_b_ref, ttab_ref, stab_ref,
                       pf1_w_ref, pf1_b_ref, pf2_w_ref, pf2_b_ref,
                       rf1_w_ref, rf1_b_ref, rf2_w_ref, rf2_b_ref,
                       w1_ref, w2_ref, pb_b1_ref, pb_b2_ref, g_ref,
                       bd1_ref, bd1_b_ref, bd2_ref, bd2_b_ref, bde_ref,
                       out_ref):
    f32 = jnp.float32

    def mm(a, w_ref):  # bf16 MXU operands, f32 accumulation
        return jnp.dot(a.astype(jnp.bfloat16), w_ref[...],
                       preferred_element_type=f32)

    def l2_normalize(v):  # F.normalize: v / max(||v||_2, 1e-12)
        ss = jnp.sum(v * v, axis=1, keepdims=True)
        return v * jax.lax.rsqrt(jnp.maximum(ss, 1e-24))

    # --- state embedding: state_fc(flattened conv features) ----------------
    s = mm(x_ref[...], sfc_w_ref) + sfc_b_ref[...]                    # (N, E)

    # --- task / scene embedding lookup (one-hot matmul) + normalize --------
    temb = l2_normalize(jnp.dot(toh_ref[...], ttab_ref[...],
                                preferred_element_type=f32))          # (N, Td)
    semb = l2_normalize(jnp.dot(soh_ref[...], stab_ref[...],
                                preferred_element_type=f32))          # (N, Sd)
    ts = jnp.concatenate([temb, semb], axis=1)                        # (N, Td+Sd)

    # --- policy / reward embedding MLPs -------------------------------------
    ph = jnp.maximum(mm(ts, pf1_w_ref) + pf1_b_ref[...], 0.0)
    pemb = mm(ph, pf2_w_ref) + pf2_b_ref[...]                         # (N, E)
    rh = jnp.maximum(mm(ts, rf1_w_ref) + rf1_b_ref[...], 0.0)
    remb = mm(rh, rf2_w_ref) + rf2_b_ref[...]                         # (N, E)

    # --- PolicyBasis bilinear forms -----------------------------------------
    # TODO(synk): PolicyBasis source (synpo/network/operator.py) not provided;
    # reconstructed as policy[n,a] = s[n]^T W1[a] pemb[n] + b1[a] (reward with
    # W2/remb), state_action_feat[n,a,:] = s[n]^T W1[a].
    sa1 = mm(s, w1_ref)                                               # (N, A*E)
    sa2 = mm(s, w2_ref)                                               # (N, A*E)
    pe_t = jnp.concatenate([pemb] * n_actions, axis=1)                # (N, A*E)
    re_t = jnp.concatenate([remb] * n_actions, axis=1)                # (N, A*E)
    g = g_ref[...]                                                    # (A*E, A)
    policy = jnp.dot(sa1 * pe_t, g, preferred_element_type=f32) + pb_b1_ref[...]
    reward = jnp.dot(sa2 * re_t, g, preferred_element_type=f32) + pb_b2_ref[...]

    # --- scene / task disentanglement reprojection (block-diag per action) --
    h = jnp.maximum(mm(sa1, bd1_ref) + bd1_b_ref[...], 0.0)           # (N, 2*A*4E)
    r = mm(h, bd2_ref) + bd2_b_ref[...]                               # (N, A*(Sd+Td))
    scores = mm(r, bde_ref)                                           # (N, A*(Sn+Tn))

    # --- single lane-dense output slab --------------------------------------
    pieces = [policy, reward, scores]
    pad_w = out_ref.shape[1] - (2 * n_actions + scores.shape[1])
    if pad_w > 0:
        pieces.append(jnp.zeros((policy.shape[0], pad_w), f32))
    out_ref[...] = jnp.concatenate(pieces, axis=1)


def synpo_head(x_flat, task_oh, scene_oh, hp, cfg):
    n = x_flat.shape[0]
    a, sn, tn = cfg['n_actions'], cfg['scene_num'], cfg['task_num']
    used = 2 * a + a * sn + a * tn
    out_cols = ((used + 127) // 128) * 128

    args = (x_flat, task_oh, scene_oh,
            hp['sfc_w'], hp['sfc_b'], hp['ttab'], hp['stab'],
            hp['pf1_w'], hp['pf1_b'], hp['pf2_w'], hp['pf2_b'],
            hp['rf1_w'], hp['rf1_b'], hp['rf2_w'], hp['rf2_b'],
            hp['w1cat'], hp['w2cat'], hp['pb_b1'], hp['pb_b2'], hp['g_mat'],
            hp['bd1'], hp['bd1_b'], hp['bd2'], hp['bd2_b'], hp['bde'])

    out = pl.pallas_call(
        functools.partial(_synpo_head_kernel, a),
        grid=(1,),
        in_specs=[_full_spec(v.shape) for v in args],
        out_specs=_full_spec((n, out_cols)),
        out_shape=jax.ShapeDtypeStruct((n, out_cols), jnp.float32),
        compiler_params=pltpu.CompilerParams(dimension_semantics=("arbitrary",)),
    )(*args)

    policy = out[:, :a]
    reward = out[:, a:2 * a]
    scene_score = out[:, 2 * a:2 * a + a * sn].reshape(n, a, sn)
    task_score = out[:, 2 * a + a * sn:used].reshape(n, a, tn)
    return policy, reward, scene_score, task_score


# ----------------------------------------------------------------------------
# parameters: init (PyTorch-style layouts) and one-time kernel-layout prepare
# ----------------------------------------------------------------------------
def init_params(key, cfg):
    keys = iter(jax.random.split(key, 64))

    def nrm(shape, scale=0.1):
        return scale * jax.random.normal(next(keys), shape, dtype=jnp.float32)

    e = cfg['embed_dim']
    a = cfg['n_actions']
    chans = [cfg['in_channels'], 32, 64, 128, cfg['feat_dim'] // 4]
    convs = [(nrm((cout, cin, 3, 3)), nrm((cout,)))
             for cin, cout in zip(chans[:-1], chans[1:])]
    return dict(
        convs=convs,
        state_fc_w=nrm((e, cfg['feat_dim'])), state_fc_b=nrm((e,)),
        task_embed=nrm((cfg['task_num'], cfg['task_dim'])),
        scene_embed=nrm((cfg['scene_num'], cfg['scene_dim'])),
        policy_fc1_w=nrm((4 * e, cfg['task_dim'] + cfg['scene_dim'])), policy_fc1_b=nrm((4 * e,)),
        policy_fc2_w=nrm((e, 4 * e)), policy_fc2_b=nrm((e,)),
        reward_fc1_w=nrm((4 * e, cfg['task_dim'] + cfg['scene_dim'])), reward_fc1_b=nrm((4 * e,)),
        reward_fc2_w=nrm((e, 4 * e)), reward_fc2_b=nrm((e,)),
        pb_w1=nrm((a, e, e)), pb_w2=nrm((a, e, e)), pb_b1=nrm((a,)), pb_b2=nrm((a,)),
        scene_refc1_w=nrm((4 * e, e)), scene_refc1_b=nrm((4 * e,)),
        scene_refc2_w=nrm((cfg['scene_dim'], 4 * e)), scene_refc2_b=nrm((cfg['scene_dim'],)),
        task_refc1_w=nrm((4 * e, e)), task_refc1_b=nrm((4 * e,)),
        task_refc2_w=nrm((cfg['task_dim'], 4 * e)), task_refc2_b=nrm((cfg['task_dim'],)),
    )


def prepare_params(params, cfg):
    """One-time re-layout of all weights into kernel-ready (bf16) slabs."""
    bf16, f32 = jnp.bfloat16, jnp.float32
    a, e = cfg['n_actions'], cfg['embed_dim']

    # conv weights: (Cout,Cin,3,3) -> (9*Cin, Cout) matching [(di,dj),cin] patch order
    convs = []
    for w, b in params['convs']:
        cout, cin, kh, kw = w.shape
        w_mat = jnp.transpose(w, (2, 3, 1, 0)).reshape(kh * kw * cin, cout).astype(bf16)
        convs.append((w_mat, b.reshape(1, cout).astype(f32)))

    # final conv spatial size (3x3, pad=1 convs with cfg strides)
    hw = cfg['input_hw']
    for s in cfg['conv_strides']:
        hw = (hw + 2 - 3) // s + 1
    cf = cfg['feat_dim'] // (hw * hw)

    # fold the PyTorch NCHW .view(N,-1) flatten order into state_fc (we flatten NHWC)
    hh, ww, cc = jnp.meshgrid(jnp.arange(hw), jnp.arange(hw), jnp.arange(cf), indexing='ij')
    perm = (cc * hw * hw + hh * hw + ww).reshape(-1)              # NHWC pos -> NCHW pos
    sfc_w_perm = params['state_fc_w'][:, perm]                    # (E, feat)

    eye_a = jnp.eye(a, dtype=f32)
    kron = jnp.kron
    head = dict(
        sfc_w=jnp.transpose(sfc_w_perm).astype(bf16),
        sfc_b=params['state_fc_b'].reshape(1, e).astype(f32),
        ttab=params['task_embed'].astype(f32),
        stab=params['scene_embed'].astype(f32),
        pf1_w=jnp.transpose(params['policy_fc1_w']).astype(bf16),
        pf1_b=params['policy_fc1_b'].reshape(1, 4 * e).astype(f32),
        pf2_w=jnp.transpose(params['policy_fc2_w']).astype(bf16),
        pf2_b=params['policy_fc2_b'].reshape(1, e).astype(f32),
        rf1_w=jnp.transpose(params['reward_fc1_w']).astype(bf16),
        rf1_b=params['reward_fc1_b'].reshape(1, 4 * e).astype(f32),
        rf2_w=jnp.transpose(params['reward_fc2_w']).astype(bf16),
        rf2_b=params['reward_fc2_b'].reshape(1, e).astype(f32),
        # PolicyBasis tensors flattened per action: [e_in, a*E + e_out]
        w1cat=jnp.transpose(params['pb_w1'], (1, 0, 2)).reshape(e, a * e).astype(bf16),
        w2cat=jnp.transpose(params['pb_w2'], (1, 0, 2)).reshape(e, a * e).astype(bf16),
        pb_b1=params['pb_b1'].reshape(1, a).astype(f32),
        pb_b2=params['pb_b2'].reshape(1, a).astype(f32),
        # group-sum matrix: per-action reduction over E
        g_mat=jnp.repeat(eye_a, e, axis=0),                       # (A*E, A) f32
        # block-diagonal (per-action) reprojection weights, scene & task fused
        bd1=jnp.concatenate(
            [kron(eye_a, jnp.transpose(params['scene_refc1_w'])),
             kron(eye_a, jnp.transpose(params['task_refc1_w']))], axis=1).astype(bf16),
        bd1_b=jnp.concatenate(
            [jnp.tile(params['scene_refc1_b'], a),
             jnp.tile(params['task_refc1_b'], a)]).reshape(1, -1).astype(f32),
        bd2=_block_diag(
            kron(eye_a, jnp.transpose(params['scene_refc2_w'])),
            kron(eye_a, jnp.transpose(params['task_refc2_w']))).astype(bf16),
        bd2_b=jnp.concatenate(
            [jnp.tile(params['scene_refc2_b'], a),
             jnp.tile(params['task_refc2_b'], a)]).reshape(1, -1).astype(f32),
        bde=_block_diag(
            kron(eye_a, jnp.transpose(params['scene_embed'])),
            kron(eye_a, jnp.transpose(params['task_embed']))).astype(bf16),
    )
    return dict(convs=convs, head=head)


# ----------------------------------------------------------------------------
# forward
# ----------------------------------------------------------------------------
def grid_world_synpo_forward(prepared, xs, scene_ids, task_ids, *, cfg):
    # state_func: GridWorldResNet18 stand-in.
    # TODO(synk): GridWorldResNet18 definition (synpo/network/operator.py) not
    # provided; approximated with a 4-layer 3x3 conv stack (strides 1,2,2,2,
    # ReLU, no BatchNorm) producing the (N, feat_dim//4, 2, 2) feature map
    # implied by feat_dim // (2*2).
    x = jnp.transpose(xs, (0, 2, 3, 1))                 # NCHW -> NHWC, once
    for (w_mat, b_row), stride in zip(prepared['convs'], cfg['conv_strides']):
        x = conv3x3_relu(x, w_mat, b_row, stride)

    n = x.shape[0]
    x_flat = x.reshape(n, -1)                           # NHWC flatten (state_fc pre-permuted)

    task_oh = jax.nn.one_hot(task_ids, cfg['task_num'], dtype=jnp.float32)
    scene_oh = jax.nn.one_hot(scene_ids, cfg['scene_num'], dtype=jnp.float32)

    return synpo_head(x_flat, task_oh, scene_oh, prepared['head'], cfg)


if __name__ == "__main__":
    cfg = dict(in_channels=4, n_actions=8, embed_dim=32, feat_dim=128,
               task_dim=16, scene_dim=16, task_num=10, scene_num=10,
               conv_strides=(1, 2, 2, 2), input_hw=16)
    key = jax.random.PRNGKey(0)
    kp, kx, ks, kt = jax.random.split(key, 4)
    params = init_params(kp, cfg)
    prepared = prepare_params(params, cfg)

    xs = jax.random.normal(kx, (2, cfg['in_channels'], cfg['input_hw'], cfg['input_hw']),
                           dtype=jnp.float32)
    scene_ids = jax.random.randint(ks, (2,), 0, cfg['scene_num'])
    task_ids = jax.random.randint(kt, (2,), 0, cfg['task_num'])

    fwd = jax.jit(functools.partial(grid_world_synpo_forward, cfg=cfg))
    policy, reward, scene_score, task_score = fwd(prepared, xs, scene_ids, task_ids)
    jax.block_until_ready((policy, reward, scene_score, task_score))

    assert policy.shape == (2, cfg['n_actions'])
    assert reward.shape == (2, cfg['n_actions'])
    assert scene_score.shape == (2, cfg['n_actions'], cfg['scene_num'])
    assert task_score.shape == (2, cfg['n_actions'], cfg['task_num'])
    print("KERNEL_OK")
</pallas_src>

<mosaic_0001>
module attributes {stable_mosaic.version = 11 : i64} {
  func.func @_conv_matmul_kernel(%arg0: i32, %arg1: memref<512x36xbf16, #tpu.memory_space<vmem>>, %arg2: memref<36x32xbf16, #tpu.memory_space<vmem>>, %arg3: memref<1x32xf32, #tpu.memory_space<vmem>>, %arg4: memref<512x32xf32, #tpu.memory_space<vmem>>) attributes {dimension_semantics = [#tpu.dimension_semantics<arbitrary>], iteration_bounds = array<i64: 1>, scalar_prefetch = 0 : i64, scratch_operands = 0 : i64, tpu.core_type = #tpu.core_type<tc>, window_params = [{pipeline_mode = #tpu.pipeline_mode<synchronous>, transform_indices = @transform_0, window_bounds = array<i64: 512, 36>}, {pipeline_mode = #tpu.pipeline_mode<synchronous>, transform_indices = @transform_1, window_bounds = array<i64: 36, 32>}, {pipeline_mode = #tpu.pipeline_mode<synchronous>, transform_indices = @transform_2, window_bounds = array<i64: 1, 32>}, {pipeline_mode = #tpu.pipeline_mode<synchronous>, transform_indices = @transform_3, window_bounds = array<i64: 512, 32>}]} {
    %c0 = arith.constant 0 : index
    %c0_0 = arith.constant 0 : index
    %0 = vector.load %arg1[%c0, %c0_0] : memref<512x36xbf16, #tpu.memory_space<vmem>>, vector<512x36xbf16>
    %c0_1 = arith.constant 0 : index
    %c0_2 = arith.constant 0 : index
    %1 = vector.load %arg2[%c0_1, %c0_2] : memref<36x32xbf16, #tpu.memory_space<vmem>>, vector<36x32xbf16>
    %cst = arith.constant dense<0.000000e+00> : vector<512x32xf32>
    %2 = tpu.matmul %0, %1, %cst {dimension_numbers = #tpu.dot_dimension_numbers<[1], [0], [0], [1], [0, 0, 1, 1], [], []>} : vector<512x36xbf16>, vector<36x32xbf16>, vector<512x32xf32> -> vector<512x32xf32>
    %c0_3 = arith.constant 0 : index
    %c0_4 = arith.constant 0 : index
    %3 = vector.load %arg3[%c0_3, %c0_4] : memref<1x32xf32, #tpu.memory_space<vmem>>, vector<1x32xf32>
    %4 = vector.broadcast %3 : vector<1x32xf32> to vector<512x32xf32>
    %5 = arith.addf %2, %4 : vector<512x32xf32>
    %cst_5 = arith.constant 0.000000e+00 : f32
    %6 = vector.broadcast %cst_5 : f32 to vector<512x32xf32>
    %7 = arith.maximumf %5, %6 : vector<512x32xf32>
    %c0_6 = arith.constant 0 : index
    %c0_7 = arith.constant 0 : index
    %8 = vector.load %arg4[%c0_6, %c0_7] : memref<512x32xf32, #tpu.memory_space<vmem>>, vector<512x32xf32>
    tpu.vector_store %arg4[%c0_6, %c0_7], %7 {strides = array<i32>} : memref<512x32xf32, #tpu.memory_space<vmem>>, vector<512x32xf32>,
    return
  }
  func.func @transform_0(%arg0: i32) -> (i32, i32) {
    %c0_i32 = arith.constant 0 : i32
    %c0_i32_0 = arith.constant 0 : i32
    %c0_i32_1 = arith.constant 0 : i32
    return %c0_i32, %c0_i32_0 : i32, i32
  }
  func.func @transform_1(%arg0: i32) -> (i32, i32) {
    %c0_i32 = arith.constant 0 : i32
    %c0_i32_0 = arith.constant 0 : i32
    %c0_i32_1 = arith.constant 0 : i32
    return %c0_i32, %c0_i32_0 : i32, i32
  }
  func.func @transform_2(%arg0: i32) -> (i32, i32) {
    %c0_i32 = arith.constant 0 : i32
    %c0_i32_0 = arith.constant 0 : i32
    %c0_i32_1 = arith.constant 0 : i32
    return %c0_i32, %c0_i32_0 : i32, i32
  }
  func.func @transform_3(%arg0: i32) -> (i32, i32) {
    %c0_i32 = arith.constant 0 : i32
    %c0_i32_0 = arith.constant 0 : i32
    %c0_i32_1 = arith.constant 0 : i32
    return %c0_i32, %c0_i32_0 : i32, i32
  }
}

module attributes {stable_mosaic.version = 11 : i64} {
  func.func @_conv_matmul_kernel(%arg0: i32, %arg1: memref<128x288xbf16, #tpu.memory_space<vmem>>, %arg2: memref<288x64xbf16, #tpu.memory_space<vmem>>, %arg3: memref<1x64xf32, #tpu.memory_space<vmem>>, %arg4: memref<128x64xf32, #tpu.memory_space<vmem>>) attributes {dimension_semantics = [#tpu.dimension_semantics<arbitrary>], iteration_bounds = array<i64: 1>, scalar_prefetch = 0 : i64, scratch_operands = 0 : i64, tpu.core_type = #tpu.core_type<tc>, window_params = [{pipeline_mode = #tpu.pipeline_mode<synchronous>, transform_indices = @transform_0, window_bounds = array<i64: 128, 288>}, {pipeline_mode = #tpu.pipeline_mode<synchronous>, transform_indices = @transform_1, window_bounds = array<i64: 288, 64>}, {pipeline_mode = #tpu.pipeline_mode<synchronous>, transform_indices = @transform_2, window_bounds = array<i64: 1, 64>}, {pipeline_mode = #tpu.pipeline_mode<synchronous>, transform_indices = @transform_3, window_bounds = array<i64: 128, 64>}]} {
    %c0 = arith.constant 0 : index
    %c0_0 = arith.constant 0 : index
    %0 = vector.load %arg1[%c0, %c0_0] : memref<128x288xbf16, #tpu.memory_space<vmem>>, vector<128x288xbf16>
    %c0_1 = arith.constant 0 : index
    %c0_2 = arith.constant 0 : index
    %1 = vector.load %arg2[%c0_1, %c0_2] : memref<288x64xbf16, #tpu.memory_space<vmem>>, vector<288x64xbf16>
    %cst = arith.constant dense<0.000000e+00> : vector<128x64xf32>
    %2 = tpu.matmul %0, %1, %cst {dimension_numbers = #tpu.dot_dimension_numbers<[1], [0], [0], [1], [0, 0, 1, 1], [], []>} : vector<128x288xbf16>, vector<288x64xbf16>, vector<128x64xf32> -> vector<128x64xf32>
    %c0_3 = arith.constant 0 : index
    %c0_4 = arith.constant 0 : index
    %3 = vector.load %arg3[%c0_3, %c0_4] : memref<1x64xf32, #tpu.memory_space<vmem>>, vector<1x64xf32>
    %4 = vector.broadcast %3 : vector<1x64xf32> to vector<128x64xf32>
    %5 = arith.addf %2, %4 : vector<128x64xf32>
    %cst_5 = arith.constant 0.000000e+00 : f32
    %6 = vector.broadcast %cst_5 : f32 to vector<128x64xf32>
    %7 = arith.maximumf %5, %6 : vector<128x64xf32>
    %c0_6 = arith.constant 0 : index
    %c0_7 = arith.constant 0 : index
    %8 = vector.load %arg4[%c0_6, %c0_7] : memref<128x64xf32, #tpu.memory_space<vmem>>, vector<128x64xf32>
    tpu.vector_store %arg4[%c0_6, %c0_7], %7 {strides = array<i32>} : memref<128x64xf32, #tpu.memory_space<vmem>>, vector<128x64xf32>,
    return
  }
  func.func @transform_0(%arg0: i32) -> (i32, i32) {
    %c0_i32 = arith.constant 0 : i32
    %c0_i32_0 = arith.constant 0 : i32
    %c0_i32_1 = arith.constant 0 : i32
    return %c0_i32, %c0_i32_0 : i32, i32
  }
  func.func @transform_1(%arg0: i32) -> (i32, i32) {
    %c0_i32 = arith.constant 0 : i32
    %c0_i32_0 = arith.constant 0 : i32
    %c0_i32_1 = arith.constant 0 : i32
    return %c0_i32, %c0_i32_0 : i32, i32
  }
  func.func @transform_2(%arg0: i32) -> (i32, i32) {
    %c0_i32 = arith.constant 0 : i32
    %c0_i32_0 = arith.constant 0 : i32
    %c0_i32_1 = arith.constant 0 : i32
    return %c0_i32, %c0_i32_0 : i32, i32
  }
  func.func @transform_3(%arg0: i32) -> (i32, i32) {
    %c0_i32 = arith.constant 0 : i32
    %c0_i32_0 = arith.constant 0 : i32
    %c0_i32_1 = arith.constant 0 : i32
    return %c0_i32, %c0_i32_0 : i32, i32
  }
}

module attributes {stable_mosaic.version = 11 : i64} {
  func.func @_conv_matmul_kernel(%arg0: i32, %arg1: memref<32x576xbf16, #tpu.memory_space<vmem>>, %arg2: memref<576x128xbf16, #tpu.memory_space<vmem>>, %arg3: memref<1x128xf32, #tpu.memory_space<vmem>>, %arg4: memref<32x128xf32, #tpu.memory_space<vmem>>) attributes {dimension_semantics = [#tpu.dimension_semantics<arbitrary>], iteration_bounds = array<i64: 1>, scalar_prefetch = 0 : i64, scratch_operands = 0 : i64, tpu.core_type = #tpu.core_type<tc>, window_params = [{pipeline_mode = #tpu.pipeline_mode<synchronous>, transform_indices = @transform_0, window_bounds = array<i64: 32, 576>}, {pipeline_mode = #tpu.pipeline_mode<synchronous>, transform_indices = @transform_1, window_bounds = array<i64: 576, 128>}, {pipeline_mode = #tpu.pipeline_mode<synchronous>, transform_indices = @transform_2, window_bounds = array<i64: 1, 128>}, {pipeline_mode = #tpu.pipeline_mode<synchronous>, transform_indices = @transform_3, window_bounds = array<i64: 32, 128>}]} {
    %c0 = arith.constant 0 : index
    %c0_0 = arith.constant 0 : index
    %0 = vector.load %arg1[%c0, %c0_0] : memref<32x576xbf16, #tpu.memory_space<vmem>>, vector<32x576xbf16>
    %c0_1 = arith.constant 0 : index
    %c0_2 = arith.constant 0 : index
    %1 = vector.load %arg2[%c0_1, %c0_2] : memref<576x128xbf16, #tpu.memory_space<vmem>>, vector<576x128xbf16>
    %cst = arith.constant dense<0.000000e+00> : vector<32x128xf32>
    %2 = tpu.matmul %0, %1, %cst {dimension_numbers = #tpu.dot_dimension_numbers<[1], [0], [0], [1], [0, 0, 1, 1], [], []>} : vector<32x576xbf16>, vector<576x128xbf16>, vector<32x128xf32> -> vector<32x128xf32>
    %c0_3 = arith.constant 0 : index
    %c0_4 = arith.constant 0 : index
    %3 = vector.load %arg3[%c0_3, %c0_4] : memref<1x128xf32, #tpu.memory_space<vmem>>, vector<1x128xf32>
    %4 = vector.broadcast %3 : vector<1x128xf32> to vector<32x128xf32>
    %5 = arith.addf %2, %4 : vector<32x128xf32>
    %cst_5 = arith.constant 0.000000e+00 : f32
    %6 = vector.broadcast %cst_5 : f32 to vector<32x128xf32>
    %7 = arith.maximumf %5, %6 : vector<32x128xf32>
    %c0_6 = arith.constant 0 : index
    %c0_7 = arith.constant 0 : index
    %8 = vector.load %arg4[%c0_6, %c0_7] : memref<32x128xf32, #tpu.memory_space<vmem>>, vector<32x128xf32>
    tpu.vector_store %arg4[%c0_6, %c0_7], %7 {strides = array<i32>} : memref<32x128xf32, #tpu.memory_space<vmem>>, vector<32x128xf32>,
    return
  }
  func.func @transform_0(%arg0: i32) -> (i32, i32) {
    %c0_i32 = arith.constant 0 : i32
    %c0_i32_0 = arith.constant 0 : i32
    %c0_i32_1 = arith.constant 0 : i32
    return %c0_i32, %c0_i32_0 : i32, i32
  }
  func.func @transform_1(%arg0: i32) -> (i32, i32) {
    %c0_i32 = arith.constant 0 : i32
    %c0_i32_0 = arith.constant 0 : i32
    %c0_i32_1 = arith.constant 0 : i32
    return %c0_i32, %c0_i32_0 : i32, i32
  }
  func.func @transform_2(%arg0: i32) -> (i32, i32) {
    %c0_i32 = arith.constant 0 : i32
    %c0_i32_0 = arith.constant 0 : i32
    %c0_i32_1 = arith.constant 0 : i32
    return %c0_i32, %c0_i32_0 : i32, i32
  }
  func.func @transform_3(%arg0: i32) -> (i32, i32) {
    %c0_i32 = arith.constant 0 : i32
    %c0_i32_0 = arith.constant 0 : i32
    %c0_i32_1 = arith.constant 0 : i32
    return %c0_i32, %c0_i32_0 : i32, i32
  }
}

module attributes {stable_mosaic.version = 11 : i64} {
  func.func @_conv_matmul_kernel(%arg0: i32, %arg1: memref<8x1152xbf16, #tpu.memory_space<vmem>>, %arg2: memref<1152x32xbf16, #tpu.memory_space<vmem>>, %arg3: memref<1x32xf32, #tpu.memory_space<vmem>>, %arg4: memref<8x32xf32, #tpu.memory_space<vmem>>) attributes {dimension_semantics = [#tpu.dimension_semantics<arbitrary>], iteration_bounds = array<i64: 1>, scalar_prefetch = 0 : i64, scratch_operands = 0 : i64, tpu.core_type = #tpu.core_type<tc>, window_params = [{pipeline_mode = #tpu.pipeline_mode<synchronous>, transform_indices = @transform_0, window_bounds = array<i64: 8, 1152>}, {pipeline_mode = #tpu.pipeline_mode<synchronous>, transform_indices = @transform_1, window_bounds = array<i64: 1152, 32>}, {pipeline_mode = #tpu.pipeline_mode<synchronous>, transform_indices = @transform_2, window_bounds = array<i64: 1, 32>}, {pipeline_mode = #tpu.pipeline_mode<synchronous>, transform_indices = @transform_3, window_bounds = array<i64: 8, 32>}]} {
    %c0 = arith.constant 0 : index
    %c0_0 = arith.constant 0 : index
    %0 = vector.load %arg1[%c0, %c0_0] : memref<8x1152xbf16, #tpu.memory_space<vmem>>, vector<8x1152xbf16>
    %c0_1 = arith.constant 0 : index
    %c0_2 = arith.constant 0 : index
    %1 = vector.load %arg2[%c0_1, %c0_2] : memref<1152x32xbf16, #tpu.memory_space<vmem>>, vector<1152x32xbf16>
    %cst = arith.constant dense<0.000000e+00> : vector<8x32xf32>
    %2 = tpu.matmul %0, %1, %cst {dimension_numbers = #tpu.dot_dimension_numbers<[1], [0], [0], [1], [0, 0, 1, 1], [], []>} : vector<8x1152xbf16>, vector<1152x32xbf16>, vector<8x32xf32> -> vector<8x32xf32>
    %c0_3 = arith.constant 0 : index
    %c0_4 = arith.constant 0 : index
    %3 = vector.load %arg3[%c0_3, %c0_4] : memref<1x32xf32, #tpu.memory_space<vmem>>, vector<1x32xf32>
    %4 = vector.broadcast %3 : vector<1x32xf32> to vector<8x32xf32>
    %5 = arith.addf %2, %4 : vector<8x32xf32>
    %cst_5 = arith.constant 0.000000e+00 : f32
    %6 = vector.broadcast %cst_5 : f32 to vector<8x32xf32>
    %7 = arith.maximumf %5, %6 : vector<8x32xf32>
    %c0_6 = arith.constant 0 : index
    %c0_7 = arith.constant 0 : index
    %8 = vector.load %arg4[%c0_6, %c0_7] : memref<8x32xf32, #tpu.memory_space<vmem>>, vector<8x32xf32>
    tpu.vector_store %arg4[%c0_6, %c0_7], %7 {strides = array<i32>} : memref<8x32xf32, #tpu.memory_space<vmem>>, vector<8x32xf32>,
    return
  }
  func.func @transform_0(%arg0: i32) -> (i32, i32) {
    %c0_i32 = arith.constant 0 : i32
    %c0_i32_0 = arith.constant 0 : i32
    %c0_i32_1 = arith.constant 0 : i32
    return %c0_i32, %c0_i32_0 : i32, i32
  }
  func.func @transform_1(%arg0: i32) -> (i32, i32) {
    %c0_i32 = arith.constant 0 : i32
    %c0_i32_0 = arith.constant 0 : i32
    %c0_i32_1 = arith.constant 0 : i32
    return %c0_i32, %c0_i32_0 : i32, i32
  }
  func.func @transform_2(%arg0: i32) -> (i32, i32) {
    %c0_i32 = arith.constant 0 : i32
    %c0_i32_0 = arith.constant 0 : i32
    %c0_i32_1 = arith.constant 0 : i32
    return %c0_i32, %c0_i32_0 : i32, i32
  }
  func.func @transform_3(%arg0: i32) -> (i32, i32) {
    %c0_i32 = arith.constant 0 : i32
    %c0_i32_0 = arith.constant 0 : i32
    %c0_i32_1 = arith.constant 0 : i32
    return %c0_i32, %c0_i32_0 : i32, i32
  }
}

module attributes {stable_mosaic.version = 11 : i64} {
  func.func @_synpo_head_kernel(%arg0: i32, %arg1: memref<2x128xf32, #tpu.memory_space<vmem>>, %arg2: memref<2x10xf32, #tpu.memory_space<vmem>>, %arg3: memref<2x10xf32, #tpu.memory_space<vmem>>, %arg4: memref<128x32xbf16, #tpu.memory_space<vmem>>, %arg5: memref<1x32xf32, #tpu.memory_space<vmem>>, %arg6: memref<10x16xf32, #tpu.memory_space<vmem>>, %arg7: memref<10x16xf32, #tpu.memory_space<vmem>>, %arg8: memref<32x128xbf16, #tpu.memory_space<vmem>>, %arg9: memref<1x128xf32, #tpu.memory_space<vmem>>, %arg10: memref<128x32xbf16, #tpu.memory_space<vmem>>, %arg11: memref<1x32xf32, #tpu.memory_space<vmem>>, %arg12: memref<32x128xbf16, #tpu.memory_space<vmem>>, %arg13: memref<1x128xf32, #tpu.memory_space<vmem>>, %arg14: memref<128x32xbf16, #tpu.memory_space<vmem>>, %arg15: memref<1x32xf32, #tpu.memory_space<vmem>>, %arg16: memref<32x256xbf16, #tpu.memory_space<vmem>>, %arg17: memref<32x256xbf16, #tpu.memory_space<vmem>>, %arg18: memref<1x8xf32, #tpu.memory_space<vmem>>, %arg19: memref<1x8xf32, #tpu.memory_space<vmem>>, %arg20: memref<256x8xf32, #tpu.memory_space<vmem>>, %arg21: memref<256x2048xbf16, #tpu.memory_space<vmem>>, %arg22: memref<1x2048xf32, #tpu.memory_space<vmem>>, %arg23: memref<2048x256xbf16, #tpu.memory_space<vmem>>, %arg24: memref<1x256xf32, #tpu.memory_space<vmem>>, %arg25: memref<256x160xbf16, #tpu.memory_space<vmem>>, %arg26: memref<2x256xf32, #tpu.memory_space<vmem>>) attributes {dimension_semantics = [#tpu.dimension_semantics<arbitrary>], iteration_bounds = array<i64: 1>, scalar_prefetch = 0 : i64, scratch_operands = 0 : i64, tpu.core_type = #tpu.core_type<tc>, window_params = [{pipeline_mode = #tpu.pipeline_mode<synchronous>, transform_indices = @transform_0, window_bounds = array<i64: 2, 128>}, {pipeline_mode = #tpu.pipeline_mode<synchronous>, transform_indices = @transform_1, window_bounds = array<i64: 2, 10>}, {pipeline_mode = #tpu.pipeline_mode<synchronous>, transform_indices = @transform_2, window_bounds = array<i64: 2, 10>}, {pipeline_mode = #tpu.pipeline_mode<synchronous>, transform_indices = @transform_3, window_bounds = array<i64: 128, 32>}, {pipeline_mode = #tpu.pipeline_mode<synchronous>, transform_indices = @transform_4, window_bounds = array<i64: 1, 32>}, {pipeline_mode = #tpu.pipeline_mode<synchronous>, transform_indices = @transform_5, window_bounds = array<i64: 10, 16>}, {pipeline_mode = #tpu.pipeline_mode<synchronous>, transform_indices = @transform_6, window_bounds = array<i64: 10, 16>}, {pipeline_mode = #tpu.pipeline_mode<synchronous>, transform_indices = @transform_7, window_bounds = array<i64: 32, 128>}, {pipeline_mode = #tpu.pipeline_mode<synchronous>, transform_indices = @transform_8, window_bounds = array<i64: 1, 128>}, {pipeline_mode = #tpu.pipeline_mode<synchronous>, transform_indices = @transform_9, window_bounds = array<i64: 128, 32>}, {pipeline_mode = #tpu.pipeline_mode<synchronous>, transform_indices = @transform_10, window_bounds = array<i64: 1, 32>}, {pipeline_mode = #tpu.pipeline_mode<synchronous>, transform_indices = @transform_11, window_bounds = array<i64: 32, 128>}, {pipeline_mode = #tpu.pipeline_mode<synchronous>, transform_indices = @transform_12, window_bounds = array<i64: 1, 128>}, {pipeline_mode = #tpu.pipeline_mode<synchronous>, transform_indices = @transform_13, window_bounds = array<i64: 128, 32>}, {pipeline_mode = #tpu.pipeline_mode<synchronous>, transform_indices = @transform_14, window_bounds = array<i64: 1, 32>}, {pipeline_mode = #tpu.pipeline_mode<synchronous>, transform_indices = @transform_15, window_bounds = array<i64: 32, 256>}, {pipeline_mode = #tpu.pipeline_mode<synchronous>, transform_indices = @transform_16, window_bounds = array<i64: 32, 256>}, {pipeline_mode = #tpu.pipeline_mode<synchronous>, transform_indices = @transform_17, window_bounds = array<i64: 1, 8>}, {pipeline_mode = #tpu.pipeline_mode<synchronous>, transform_indices = @transform_18, window_bounds = array<i64: 1, 8>}, {pipeline_mode = #tpu.pipeline_mode<synchronous>, transform_indices = @transform_19, window_bounds = array<i64: 256, 8>}, {pipeline_mode = #tpu.pipeline_mode<synchronous>, transform_indices = @transform_20, window_bounds = array<i64: 256, 2048>}, {pipeline_mode = #tpu.pipeline_mode<synchronous>, transform_indices = @transform_21, window_bounds = array<i64: 1, 2048>}, {pipeline_mode = #tpu.pipeline_mode<synchronous>, transform_indices = @transform_22, window_bounds = array<i64: 2048, 256>}, {pipeline_mode = #tpu.pipeline_mode<synchronous>, transform_indices = @transform_23, window_bounds = array<i64: 1, 256>}, {pipeline_mode = #tpu.pipeline_mode<synchronous>, transform_indices = @transform_24, window_bounds = array<i64: 256, 160>}, {pipeline_mode = #tpu.pipeline_mode<synchronous>, transform_indices = @transform_25, window_bounds = array<i64: 2, 256>}]} {
    %c0 = arith.constant 0 : index
    %c0_0 = arith.constant 0 : index
    %0 = vector.load %arg1[%c0, %c0_0] : memref<2x128xf32, #tpu.memory_space<vmem>>, vector<2x128xf32>
    %1 = arith.truncf %0 : vector<2x128xf32> to vector<2x128xbf16>
    %c0_1 = arith.constant 0 : index
    %c0_2 = arith.constant 0 : index
    %2 = vector.load %arg4[%c0_1, %c0_2] : memref<128x32xbf16, #tpu.memory_space<vmem>>, vector<128x32xbf16>
    %cst = arith.constant dense<0.000000e+00> : vector<2x32xf32>
    %3 = tpu.matmul %1, %2, %cst {dimension_numbers = #tpu.dot_dimension_numbers<[1], [0], [0], [1], [0, 0, 1, 1], [], []>} : vector<2x128xbf16>, vector<128x32xbf16>, vector<2x32xf32> -> vector<2x32xf32>
    %c0_3 = arith.constant 0 : index
    %c0_4 = arith.constant 0 : index
    %4 = vector.load %arg5[%c0_3, %c0_4] : memref<1x32xf32, #tpu.memory_space<vmem>>, vector<1x32xf32>
    %5 = vector.broadcast %4 : vector<1x32xf32> to vector<2x32xf32>
    %6 = arith.addf %3, %5 : vector<2x32xf32>
    %c0_5 = arith.constant 0 : index
    %c0_6 = arith.constant 0 : index
    %7 = vector.load %arg2[%c0_5, %c0_6] : memref<2x10xf32, #tpu.memory_space<vmem>>, vector<2x10xf32>
    %c0_7 = arith.constant 0 : index
    %c0_8 = arith.constant 0 : index
    %8 = vector.load %arg6[%c0_7, %c0_8] : memref<10x16xf32, #tpu.memory_space<vmem>>, vector<10x16xf32>
    %cst_9 = arith.constant dense<0.000000e+00> : vector<2x16xf32>
    %9 = tpu.matmul %7, %8, %cst_9 {dimension_numbers = #tpu.dot_dimension_numbers<[1], [0], [0], [1], [0, 0, 1, 1], [], []>} : vector<2x10xf32>, vector<10x16xf32>, vector<2x16xf32> -> vector<2x16xf32>
    %10 = arith.mulf %9, %9 : vector<2x16xf32>
    %cst_10 = arith.constant dense<0.000000e+00> : vector<2xf32>
    %11 = vector.multi_reduction <add>, %10, %cst_10 [1] : vector<2x16xf32> to vector<2xf32>
    %12 = vector.shape_cast %11 : vector<2xf32> to vector<2x1xf32>
    %cst_11 = arith.constant 1.000000e-24 : f32
    %13 = vector.broadcast %cst_11 : f32 to vector<2x1xf32>
    %14 = arith.maximumf %12, %13 : vector<2x1xf32>
    %15 = math.rsqrt %14 : vector<2x1xf32>
    %16 = vector.broadcast %15 : vector<2x1xf32> to vector<2x16xf32>
    %17 = arith.mulf %9, %16 : vector<2x16xf32>
    %c0_12 = arith.constant 0 : index
    %c0_13 = arith.constant 0 : index
    %18 = vector.load %arg3[%c0_12, %c0_13] : memref<2x10xf32, #tpu.memory_space<vmem>>, vector<2x10xf32>
    %c0_14 = arith.constant 0 : index
    %c0_15 = arith.constant 0 : index
    %19 = vector.load %arg7[%c0_14, %c0_15] : memref<10x16xf32, #tpu.memory_space<vmem>>, vector<10x16xf32>
    %cst_16 = arith.constant dense<0.000000e+00> : vector<2x16xf32>
    %20 = tpu.matmul %18, %19, %cst_16 {dimension_numbers = #tpu.dot_dimension_numbers<[1], [0], [0], [1], [0, 0, 1, 1], [], []>} : vector<2x10xf32>, vector<10x16xf32>, vector<2x16xf32> -> vector<2x16xf32>
    %21 = arith.mulf %20, %20 : vector<2x16xf32>
    %cst_17 = arith.constant dense<0.000000e+00> : vector<2xf32>
    %22 = vector.multi_reduction <add>, %21, %cst_17 [1] : vector<2x16xf32> to vector<2xf32>
    %23 = vector.shape_cast %22 : vector<2xf32> to vector<2x1xf32>
    %cst_18 = arith.constant 1.000000e-24 : f32
    %24 = vector.broadcast %cst_18 : f32 to vector<2x1xf32>
    %25 = arith.maximumf %23, %24 : vector<2x1xf32>
    %26 = math.rsqrt %25 : vector<2x1xf32>
    %27 = vector.broadcast %26 : vector<2x1xf32> to vector<2x16xf32>
    %28 = arith.mulf %20, %27 : vector<2x16xf32>
    %29 = tpu.concatenate %17, %28 in 1 : vector<2x16xf32>, vector<2x16xf32> -> vector<2x32xf32>
    %30 = arith.truncf %29 : vector<2x32xf32> to vector<2x32xbf16>
    %c0_19 = arith.constant 0 : index
    %c0_20 = arith.constant 0 : index
    %31 = vector.load %arg8[%c0_19, %c0_20] : memref<32x128xbf16, #tpu.memory_space<vmem>>, vector<32x128xbf16>
    %cst_21 = arith.constant dense<0.000000e+00> : vector<2x128xf32>
    %32 = tpu.matmul %30, %31, %cst_21 {dimension_numbers = #tpu.dot_dimension_numbers<[1], [0], [0], [1], [0, 0, 1, 1], [], []>} : vector<2x32xbf16>, vector<32x128xbf16>, vector<2x128xf32> -> vector<2x128xf32>
    %c0_22 = arith.constant 0 : index
    %c0_23 = arith.constant 0 : index
    %33 = vector.load %arg9[%c0_22, %c0_23] : memref<1x128xf32, #tpu.memory_space<vmem>>, vector<1x128xf32>
    %34 = vector.broadcast %33 : vector<1x128xf32> to vector<2x128xf32>
    %35 = arith.addf %32, %34 : vector<2x128xf32>
    %cst_24 = arith.constant 0.000000e+00 : f32
    %36 = vector.broadcast %cst_24 : f32 to vector<2x128xf32>
    %37 = arith.maximumf %35, %36 : vector<2x128xf32>
    %38 = arith.truncf %37 : vector<2x128xf32> to vector<2x128xbf16>
    %c0_25 = arith.constant 0 : index
    %c0_26 = arith.constant 0 : index
    %39 = vector.load %arg10[%c0_25, %c0_26] : memref<128x32xbf16, #tpu.memory_space<vmem>>, vector<128x32xbf16>
    %cst_27 = arith.constant dense<0.000000e+00> : vector<2x32xf32>
    %40 = tpu.matmul %38, %39, %cst_27 {dimension_numbers = #tpu.dot_dimension_numbers<[1], [0], [0], [1], [0, 0, 1, 1], [], []>} : vector<2x128xbf16>, vector<128x32xbf16>, vector<2x32xf32> -> vector<2x32xf32>
    %c0_28 = arith.constant 0 : index
    %c0_29 = arith.constant 0 : index
    %41 = vector.load %arg11[%c0_28, %c0_29] : memref<1x32xf32, #tpu.memory_space<vmem>>, vector<1x32xf32>
    %42 = vector.broadcast %41 : vector<1x32xf32> to vector<2x32xf32>
    %43 = arith.addf %40, %42 : vector<2x32xf32>
    %44 = arith.truncf %29 : vector<2x32xf32> to vector<2x32xbf16>
    %c0_30 = arith.constant 0 : index
    %c0_31 = arith.constant 0 : index
    %45 = vector.load %arg12[%c0_30, %c0_31] : memref<32x128xbf16, #tpu.memory_space<vmem>>, vector<32x128xbf16>
    %cst_32 = arith.constant dense<0.000000e+00> : vector<2x128xf32>
    %46 = tpu.matmul %44, %45, %cst_32 {dimension_numbers = #tpu.dot_dimension_numbers<[1], [0], [0], [1], [0, 0, 1, 1], [], []>} : vector<2x32xbf16>, vector<32x128xbf16>, vector<2x128xf32> -> vector<2x128xf32>
    %c0_33 = arith.constant 0 : index
    %c0_34 = arith.constant 0 : index
    %47 = vector.load %arg13[%c0_33, %c0_34] : memref<1x128xf32, #tpu.memory_space<vmem>>, vector<1x128xf32>
    %48 = vector.broadcast %47 : vector<1x128xf32> to vector<2x128xf32>
    %49 = arith.addf %46, %48 : vector<2x128xf32>
    %cst_35 = arith.constant 0.000000e+00 : f32
    %50 = vector.broadcast %cst_35 : f32 to vector<2x128xf32>
    %51 = arith.maximumf %49, %50 : vector<2x128xf32>
    %52 = arith.truncf %51 : vector<2x128xf32> to vector<2x128xbf16>
    %c0_36 = arith.constant 0 : index
    %c0_37 = arith.constant 0 : index
    %53 = vector.load %arg14[%c0_36, %c0_37] : memref<128x32xbf16, #tpu.memory_space<vmem>>, vector<128x32xbf16>
    %cst_38 = arith.constant dense<0.000000e+00> : vector<2x32xf32>
    %54 = tpu.matmul %52, %53, %cst_38 {dimension_numbers = #tpu.dot_dimension_numbers<[1], [0], [0], [1], [0, 0, 1, 1], [], []>} : vector<2x128xbf16>, vector<128x32xbf16>, vector<2x32xf32> -> vector<2x32xf32>
    %c0_39 = arith.constant 0 : index
    %c0_40 = arith.constant 0 : index
    %55 = vector.load %arg15[%c0_39, %c0_40] : memref<1x32xf32, #tpu.memory_space<vmem>>, vector<1x32xf32>
    %56 = vector.broadcast %55 : vector<1x32xf32> to vector<2x32xf32>
    %57 = arith.addf %54, %56 : vector<2x32xf32>
    %58 = arith.truncf %6 : vector<2x32xf32> to vector<2x32xbf16>
    %c0_41 = arith.constant 0 : index
    %c0_42 = arith.constant 0 : index
    %59 = vector.load %arg16[%c0_41, %c0_42] : memref<32x256xbf16, #tpu.memory_space<vmem>>, vector<32x256xbf16>
    %cst_43 = arith.constant dense<0.000000e+00> : vector<2x256xf32>
    %60 = tpu.matmul %58, %59, %cst_43 {dimension_numbers = #tpu.dot_dimension_numbers<[1], [0], [0], [1], [0, 0, 1, 1], [], []>} : vector<2x32xbf16>, vector<32x256xbf16>, vector<2x256xf32> -> vector<2x256xf32>
    %61 = arith.truncf %6 : vector<2x32xf32> to vector<2x32xbf16>
    %c0_44 = arith.constant 0 : index
    %c0_45 = arith.constant 0 : index
    %62 = vector.load %arg17[%c0_44, %c0_45] : memref<32x256xbf16, #tpu.memory_space<vmem>>, vector<32x256xbf16>
    %cst_46 = arith.constant dense<0.000000e+00> : vector<2x256xf32>
    %63 = tpu.matmul %61, %62, %cst_46 {dimension_numbers = #tpu.dot_dimension_numbers<[1], [0], [0], [1], [0, 0, 1, 1], [], []>} : vector<2x32xbf16>, vector<32x256xbf16>, vector<2x256xf32> -> vector<2x256xf32>
    %64 = tpu.concatenate %43, %43, %43, %43, %43, %43, %43, %43 in 1 : vector<2x32xf32>, vector<2x32xf32>, vector<2x32xf32>, vector<2x32xf32>, vector<2x32xf32>, vector<2x32xf32>, vector<2x32xf32>, vector<2x32xf32> -> vector<2x256xf32>
    %65 = tpu.concatenate %57, %57, %57, %57, %57, %57, %57, %57 in 1 : vector<2x32xf32>, vector<2x32xf32>, vector<2x32xf32>, vector<2x32xf32>, vector<2x32xf32>, vector<2x32xf32>, vector<2x32xf32>, vector<2x32xf32> -> vector<2x256xf32>
    %c0_47 = arith.constant 0 : index
    %c0_48 = arith.constant 0 : index
    %66 = vector.load %arg20[%c0_47, %c0_48] : memref<256x8xf32, #tpu.memory_space<vmem>>, vector<256x8xf32>
    %67 = arith.mulf %60, %64 : vector<2x256xf32>
    %cst_49 = arith.constant dense<0.000000e+00> : vector<2x8xf32>
    %68 = tpu.matmul %67, %66, %cst_49 {dimension_numbers = #tpu.dot_dimension_numbers<[1], [0], [0], [1], [0, 0, 1, 1], [], []>} : vector<2x256xf32>, vector<256x8xf32>, vector<2x8xf32> -> vector<2x8xf32>
    %c0_50 = arith.constant 0 : index
    %c0_51 = arith.constant 0 : index
    %69 = vector.load %arg18[%c0_50, %c0_51] : memref<1x8xf32, #tpu.memory_space<vmem>>, vector<1x8xf32>
    %70 = vector.broadcast %69 : vector<1x8xf32> to vector<2x8xf32>
    %71 = arith.addf %68, %70 : vector<2x8xf32>
    %72 = arith.mulf %63, %65 : vector<2x256xf32>
    %cst_52 = arith.constant dense<0.000000e+00> : vector<2x8xf32>
    %73 = tpu.matmul %72, %66, %cst_52 {dimension_numbers = #tpu.dot_dimension_numbers<[1], [0], [0], [1], [0, 0, 1, 1], [], []>} : vector<2x256xf32>, vector<256x8xf32>, vector<2x8xf32> -> vector<2x8xf32>
    %c0_53 = arith.constant 0 : index
    %c0_54 = arith.constant 0 : index
    %74 = vector.load %arg19[%c0_53, %c0_54] : memref<1x8xf32, #tpu.memory_space<vmem>>, vector<1x8xf32>
    %75 = vector.broadcast %74 : vector<1x8xf32> to vector<2x8xf32>
    %76 = arith.addf %73, %75 : vector<2x8xf32>
    %77 = arith.truncf %60 : vector<2x256xf32> to vector<2x256xbf16>
    %c0_55 = arith.constant 0 : index
    %c0_56 = arith.constant 0 : index
    %78 = vector.load %arg21[%c0_55, %c0_56] : memref<256x2048xbf16, #tpu.memory_space<vmem>>, vector<256x2048xbf16>
    %cst_57 = arith.constant dense<0.000000e+00> : vector<2x2048xf32>
    %79 = tpu.matmul %77, %78, %cst_57 {dimension_numbers = #tpu.dot_dimension_numbers<[1], [0], [0], [1], [0, 0, 1, 1], [], []>} : vector<2x256xbf16>, vector<256x2048xbf16>, vector<2x2048xf32> -> vector<2x2048xf32>
    %c0_58 = arith.constant 0 : index
    %c0_59 = arith.constant 0 : index
    %80 = vector.load %arg22[%c0_58, %c0_59] : memref<1x2048xf32, #tpu.memory_space<vmem>>, vector<1x2048xf32>
    %81 = vector.broadcast %80 : vector<1x2048xf32> to vector<2x2048xf32>
    %82 = arith.addf %79, %81 : vector<2x2048xf32>
    %cst_60 = arith.constant 0.000000e+00 : f32
    %83 = vector.broadcast %cst_60 : f32 to vector<2x2048xf32>
    %84 = arith.maximumf %82, %83 : vector<2x2048xf32>
    %85 = arith.truncf %84 : vector<2x2048xf32> to vector<2x2048xbf16>
    %c0_61 = arith.constant 0 : index
    %c0_62 = arith.constant 0 : index
    %86 = vector.load %arg23[%c0_61, %c0_62] : memref<2048x256xbf16, #tpu.memory_space<vmem>>, vector<2048x256xbf16>
    %cst_63 = arith.constant dense<0.000000e+00> : vector<2x256xf32>
    %87 = tpu.matmul %85, %86, %cst_63 {dimension_numbers = #tpu.dot_dimension_numbers<[1], [0], [0], [1], [0, 0, 1, 1], [], []>} : vector<2x2048xbf16>, vector<2048x256xbf16>, vector<2x256xf32> -> vector<2x256xf32>
    %c0_64 = arith.constant 0 : index
    %c0_65 = arith.constant 0 : index
    %88 = vector.load %arg24[%c0_64, %c0_65] : memref<1x256xf32, #tpu.memory_space<vmem>>, vector<1x256xf32>
    %89 = vector.broadcast %88 : vector<1x256xf32> to vector<2x256xf32>
    %90 = arith.addf %87, %89 : vector<2x256xf32>
    %91 = arith.truncf %90 : vector<2x256xf32> to vector<2x256xbf16>
    %c0_66 = arith.constant 0 : index
    %c0_67 = arith.constant 0 : index
    %92 = vector.load %arg25[%c0_66, %c0_67] : memref<256x160xbf16, #tpu.memory_space<vmem>>, vector<256x160xbf16>
    %cst_68 = arith.constant dense<0.000000e+00> : vector<2x160xf32>
    %93 = tpu.matmul %91, %92, %cst_68 {dimension_numbers = #tpu.dot_dimension_numbers<[1], [0], [0], [1], [0, 0, 1, 1], [], []>} : vector<2x256xbf16>, vector<256x160xbf16>, vector<2x160xf32> -> vector<2x160xf32>
    %cst_69 = arith.constant 0.000000e+00 : f32
    %94 = vector.broadcast %cst_69 : f32 to vector<2x80xf32>
    %95 = tpu.concatenate %71, %76, %93, %94 in 1 : vector<2x8xf32>, vector<2x8xf32>, vector<2x160xf32>, vector<2x80xf32> -> vector<2x256xf32>
    %c0_70 = arith.constant 0 : index
    %c0_71 = arith.constant 0 : index
    %96 = vector.load %arg26[%c0_70, %c0_71] : memref<2x256xf32, #tpu.memory_space<vmem>>, vector<2x256xf32>
    tpu.vector_store %arg26[%c0_70, %c0_71], %95 {strides = array<i32>} : memref<2x256xf32, #tpu.memory_space<vmem>>, vector<2x256xf32>,
    return
  }
  func.func @transform_0(%arg0: i32) -> (i32, i32) {
    %c0_i32 = arith.constant 0 : i32
    %c0_i32_0 = arith.constant 0 : i32
    %c0_i32_1 = arith.constant 0 : i32
    return %c0_i32, %c0_i32_0 : i32, i32
  }
  func.func @transform_1(%arg0: i32) -> (i32, i32) {
    %c0_i32 = arith.constant 0 : i32
    %c0_i32_0 = arith.constant 0 : i32
    %c0_i32_1 = arith.constant 0 : i32
    return %c0_i32, %c0_i32_0 : i32, i32
  }
  func.func @transform_2(%arg0: i32) -> (i32, i32) {
    %c0_i32 = arith.constant 0 : i32
    %c0_i32_0 = arith.constant 0 : i32
    %c0_i32_1 = arith.constant 0 : i32
    return %c0_i32, %c0_i32_0 : i32, i32
  }
  func.func @transform_3(%arg0: i32) -> (i32, i32) {
    %c0_i32 = arith.constant 0 : i32
    %c0_i32_0 = arith.constant 0 : i32
    %c0_i32_1 = arith.constant 0 : i32
    return %c0_i32, %c0_i32_0 : i32, i32
  }
  func.func @transform_4(%arg0: i32) -> (i32, i32) {
    %c0_i32 = arith.constant 0 : i32
    %c0_i32_0 = arith.constant 0 : i32
    %c0_i32_1 = arith.constant 0 : i32
    return %c0_i32, %c0_i32_0 : i32, i32
  }
  func.func @transform_5(%arg0: i32) -> (i32, i32) {
    %c0_i32 = arith.constant 0 : i32
    %c0_i32_0 = arith.constant 0 : i32
    %c0_i32_1 = arith.constant 0 : i32
    return %c0_i32, %c0_i32_0 : i32, i32
  }
  func.func @transform_6(%arg0: i32) -> (i32, i32) {
    %c0_i32 = arith.constant 0 : i32
    %c0_i32_0 = arith.constant 0 : i32
    %c0_i32_1 = arith.constant 0 : i32
    return %c0_i32, %c0_i32_0 : i32, i32
  }
  func.func @transform_7(%arg0: i32) -> (i32, i32) {
    %c0_i32 = arith.constant 0 : i32
    %c0_i32_0 = arith.constant 0 : i32
    %c0_i32_1 = arith.constant 0 : i32
    return %c0_i32, %c0_i32_0 : i32, i32
  }
  func.func @transform_8(%arg0: i32) -> (i32, i32) {
    %c0_i32 = arith.constant 0 : i32
    %c0_i32_0 = arith.constant 0 : i32
    %c0_i32_1 = arith.constant 0 : i32
    return %c0_i32, %c0_i32_0 : i32, i32
  }
  func.func @transform_9(%arg0: i32) -> (i32, i32) {
    %c0_i32 = arith.constant 0 : i32
    %c0_i32_0 = arith.constant 0 : i32
    %c0_i32_1 = arith.constant 0 : i32
    return %c0_i32, %c0_i32_0 : i32, i32
  }
  func.func @transform_10(%arg0: i32) -> (i32, i32) {
    %c0_i32 = arith.constant 0 : i32
    %c0_i32_0 = arith.constant 0 : i32
    %c0_i32_1 = arith.constant 0 : i32
    return %c0_i32, %c0_i32_0 : i32, i32
  }
  func.func @transform_11(%arg0: i32) -> (i32, i32) {
    %c0_i32 = arith.constant 0 : i32
    %c0_i32_0 = arith.constant 0 : i32
    %c0_i32_1 = arith.constant 0 : i32
    return %c0_i32, %c0_i32_0 : i32, i32
  }
  func.func @transform_12(%arg0: i32) -> (i32, i32) {
    %c0_i32 = arith.constant 0 : i32
    %c0_i32_0 = arith.constant 0 : i32
    %c0_i32_1 = arith.constant 0 : i32
    return %c0_i32, %c0_i32_0 : i32, i32
  }
  func.func @transform_13(%arg0: i32) -> (i32, i32) {
    %c0_i32 = arith.constant 0 : i32
    %c0_i32_0 = arith.constant 0 : i32
    %c0_i32_1 = arith.constant 0 : i32
    return %c0_i32, %c0_i32_0 : i32, i32
  }
  func.func @transform_14(%arg0: i32) -> (i32, i32) {
    %c0_i32 = arith.constant 0 : i32
    %c0_i32_0 = arith.constant 0 : i32
    %c0_i32_1 = arith.constant 0 : i32
    return %c0_i32, %c0_i32_0 : i32, i32
  }
  func.func @transform_15(%arg0: i32) -> (i32, i32) {
    %c0_i32 = arith.constant 0 : i32
    %c0_i32_0 = arith.constant 0 : i32
    %c0_i32_1 = arith.constant 0 : i32
    return %c0_i32, %c0_i32_0 : i32, i32
  }
  func.func @transform_16(%arg0: i32) -> (i32, i32) {
    %c0_i32 = arith.constant 0 : i32
    %c0_i32_0 = arith.constant 0 : i32
    %c0_i32_1 = arith.constant 0 : i32
    return %c0_i32, %c0_i32_0 : i32, i32
  }
  func.func @transform_17(%arg0: i32) -> (i32, i32) {
    %c0_i32 = arith.constant 0 : i32
    %c0_i32_0 = arith.constant 0 : i32
    %c0_i32_1 = arith.constant 0 : i32
    return %c0_i32, %c0_i32_0 : i32, i32
  }
  func.func @transform_18(%arg0: i32) -> (i32, i32) {
    %c0_i32 = arith.constant 0 : i32
    %c0_i32_0 = arith.constant 0 : i32
    %c0_i32_1 = arith.constant 0 : i32
    return %c0_i32, %c0_i32_0 : i32, i32
  }
  func.func @transform_19(%arg0: i32) -> (i32, i32) {
    %c0_i32 = arith.constant 0 : i32
    %c0_i32_0 = arith.constant 0 : i32
    %c0_i32_1 = arith.constant 0 : i32
    return %c0_i32, %c0_i32_0 : i32, i32
  }
  func.func @transform_20(%arg0: i32) -> (i32, i32) {
    %c0_i32 = arith.constant 0 : i32
    %c0_i32_0 = arith.constant 0 : i32
    %c0_i32_1 = arith.constant 0 : i32
    return %c0_i32, %c0_i32_0 : i32, i32
  }
  func.func @transform_21(%arg0: i32) -> (i32, i32) {
    %c0_i32 = arith.constant 0 : i32
    %c0_i32_0 = arith.constant 0 : i32
    %c0_i32_1 = arith.constant 0 : i32
    return %c0_i32, %c0_i32_0 : i32, i32
  }
  func.func @transform_22(%arg0: i32) -> (i32, i32) {
    %c0_i32 = arith.constant 0 : i32
    %c0_i32_0 = arith.constant 0 : i32
    %c0_i32_1 = arith.constant 0 : i32
    return %c0_i32, %c0_i32_0 : i32, i32
  }
  func.func @transform_23(%arg0: i32) -> (i32, i32) {
    %c0_i32 = arith.constant 0 : i32
    %c0_i32_0 = arith.constant 0 : i32
    %c0_i32_1 = arith.constant 0 : i32
    return %c0_i32, %c0_i32_0 : i32, i32
  }
  func.func @transform_24(%arg0: i32) -> (i32, i32) {
    %c0_i32 = arith.constant 0 : i32
    %c0_i32_0 = arith.constant 0 : i32
    %c0_i32_1 = arith.constant 0 : i32
    return %c0_i32, %c0_i32_0 : i32, i32
  }
  func.func @transform_25(%arg0: i32) -> (i32, i32) {
    %c0_i32 = arith.constant 0 : i32
    %c0_i32_0 = arith.constant 0 : i32
    %c0_i32_1 = arith.constant 0 : i32
    return %c0_i32, %c0_i32_0 : i32, i32
  }
}

</mosaic_0001>

<bundles_post_ra>
// kernel: grid_world_synpo_forward.5
= control target key start
LH: loop header
LB: loop body
LE: loop exit
PB: predicated region body
PF: predicated region fallthrough
CT: control target
= control target key end

     0   :  { %vm266_vm0 = vcmask 293888   ;;  %vm363_vm1 = vcmask 1041408   ;;  %vm720_vm2 = vcmask 261120   ;;  %s1487_s1 = inlined_call_operand.vmem [shape: bf16[36,32], index: 1, kind: input, shape index: {}]   ;;  %s1488_s0 = inlined_call_operand.vmem [shape: bf16[512,36], index: 0, kind: input, shape index: {}]   ;;  %s1489_s2 = inlined_call_operand.vmem [shape: f32[1,32], index: 2, kind: input, shape index: {}]   ;;  %s1490_s3 = inlined_call_operand.vmem [shape: f32[512,32], index: 3, kind: output, shape index: {}]  }
   0x1   :  { %v970_v0 = vld [vmem:[%s1487_s1] sm:$0xff]   ;;  %v971_v1 = vld [vmem:[%s1487_s1 + $0x8] sm:$0xff]   ;;  %v972_v2 = vld [vmem:[%s1487_s1 + $0x10] ss:$0 sps:$4 sm:$0x33]  }
   0x2   :  { %892 = vmatprep.subr.bf16.mxu0 %v970_v0  ;;  %962 = vmatprep.subr.bf16.mxu1 %v970_v0  ;;  %v973_v3 = vld [vmem:[%s1488_s0] sm:$0xff]   ;;  %v365_v5 = vsel %vm363_vm1, %v972_v2, 0  ;;  %v975_v6 = vld [vmem:[%s1488_s0 + $0x8] sm:$0xff]   ;;  %v977_v8 = vld [vmem:[%s1488_s0 + $0x10] sm:$0xff]  }
   0x3   :  { %893 = vmatpush3.bf16.msra.mxu0 %v970_v0  ;;  %965 = vmatpush3.bf16.msra.mxu1 %v970_v0  ;;  %v974_v4 = vld [vmem:[%s1488_s0 + $0x80] sm:$0xff]   ;;  %v976_v7 = vld [vmem:[%s1488_s0 + $0x88] sm:$0xff]   ;;  %v978_v9 = vld [vmem:[%s1488_s0 + $0x90] sm:$0xff]  }
   0x4   :  { %894 = vmatprep.subr.bf16.mxu0 %v971_v1  ;;  %963 = vmatprep.subr.bf16.mxu1 %v971_v1  ;;  %v979_v10 = vld [vmem:[%s1488_s0 + $0x18] sm:$0xff]   ;;  %v981_v12 = vld [vmem:[%s1488_s0 + $0x20] sm:$0xff]   ;;  %v983_v14 = vld [vmem:[%s1488_s0 + $0x28] sm:$0xff]  }
   0x5   :  { %898 = vmatprep.mubr.msk.bf16.mxu0 %vm266_vm0, %v973_v3  ;;  %930 = vmatprep.mubr.msk.bf16.mxu1 %vm266_vm0, %v974_v4  ;;  %v980_v11 = vld [vmem:[%s1488_s0 + $0x98] sm:$0xff]   ;;  %v982_v13 = vld [vmem:[%s1488_s0 + $0xa0] sm:$0xff]   ;;  %v984_v15 = vld [vmem:[%s1488_s0 + $0xa8] sm:$0xff]  }
   0x6   :  { %v985_v16 = vld [vmem:[%s1488_s0 + $0x30] sm:$0xff]   ;;  %v987_v18 = vld [vmem:[%s1488_s0 + $0x38] sm:$0xff]   ;;  %v989_v20 = vld [vmem:[%s1488_s0 + $0x40] sm:$0xff]  }
   0x7   :  { %895 = vmatpush3.bf16.msra.mxu0 %v971_v1  ;;  %966 = vmatpush3.bf16.msra.mxu1 %v971_v1  ;;  %v986_v17 = vld [vmem:[%s1488_s0 + $0xb0] sm:$0xff]   ;;  %v988_v19 = vld [vmem:[%s1488_s0 + $0xb8] sm:$0xff]   ;;  %v990_v21 = vld [vmem:[%s1488_s0 + $0xc0] sm:$0xff]  }
   0x8   :  { %968 = vmatprep.subr.msk.bf16.mxu0 %vm363_vm1, %v972_v2  ;;  %969 = vmatprep.subr.msk.bf16.mxu1 %vm363_vm1, %v972_v2  ;;  %v991_v22 = vld [vmem:[%s1488_s0 + $0x48] sm:$0xff]   ;;  %v993_v24 = vld [vmem:[%s1488_s0 + $0x50] sm:$0xff]   ;;  %v995_v26 = vld [vmem:[%s1488_s0 + $0x58] sm:$0xff]  }
   0x9   :  { %v992_v23 = vld [vmem:[%s1488_s0 + $0xc8] sm:$0xff]   ;;  %v994_v25 = vld [vmem:[%s1488_s0 + $0xd0] sm:$0xff]   ;;  %v996_v27 = vld [vmem:[%s1488_s0 + $0xd8] sm:$0xff]  }
   0xa   :  { %v997_v28 = vld [vmem:[%s1488_s0 + $0x60] sm:$0xff]   ;;  %v999_v30 = vld [vmem:[%s1488_s0 + $0x68] sm:$0xff]   ;;  %v1001_v32 = vld [vmem:[%s1488_s0 + $0x70] sm:$0xff]  }
   0xb   :  { %897 = vmatpush3.bf16.msra.mxu0 %v365_v5  ;;  %967 = vmatpush3.bf16.msra.mxu1 %v365_v5  ;;  %v998_v29 = vld [vmem:[%s1488_s0 + $0xe0] sm:$0xff]   ;;  %v1000_v31 = vld [vmem:[%s1488_s0 + $0xe8] sm:$0xff]   ;;  %v1002_v33 = vld [vmem:[%s1488_s0 + $0xf0] sm:$0xff]  }
   0xc   :  { %v1003_v34 = vld [vmem:[%s1488_s0 + $0x78] sm:$0xff]   ;;  %v1165_v36 = vld [vmem:[%s1489_s2] ss:$0 sm:$0xff] }
   0xd   :  { %v1004_v35 = vld [vmem:[%s1488_s0 + $0xf8] sm:$0xff]  }
   0xe   :  { %899 = vmatmul.mubr.msk.bf16.vlgmr.msra.gmra.mrb[0].mxu0 %vm266_vm0, %v975_v6  ;;  %931 = vmatmul.mubr.msk.bf16.vlgmr.msra.gmra.mrb[0].mxu1 %vm266_vm0, %v976_v7 }
   0xf   :  { %902 = vmatprep.mubr.msk.bf16.mxu0 %vm266_vm0, %v977_v8  ;;  %934 = vmatprep.mubr.msk.bf16.mxu1 %vm266_vm0, %v978_v9 }
  0x16   :  { %903 = vmatmul.mubr.msk.bf16.gmra.mrb[4].mxu0 %vm266_vm0, %v979_v10  ;;  %935 = vmatmul.mubr.msk.bf16.gmra.mrb[4].mxu1 %vm266_vm0, %v980_v11 }
  0x17   :  { %906 = vmatprep.mubr.msk.bf16.mxu0 %vm266_vm0, %v981_v12  ;;  %938 = vmatprep.mubr.msk.bf16.mxu1 %vm266_vm0, %v982_v13 }
  0x1e   :  { %907 = vmatmul.mubr.msk.bf16.gmra.mrb[8].mxu0 %vm266_vm0, %v983_v14  ;;  %939 = vmatmul.mubr.msk.bf16.gmra.mrb[8].mxu1 %vm266_vm0, %v984_v15 }
  0x1f   :  { %910 = vmatprep.mubr.msk.bf16.mxu0 %vm266_vm0, %v985_v16  ;;  %942 = vmatprep.mubr.msk.bf16.mxu1 %vm266_vm0, %v986_v17 }
  0x26   :  { %911 = vmatmul.mubr.msk.bf16.gmra.mrb[12].mxu0 %vm266_vm0, %v987_v18  ;;  %943 = vmatmul.mubr.msk.bf16.gmra.mrb[12].mxu1 %vm266_vm0, %v988_v19 }
  0x27   :  { %914 = vmatprep.mubr.msk.bf16.mxu0 %vm266_vm0, %v989_v20  ;;  %946 = vmatprep.mubr.msk.bf16.mxu1 %vm266_vm0, %v990_v21 }
  0x2e   :  { %915 = vmatmul.mubr.msk.bf16.gmra.mrb[16].mxu0 %vm266_vm0, %v991_v22  ;;  %947 = vmatmul.mubr.msk.bf16.gmra.mrb[16].mxu1 %vm266_vm0, %v992_v23 }
  0x2f   :  { %918 = vmatprep.mubr.msk.bf16.mxu0 %vm266_vm0, %v993_v24  ;;  %950 = vmatprep.mubr.msk.bf16.mxu1 %vm266_vm0, %v994_v25 }
  0x36   :  { %919 = vmatmul.mubr.msk.bf16.gmra.mrb[20].mxu0 %vm266_vm0, %v995_v26  ;;  %951 = vmatmul.mubr.msk.bf16.gmra.mrb[20].mxu1 %vm266_vm0, %v996_v27 }
  0x37   :  { %922 = vmatprep.mubr.msk.bf16.mxu0 %vm266_vm0, %v997_v28  ;;  %954 = vmatprep.mubr.msk.bf16.mxu1 %vm266_vm0, %v998_v29 }
  0x3e   :  { %923 = vmatmul.mubr.msk.bf16.gmra.mrb[24].mxu0 %vm266_vm0, %v999_v30  ;;  %955 = vmatmul.mubr.msk.bf16.gmra.mrb[24].mxu1 %vm266_vm0, %v1000_v31 }
  0x3f   :  { %926 = vmatprep.mubr.msk.bf16.mxu0 %vm266_vm0, %v1001_v32  ;;  %958 = vmatprep.mubr.msk.bf16.mxu1 %vm266_vm0, %v1002_v33 }
  0x46   :  { %927 = vmatmul.mubr.msk.bf16.gmra.mrb[28].mxu0 %vm266_vm0, %v1003_v34  ;;  %959 = vmatmul.mubr.msk.bf16.gmra.mrb[28].mxu1 %vm266_vm0, %v1004_v35 }
  0xe1   :  { %v900_v37 = vpop.f32.mrb[0].mxu0  ;;  %v932_v38 = vpop.f32.mrb[0].mxu1 }
  0xe2   :  { %v410_v39 = vadd.f32 %v900_v37, %v1165_v36  ;;  %v538_v40 = vadd.f32 %v932_v38, %v1165_v36  ;;  %v401_v41 = vpop.f32.mrb[1].mxu0  ;;  %v529_v42 = vpop.f32.mrb[1].mxu1 }
  0xe3   :  { %v402_v43 = vadd.f32 %v1165_v36, %v401_v41  ;;  %v530_v44 = vadd.f32 %v1165_v36, %v529_v42  ;;  %v901_v45 = vpop.f32.mrb[2].mxu0  ;;  %v933_v46 = vpop.f32.mrb[2].mxu1 }
  0xe4   :  { %v658_v47 = vmax.f32 %v410_v39, 0.0  ;;  %v690_v48 = vmax.f32 %v538_v40, 0.0  ;;  %v413_v49 = vadd.f32 %v901_v45, %v1165_v36  ;;  %v541_v50 = vadd.f32 %v933_v46, %v1165_v36  ;;  %v404_v51 = vpop.f32.mrb[3].mxu0  ;;  %v532_v52 = vpop.f32.mrb[3].mxu1 }
  0xe5   :  { %v656_v53 = vmax.f32 %v402_v43, 0.0  ;;  %v688_v54 = vmax.f32 %v530_v44, 0.0  ;;  %v405_v55 = vadd.f32 %v1165_v36, %v404_v51  ;;  %v533_v56 = vadd.f32 %v1165_v36, %v532_v52 }
  0xe6   :  { %723 = vst.msk [vmem:[%s1490_s3 + $0x10] sm:$0xff] %vm720_vm2, %v658_v47  ;;  %755 = vst.msk [vmem:[%s1490_s3 + $0x110] sm:$0xff] %vm720_vm2, %v690_v48  ;;  %v659_v57 = vmax.f32 %v413_v49, 0.0  ;;  %v691_v58 = vmax.f32 %v541_v50, 0.0 }
  0xe7   :  { %721 = vst.msk [vmem:[%s1490_s3] sm:$0xff] %vm720_vm2, %v656_v53  ;;  %753 = vst.msk [vmem:[%s1490_s3 + $0x100] sm:$0xff] %vm720_vm2, %v688_v54  ;;  %v657_v59 = vmax.f32 %v405_v55, 0.0  ;;  %v689_v60 = vmax.f32 %v533_v56, 0.0 }
  0xe8   :  { %724 = vst.msk [vmem:[%s1490_s3 + $0x18] sm:$0xff] %vm720_vm2, %v659_v57  ;;  %756 = vst.msk [vmem:[%s1490_s3 + $0x118] sm:$0xff] %vm720_vm2, %v691_v58 }
  0xe9   :  { %722 = vst.msk [vmem:[%s1490_s3 + $0x8] sm:$0xff] %vm720_vm2, %v657_v59  ;;  %754 = vst.msk [vmem:[%s1490_s3 + $0x108] sm:$0xff] %vm720_vm2, %v689_v60  ;;  %v904_v61 = vpop.f32.mrb[4].mxu0  ;;  %v936_v62 = vpop.f32.mrb[4].mxu1 }
  0xea   :  { %v426_v63 = vadd.f32 %v904_v61, %v1165_v36  ;;  %v554_v0 = vadd.f32 %v936_v62, %v1165_v36  ;;  %v417_v1 = vpop.f32.mrb[5].mxu0  ;;  %v545_v2 = vpop.f32.mrb[5].mxu1 }
  0xeb   :  { %v418_v3 = vadd.f32 %v1165_v36, %v417_v1  ;;  %v546_v4 = vadd.f32 %v1165_v36, %v545_v2  ;;  %v905_v5 = vpop.f32.mrb[6].mxu0  ;;  %v937_v6 = vpop.f32.mrb[6].mxu1 }
  0xec   :  { %v662_v7 = vmax.f32 %v426_v63, 0.0  ;;  %v694_v8 = vmax.f32 %v554_v0, 0.0  ;;  %v429_v9 = vadd.f32 %v905_v5, %v1165_v36  ;;  %v557_v10 = vadd.f32 %v937_v6, %v1165_v36  ;;  %v420_v11 = vpop.f32.mrb[7].mxu0  ;;  %v548_v12 = vpop.f32.mrb[7].mxu1 }
  0xed   :  { %v660_v13 = vmax.f32 %v418_v3, 0.0  ;;  %v692_v14 = vmax.f32 %v546_v4, 0.0  ;;  %v421_v15 = vadd.f32 %v1165_v36, %v420_v11  ;;  %v549_v16 = vadd.f32 %v1165_v36, %v548_v12 }
  0xee   :  { %727 = vst.msk [vmem:[%s1490_s3 + $0x30] sm:$0xff] %vm720_vm2, %v662_v7  ;;  %759 = vst.msk [vmem:[%s1490_s3 + $0x130] sm:$0xff] %vm720_vm2, %v694_v8  ;;  %v663_v17 = vmax.f32 %v429_v9, 0.0  ;;  %v695_v18 = vmax.f32 %v557_v10, 0.0 }
  0xef   :  { %725 = vst.msk [vmem:[%s1490_s3 + $0x20] sm:$0xff] %vm720_vm2, %v660_v13  ;;  %757 = vst.msk [vmem:[%s1490_s3 + $0x120] sm:$0xff] %vm720_vm2, %v692_v14  ;;  %v661_v19 = vmax.f32 %v421_v15, 0.0  ;;  %v693_v20 = vmax.f32 %v549_v16, 0.0 }
  0xf0   :  { %728 = vst.msk [vmem:[%s1490_s3 + $0x38] sm:$0xff] %vm720_vm2, %v663_v17  ;;  %760 = vst.msk [vmem:[%s1490_s3 + $0x138] sm:$0xff] %vm720_vm2, %v695_v18 }
  0xf1   :  { %726 = vst.msk [vmem:[%s1490_s3 + $0x28] sm:$0xff] %vm720_vm2, %v661_v19  ;;  %758 = vst.msk [vmem:[%s1490_s3 + $0x128] sm:$0xff] %vm720_vm2, %v693_v20  ;;  %v908_v21 = vpop.f32.mrb[8].mxu0  ;;  %v940_v22 = vpop.f32.mrb[8].mxu1 }
  0xf2   :  { %v442_v23 = vadd.f32 %v908_v21, %v1165_v36  ;;  %v570_v24 = vadd.f32 %v940_v22, %v1165_v36  ;;  %v433_v25 = vpop.f32.mrb[9].mxu0  ;;  %v561_v26 = vpop.f32.mrb[9].mxu1 }
  0xf3   :  { %v434_v27 = vadd.f32 %v1165_v36, %v433_v25  ;;  %v562_v28 = vadd.f32 %v1165_v36, %v561_v26  ;;  %v909_v29 = vpop.f32.mrb[10].mxu0  ;;  %v941_v30 = vpop.f32.mrb[10].mxu1 }
  0xf4   :  { %v666_v31 = vmax.f32 %v442_v23, 0.0  ;;  %v698_v32 = vmax.f32 %v570_v24, 0.0  ;;  %v445_v33 = vadd.f32 %v909_v29, %v1165_v36  ;;  %v573_v34 = vadd.f32 %v941_v30, %v1165_v36  ;;  %v436_v35 = vpop.f32.mrb[11].mxu0  ;;  %v564_v37 = vpop.f32.mrb[11].mxu1 }
  0xf5   :  { %v664_v38 = vmax.f32 %v434_v27, 0.0  ;;  %v696_v39 = vmax.f32 %v562_v28, 0.0  ;;  %v437_v40 = vadd.f32 %v1165_v36, %v436_v35  ;;  %v565_v41 = vadd.f32 %v1165_v36, %v564_v37 }
  0xf6   :  { %731 = vst.msk [vmem:[%s1490_s3 + $0x50] sm:$0xff] %vm720_vm2, %v666_v31  ;;  %763 = vst.msk [vmem:[%s1490_s3 + $0x150] sm:$0xff] %vm720_vm2, %v698_v32  ;;  %v667_v42 = vmax.f32 %v445_v33, 0.0  ;;  %v699_v43 = vmax.f32 %v573_v34, 0.0 }
  0xf7   :  { %729 = vst.msk [vmem:[%s1490_s3 + $0x40] sm:$0xff] %vm720_vm2, %v664_v38  ;;  %761 = vst.msk [vmem:[%s1490_s3 + $0x140] sm:$0xff] %vm720_vm2, %v696_v39  ;;  %v665_v44 = vmax.f32 %v437_v40, 0.0  ;;  %v697_v45 = vmax.f32 %v565_v41, 0.0 }
  0xf8   :  { %732 = vst.msk [vmem:[%s1490_s3 + $0x58] sm:$0xff] %vm720_vm2, %v667_v42  ;;  %764 = vst.msk [vmem:[%s1490_s3 + $0x158] sm:$0xff] %vm720_vm2, %v699_v43 }
  0xf9   :  { %730 = vst.msk [vmem:[%s1490_s3 + $0x48] sm:$0xff] %vm720_vm2, %v665_v44  ;;  %762 = vst.msk [vmem:[%s1490_s3 + $0x148] sm:$0xff] %vm720_vm2, %v697_v45  ;;  %v912_v46 = vpop.f32.mrb[12].mxu0  ;;  %v944_v47 = vpop.f32.mrb[12].mxu1 }
  0xfa   :  { %v458_v48 = vadd.f32 %v912_v46, %v1165_v36  ;;  %v586_v49 = vadd.f32 %v944_v47, %v1165_v36  ;;  %v449_v50 = vpop.f32.mrb[13].mxu0  ;;  %v577_v51 = vpop.f32.mrb[13].mxu1 }
  0xfb   :  { %v450_v52 = vadd.f32 %v1165_v36, %v449_v50  ;;  %v578_v53 = vadd.f32 %v1165_v36, %v577_v51  ;;  %v913_v54 = vpop.f32.mrb[14].mxu0  ;;  %v945_v55 = vpop.f32.mrb[14].mxu1 }
  0xfc   :  { %v670_v56 = vmax.f32 %v458_v48, 0.0  ;;  %v702_v57 = vmax.f32 %v586_v49, 0.0  ;;  %v461_v58 = vadd.f32 %v913_v54, %v1165_v36  ;;  %v589_v59 = vadd.f32 %v945_v55, %v1165_v36  ;;  %v452_v60 = vpop.f32.mrb[15].mxu0  ;;  %v580_v61 = vpop.f32.mrb[15].mxu1 }
  0xfd   :  { %v668_v62 = vmax.f32 %v450_v52, 0.0  ;;  %v700_v63 = vmax.f32 %v578_v53, 0.0  ;;  %v453_v0 = vadd.f32 %v1165_v36, %v452_v60  ;;  %v581_v1 = vadd.f32 %v1165_v36, %v580_v61 }
  0xfe   :  { %735 = vst.msk [vmem:[%s1490_s3 + $0x70] sm:$0xff] %vm720_vm2, %v670_v56  ;;  %767 = vst.msk [vmem:[%s1490_s3 + $0x170] sm:$0xff] %vm720_vm2, %v702_v57  ;;  %v671_v2 = vmax.f32 %v461_v58, 0.0  ;;  %v703_v3 = vmax.f32 %v589_v59, 0.0 }
  0xff   :  { %733 = vst.msk [vmem:[%s1490_s3 + $0x60] sm:$0xff] %vm720_vm2, %v668_v62  ;;  %765 = vst.msk [vmem:[%s1490_s3 + $0x160] sm:$0xff] %vm720_vm2, %v700_v63  ;;  %v669_v4 = vmax.f32 %v453_v0, 0.0  ;;  %v701_v5 = vmax.f32 %v581_v1, 0.0 }
 0x100   :  { %736 = vst.msk [vmem:[%s1490_s3 + $0x78] sm:$0xff] %vm720_vm2, %v671_v2  ;;  %768 = vst.msk [vmem:[%s1490_s3 + $0x178] sm:$0xff] %vm720_vm2, %v703_v3 }
 0x101   :  { %734 = vst.msk [vmem:[%s1490_s3 + $0x68] sm:$0xff] %vm720_vm2, %v669_v4  ;;  %766 = vst.msk [vmem:[%s1490_s3 + $0x168] sm:$0xff] %vm720_vm2, %v701_v5  ;;  %v916_v6 = vpop.f32.mrb[16].mxu0  ;;  %v948_v7 = vpop.f32.mrb[16].mxu1 }
 0x102   :  { %v474_v8 = vadd.f32 %v916_v6, %v1165_v36  ;;  %v602_v9 = vadd.f32 %v948_v7, %v1165_v36  ;;  %v465_v10 = vpop.f32.mrb[17].mxu0  ;;  %v593_v11 = vpop.f32.mrb[17].mxu1 }
 0x103   :  { %v466_v12 = vadd.f32 %v1165_v36, %v465_v10  ;;  %v594_v13 = vadd.f32 %v1165_v36, %v593_v11  ;;  %v917_v14 = vpop.f32.mrb[18].mxu0  ;;  %v949_v15 = vpop.f32.mrb[18].mxu1 }
 0x104   :  { %v674_v16 = vmax.f32 %v474_v8, 0.0  ;;  %v706_v17 = vmax.f32 %v602_v9, 0.0  ;;  %v477_v18 = vadd.f32 %v917_v14, %v1165_v36  ;;  %v605_v19 = vadd.f32 %v949_v15, %v1165_v36  ;;  %v468_v20 = vpop.f32.mrb[19].mxu0  ;;  %v596_v21 = vpop.f32.mrb[19].mxu1 }
 0x105   :  { %v672_v22 = vmax.f32 %v466_v12, 0.0  ;;  %v704_v23 = vmax.f32 %v594_v13, 0.0  ;;  %v469_v24 = vadd.f32 %v1165_v36, %v468_v20  ;;  %v597_v25 = vadd.f32 %v1165_v36, %v596_v21 }
 0x106   :  { %739 = vst.msk [vmem:[%s1490_s3 + $0x90] sm:$0xff] %vm720_vm2, %v674_v16  ;;  %771 = vst.msk [vmem:[%s1490_s3 + $0x190] sm:$0xff] %vm720_vm2, %v706_v17  ;;  %v675_v26 = vmax.f32 %v477_v18, 0.0  ;;  %v707_v27 = vmax.f32 %v605_v19, 0.0 }
 0x107   :  { %737 = vst.msk [vmem:[%s1490_s3 + $0x80] sm:$0xff] %vm720_vm2, %v672_v22  ;;  %769 = vst.msk [vmem:[%s1490_s3 + $0x180] sm:$0xff] %vm720_vm2, %v704_v23  ;;  %v673_v28 = vmax.f32 %v469_v24, 0.0  ;;  %v705_v29 = vmax.f32 %v597_v25, 0.0 }
 0x108   :  { %740 = vst.msk [vmem:[%s1490_s3 + $0x98] sm:$0xff] %vm720_vm2, %v675_v26  ;;  %772 = vst.msk [vmem:[%s1490_s3 + $0x198] sm:$0xff] %vm720_vm2, %v707_v27 }
 0x109   :  { %738 = vst.msk [vmem:[%s1490_s3 + $0x88] sm:$0xff] %vm720_vm2, %v673_v28  ;;  %770 = vst.msk [vmem:[%s1490_s3 + $0x188] sm:$0xff] %vm720_vm2, %v705_v29  ;;  %v920_v30 = vpop.f32.mrb[20].mxu0  ;;  %v952_v31 = vpop.f32.mrb[20].mxu1 }
 0x10a   :  { %v490_v32 = vadd.f32 %v920_v30, %v1165_v36  ;;  %v618_v33 = vadd.f32 %v952_v31, %v1165_v36  ;;  %v481_v34 = vpop.f32.mrb[21].mxu0  ;;  %v609_v35 = vpop.f32.mrb[21].mxu1 }
 0x10b   :  { %v482_v37 = vadd.f32 %v1165_v36, %v481_v34  ;;  %v610_v38 = vadd.f32 %v1165_v36, %v609_v35  ;;  %v921_v39 = vpop.f32.mrb[22].mxu0  ;;  %v953_v40 = vpop.f32.mrb[22].mxu1 }
 0x10c   :  { %v678_v41 = vmax.f32 %v490_v32, 0.0  ;;  %v710_v42 = vmax.f32 %v618_v33, 0.0  ;;  %v493_v43 = vadd.f32 %v921_v39, %v1165_v36  ;;  %v621_v44 = vadd.f32 %v953_v40, %v1165_v36  ;;  %v484_v45 = vpop.f32.mrb[23].mxu0  ;;  %v612_v46 = vpop.f32.mrb[23].mxu1 }
 0x10d   :  { %v676_v47 = vmax.f32 %v482_v37, 0.0  ;;  %v708_v48 = vmax.f32 %v610_v38, 0.0  ;;  %v485_v49 = vadd.f32 %v1165_v36, %v484_v45  ;;  %v613_v50 = vadd.f32 %v1165_v36, %v612_v46 }
 0x10e   :  { %743 = vst.msk [vmem:[%s1490_s3 + $0xb0] sm:$0xff] %vm720_vm2, %v678_v41  ;;  %775 = vst.msk [vmem:[%s1490_s3 + $0x1b0] sm:$0xff] %vm720_vm2, %v710_v42  ;;  %v679_v51 = vmax.f32 %v493_v43, 0.0  ;;  %v711_v52 = vmax.f32 %v621_v44, 0.0 }
 0x10f   :  { %741 = vst.msk [vmem:[%s1490_s3 + $0xa0] sm:$0xff] %vm720_vm2, %v676_v47  ;;  %773 = vst.msk [vmem:[%s1490_s3 + $0x1a0] sm:$0xff] %vm720_vm2, %v708_v48  ;;  %v677_v53 = vmax.f32 %v485_v49, 0.0  ;;  %v709_v54 = vmax.f32 %v613_v50, 0.0 }
 0x110   :  { %744 = vst.msk [vmem:[%s1490_s3 + $0xb8] sm:$0xff] %vm720_vm2, %v679_v51  ;;  %776 = vst.msk [vmem:[%s1490_s3 + $0x1b8] sm:$0xff] %vm720_vm2, %v711_v52 }
 0x111   :  { %742 = vst.msk [vmem:[%s1490_s3 + $0xa8] sm:$0xff] %vm720_vm2, %v677_v53  ;;  %774 = vst.msk [vmem:[%s1490_s3 + $0x1a8] sm:$0xff] %vm720_vm2, %v709_v54  ;;  %v924_v55 = vpop.f32.mrb[24].mxu0  ;;  %v956_v56 = vpop.f32.mrb[24].mxu1 }
 0x112   :  { %v506_v57 = vadd.f32 %v924_v55, %v1165_v36  ;;  %v634_v58 = vadd.f32 %v956_v56, %v1165_v36  ;;  %v497_v59 = vpop.f32.mrb[25].mxu0  ;;  %v625_v60 = vpop.f32.mrb[25].mxu1 }
 0x113   :  { %v498_v61 = vadd.f32 %v1165_v36, %v497_v59  ;;  %v626_v62 = vadd.f32 %v1165_v36, %v625_v60  ;;  %v925_v63 = vpop.f32.mrb[26].mxu0  ;;  %v957_v0 = vpop.f32.mrb[26].mxu1 }
 0x114   :  { %v682_v1 = vmax.f32 %v506_v57, 0.0  ;;  %v714_v2 = vmax.f32 %v634_v58, 0.0  ;;  %v509_v3 = vadd.f32 %v925_v63, %v1165_v36  ;;  %v637_v4 = vadd.f32 %v957_v0, %v1165_v36  ;;  %v500_v5 = vpop.f32.mrb[27].mxu0  ;;  %v628_v6 = vpop.f32.mrb[27].mxu1 }
 0x115   :  { %v680_v7 = vmax.f32 %v498_v61, 0.0  ;;  %v712_v8 = vmax.f32 %v626_v62, 0.0  ;;  %v501_v9 = vadd.f32 %v1165_v36, %v500_v5  ;;  %v629_v10 = vadd.f32 %v1165_v36, %v628_v6 }
 0x116   :  { %747 = vst.msk [vmem:[%s1490_s3 + $0xd0] sm:$0xff] %vm720_vm2, %v682_v1  ;;  %779 = vst.msk [vmem:[%s1490_s3 + $0x1d0] sm:$0xff] %vm720_vm2, %v714_v2  ;;  %v683_v11 = vmax.f32 %v509_v3, 0.0  ;;  %v715_v12 = vmax.f32 %v637_v4, 0.0 }
 0x117   :  { %745 = vst.msk [vmem:[%s1490_s3 + $0xc0] sm:$0xff] %vm720_vm2, %v680_v7  ;;  %777 = vst.msk [vmem:[%s1490_s3 + $0x1c0] sm:$0xff] %vm720_vm2, %v712_v8  ;;  %v681_v13 = vmax.f32 %v501_v9, 0.0  ;;  %v713_v14 = vmax.f32 %v629_v10, 0.0 }
 0x118   :  { %748 = vst.msk [vmem:[%s1490_s3 + $0xd8] sm:$0xff] %vm720_vm2, %v683_v11  ;;  %780 = vst.msk [vmem:[%s1490_s3 + $0x1d8] sm:$0xff] %vm720_vm2, %v715_v12 }
 0x119   :  { %746 = vst.msk [vmem:[%s1490_s3 + $0xc8] sm:$0xff] %vm720_vm2, %v681_v13  ;;  %778 = vst.msk [vmem:[%s1490_s3 + $0x1c8] sm:$0xff] %vm720_vm2, %v713_v14  ;;  %v928_v15 = vpop.f32.mrb[28].mxu0  ;;  %v960_v16 = vpop.f32.mrb[28].mxu1 }
 0x11a   :  { %v522_v17 = vadd.f32 %v928_v15, %v1165_v36  ;;  %v650_v18 = vadd.f32 %v960_v16, %v1165_v36  ;;  %v513_v19 = vpop.f32.mrb[29].mxu0  ;;  %v641_v20 = vpop.f32.mrb[29].mxu1 }
 0x11b   :  { %v514_v21 = vadd.f32 %v1165_v36, %v513_v19  ;;  %v642_v22 = vadd.f32 %v1165_v36, %v641_v20  ;;  %v929_v23 = vpop.f32.mrb[30].mxu0  ;;  %v961_v24 = vpop.f32.mrb[30].mxu1 }
 0x11c   :  { %v686_v25 = vmax.f32 %v522_v17, 0.0  ;;  %v718_v26 = vmax.f32 %v650_v18, 0.0  ;;  %v525_v27 = vadd.f32 %v929_v23, %v1165_v36  ;;  %v653_v28 = vadd.f32 %v961_v24, %v1165_v36  ;;  %v516_v29 = vpop.f32.mrb[31].mxu0  ;;  %v644_v30 = vpop.f32.mrb[31].mxu1 }
 0x11d   :  { %v684_v31 = vmax.f32 %v514_v21, 0.0  ;;  %v716_v32 = vmax.f32 %v642_v22, 0.0  ;;  %v517_v33 = vadd.f32 %v1165_v36, %v516_v29  ;;  %v645_v34 = vadd.f32 %v1165_v36, %v644_v30 }
 0x11e   :  { %751 = vst.msk [vmem:[%s1490_s3 + $0xf0] sm:$0xff] %vm720_vm2, %v686_v25  ;;  %783 = vst.msk [vmem:[%s1490_s3 + $0x1f0] sm:$0xff] %vm720_vm2, %v718_v26  ;;  %v687_v35 = vmax.f32 %v525_v27, 0.0  ;;  %v719_v37 = vmax.f32 %v653_v28, 0.0 }
 0x11f   :  { %749 = vst.msk [vmem:[%s1490_s3 + $0xe0] sm:$0xff] %vm720_vm2, %v684_v31  ;;  %781 = vst.msk [vmem:[%s1490_s3 + $0x1e0] sm:$0xff] %vm720_vm2, %v716_v32  ;;  %v685_v36 = vmax.f32 %v517_v33, 0.0  ;;  %v717_v38 = vmax.f32 %v645_v34, 0.0 }
 0x120   :  { %752 = vst.msk [vmem:[%s1490_s3 + $0xf8] sm:$0xff] %vm720_vm2, %v687_v35  ;;  %784 = vst.msk [vmem:[%s1490_s3 + $0x1f8] sm:$0xff] %vm720_vm2, %v719_v37 }
 0x121   :  { %750 = vst.msk [vmem:[%s1490_s3 + $0xe8] sm:$0xff] %vm720_vm2, %v685_v36  ;;  %782 = vst.msk [vmem:[%s1490_s3 + $0x1e8] sm:$0xff] %vm720_vm2, %v717_v38 }

// kernel: grid_world_synpo_forward.6
= control target key start
LH: loop header
LB: loop body
LE: loop exit
PB: predicated region body
PF: predicated region fallthrough
CT: control target
= control target key end

     0   :  { %vm318_vm0 = vcmask 261120   ;;  %vm553_vm1 = vcmask 523264   ;;  %s1036_s1 = inlined_call_operand.vmem [shape: bf16[288,64], index: 1, kind: input, shape index: {}]   ;;  %s1037_s0 = inlined_call_operand.vmem [shape: bf16[128,288], index: 0, kind: input, shape index: {}]   ;;  %s1038_s2 = inlined_call_operand.vmem [shape: f32[1,64], index: 2, kind: input, shape index: {}]   ;;  %s1039_s3 = inlined_call_operand.vmem [shape: f32[128,64], index: 3, kind: output, shape index: {}]  }
   0x1   :  { %v735_v0 = vld [vmem:[%s1036_s1 + $0x40] sm:$0xff]   ;;  %v737_v2 = vld [vmem:[%s1036_s1 + $0x48] sm:$0xff]   ;;  %v739_v4 = vld [vmem:[%s1036_s1 + $0x50] sm:$0xff]  }
   0x2   :  { %v736_v1 = vld [vmem:[%s1036_s1] sm:$0xff]   ;;  %625 = vmatprep.subr.bf16.mxu0 %v735_v0  ;;  %719 = vmatprep.subr.bf16.mxu1 %v735_v0  ;;  %v738_v3 = vld [vmem:[%s1036_s1 + $0x8] sm:$0xff]   ;;  %v740_v5 = vld [vmem:[%s1036_s1 + $0x10] sm:$0xff]  }
   0x3   :  { %626 = vmatpush3.bf16.msra.mxu0 %v736_v1  ;;  %727 = vmatpush3.bf16.msra.mxu1 %v736_v1  ;;  %v741_v6 = vld [vmem:[%s1036_s1 + $0x58] sm:$0xff]   ;;  %v743_v8 = vld [vmem:[%s1036_s1 + $0x60] sm:$0xff]   ;;  %v745_v10 = vld [vmem:[%s1036_s1 + $0x68] sm:$0xff]  }
   0x4   :  { %627 = vmatprep.subr.bf16.mxu0 %v737_v2  ;;  %720 = vmatprep.subr.bf16.mxu1 %v737_v2  ;;  %v742_v7 = vld [vmem:[%s1036_s1 + $0x18] sm:$0xff]   ;;  %v744_v9 = vld [vmem:[%s1036_s1 + $0x20] sm:$0xff]   ;;  %v746_v13 = vld [vmem:[%s1036_s1 + $0x28] sm:$0xff]  }
   0x5   :  { %v753_v11 = vld [vmem:[%s1037_s0 + $0x4] ss:$12 sps:$4 sm:$0xff]   ;;  %v756_v12 = vld [vmem:[%s1037_s0 + $0x94] ss:$12 sps:$4 sm:$0xff]   ;;  %v749_v16 = vld [vmem:[%s1036_s1 + $0x78] sm:$0xff]  }
   0x6   :  { %v747_v14 = vld [vmem:[%s1036_s1 + $0x70] sm:$0xff]   ;;  %375 = vmatprep.mubr.bf16.mxu0 %v753_v11  ;;  %423 = vmatprep.mubr.bf16.mxu1 %v756_v12  ;;  %v750_v17 = vld [vmem:[%s1036_s1 + $0x38] sm:$0xff]   ;;  %v751_v18 = vld [vmem:[%s1037_s0] ss:$12 sps:$4 sm:$0xff]  }
   0x7   :  { %628 = vmatpush3.bf16.msra.mxu0 %v738_v3  ;;  %728 = vmatpush3.bf16.msra.mxu1 %v738_v3  ;;  %v748_v15 = vld [vmem:[%s1036_s1 + $0x30] sm:$0xff]   ;;  %v757_v19 = vld [vmem:[%s1036_s1 + $0x80] sm:$0xff]   ;;  %v758_v21 = vld [vmem:[%s1037_s0 + $0x1c] ss:$12 sps:$4 sm:$0xff]  }
   0x8   :  { %629 = vmatprep.subr.bf16.mxu0 %v739_v4  ;;  %721 = vmatprep.subr.bf16.mxu1 %v739_v4  ;;  %v754_v20 = vld [vmem:[%s1037_s0 + $0x90] ss:$12 sps:$4 sm:$0xff]   ;;  %v760_v22 = vld [vmem:[%s1037_s0 + $0xac] ss:$12 sps:$4 sm:$0xff]   ;;  %v763_v25 = vld [vmem:[%s1037_s0 + $0xa8] ss:$12 sps:$4 sm:$0xff]  }
   0x9   :  { %v764_v23 = vld [vmem:[%s1036_s1 + $0x88] sm:$0xff]   ;;  %v762_v24 = vld [vmem:[%s1037_s0 + $0x18] ss:$12 sps:$4 sm:$0xff]   ;;  %v765_v26 = vld [vmem:[%s1037_s0 + $0x34] ss:$12 sps:$4 sm:$0xff]  }
   0xa   :  { %v767_v27 = vld [vmem:[%s1037_s0 + $0x8] ss:$12 sps:$4 sm:$0xff]   ;;  %v768_v28 = vld [vmem:[%s1037_s0 + $0x30] ss:$12 sps:$4 sm:$0xff]   ;;  %v769_v29 = vld [vmem:[%s1037_s0 + $0x20] ss:$12 sps:$4 sm:$0xff]  }
   0xb   :  { %630 = vmatpush3.bf16.msra.mxu0 %v740_v5  ;;  %729 = vmatpush3.bf16.msra.mxu1 %v740_v5  ;;  %v770_v30 = vld [vmem:[%s1037_s0 + $0x4c] ss:$12 sps:$4 sm:$0xff]   ;;  %v773_v32 = vld [vmem:[%s1037_s0 + $0x48] ss:$12 sps:$4 sm:$0xff]   ;;  %v774_v33 = vld [vmem:[%s1037_s0 + $0x50] ss:$12 sps:$4 sm:$0xff]  }
   0xc   :  { %631 = vmatprep.subr.bf16.mxu0 %v741_v6  ;;  %722 = vmatprep.subr.bf16.mxu1 %v741_v6  ;;  %v772_v31 = vld [vmem:[%s1037_s0 + $0x38] ss:$12 sps:$4 sm:$0xff]   ;;  %v777_v35 = vld [vmem:[%s1037_s0 + $0x68] ss:$12 sps:$4 sm:$0xff]   ;;  %v778_v36 = vld [vmem:[%s1037_s0 + $0x60] ss:$12 sps:$4 sm:$0xff]  }
   0xd   :  { %v775_v34 = vld [vmem:[%s1037_s0 + $0x64] ss:$12 sps:$4 sm:$0xff]   ;;  %v779_v37 = vld [vmem:[%s1037_s0 + $0x80] ss:$12 sps:$4 sm:$0xff]   ;;  %v780_v38 = vld [vmem:[%s1037_s0 + $0x7c] ss:$12 sps:$4 sm:$0xff]  }
   0xe   :  { %v782_v39 = vld [vmem:[%s1037_s0 + $0x98] ss:$12 sps:$4 sm:$0xff]   ;;  %v784_v41 = vld [vmem:[%s1037_s0 + $0xb0] ss:$12 sps:$4 sm:$0xff]   ;;  %v950_v2 = vld [vmem:[%s1038_s2] ss:$0 sm:$0xff] }
   0xf   :  { %632 = vmatpush3.bf16.msra.mxu0 %v742_v7  ;;  %730 = vmatpush3.bf16.msra.mxu1 %v742_v7  ;;  %v783_v40 = vld [vmem:[%s1037_s0 + $0x78] ss:$12 sps:$4 sm:$0xff]  }
  0x10   :  { %633 = vmatprep.subr.bf16.mxu0 %v743_v8  ;;  %723 = vmatprep.subr.bf16.mxu1 %v743_v8 }
  0x13   :  { %634 = vmatpush3.bf16.msra.mxu0 %v744_v9  ;;  %731 = vmatpush3.bf16.msra.mxu1 %v744_v9 }
  0x14   :  { %635 = vmatprep.subr.bf16.mxu0 %v745_v10  ;;  %724 = vmatprep.subr.bf16.mxu1 %v745_v10 }
  0x17   :  { %636 = vmatpush3.bf16.msra.mxu0 %v746_v13  ;;  %732 = vmatpush3.bf16.msra.mxu1 %v746_v13 }
  0x18   :  { %637 = vmatprep.subr.bf16.mxu0 %v747_v14  ;;  %725 = vmatprep.subr.bf16.mxu1 %v747_v14 }
  0x1b   :  { %638 = vmatpush3.bf16.msra.mxu0 %v748_v15  ;;  %733 = vmatpush3.bf16.msra.mxu1 %v748_v15 }
  0x1c   :  { %639 = vmatprep.subr.bf16.mxu0 %v749_v16  ;;  %726 = vmatprep.subr.bf16.mxu1 %v749_v16 }
  0x1f   :  { %640 = vmatpush3.bf16.msra.mxu0 %v750_v17  ;;  %734 = vmatpush3.bf16.msra.mxu1 %v750_v17 }
  0x20   :  { %699 = vmatprep.subr.bf16.mxu1 %v757_v19 }
  0x22   :  { %376 = vmatmul.mubr.bf16.vlgmr.msra.gmra.mrb[0].mxu0 %v751_v18  ;;  %424 = vmatmul.mubr.bf16.vlgmr.msra.gmra.mrb[0].mxu1 %v754_v20 }
  0x23   :  { %700 = vmatpush3.bf16.msra.mxu1 %v757_v19  ;;  %383 = vmatprep.mubr.bf16.mxu0 %v758_v21 }
  0x24   :  { %431 = vmatprep.mubr.bf16.mxu1 %v760_v22  ;;  %701 = vmatprep.subr.bf16.mxu1 %v764_v23 }
  0x27   :  { %702 = vmatpush3.bf16.msra.mxu1 %v764_v23 }
  0x2a   :  { %384 = vmatmul.mubr.bf16.gmra.mrb[4].mxu0 %v762_v24  ;;  %432 = vmatmul.mubr.bf16.gmra.mrb[4].mxu1 %v763_v25 }
  0x2b   :  { %391 = vmatprep.mubr.bf16.mxu0 %v765_v26  ;;  %703 = vmatprep.mubr.msk.bf16.mxu1 %vm318_vm0, %v767_v27 }
  0x32   :  { %392 = vmatmul.mubr.bf16.gmra.mrb[8].mxu0 %v768_v28  ;;  %704 = vmatmul.mubr.msk.bf16.vlgmr.msra.gmra.mrb[8].mxu1 %vm318_vm0, %v769_v29 }
  0x33   :  { %399 = vmatprep.mubr.bf16.mxu0 %v770_v30  ;;  %707 = vmatprep.mubr.msk.bf16.mxu1 %vm318_vm0, %v772_v31 }
  0x3a   :  { %400 = vmatmul.mubr.bf16.gmra.mrb[12].mxu0 %v773_v32  ;;  %708 = vmatmul.mubr.msk.bf16.gmra.mrb[12].mxu1 %vm318_vm0, %v774_v33 }
  0x3b   :  { %407 = vmatprep.mubr.bf16.mxu0 %v775_v34  ;;  %711 = vmatprep.mubr.msk.bf16.mxu1 %vm318_vm0, %v777_v35 }
  0x42   :  { %408 = vmatmul.mubr.bf16.gmra.mrb[16].mxu0 %v778_v36  ;;  %712 = vmatmul.mubr.msk.bf16.gmra.mrb[16].mxu1 %vm318_vm0, %v779_v37 }
  0x43   :  { %415 = vmatprep.mubr.bf16.mxu0 %v780_v38  ;;  %715 = vmatprep.mubr.msk.bf16.mxu1 %vm318_vm0, %v782_v39 }
  0x4a   :  { %416 = vmatmul.mubr.bf16.gmra.mrb[20].mxu0 %v783_v40  ;;  %716 = vmatmul.mubr.msk.bf16.gmra.mrb[20].mxu1 %vm318_vm0, %v784_v41 }
  0xf5   :  { %v641_v42 = vpop.f32.mrb[0].mxu0  ;;  %v677_v43 = vpop.f32.mrb[0].mxu1 }
  0xf6   :  { %v642_v44 = vpop.f32.mrb[1].mxu0  ;;  %v678_v45 = vpop.f32.mrb[1].mxu1 }
  0xf7   :  { %v643_v46 = vadd.f32 %v642_v44, %v641_v42  ;;  %v644_v47 = vpop.f32.mrb[2].mxu0  ;;  %v939_v48 = vadd.f32 %v678_v45, %v677_v43  ;;  %v680_v49 = vpop.f32.mrb[2].mxu1 }
  0xf8   :  { %v645_v50 = vpop.f32.mrb[3].mxu0  ;;  %v681_v51 = vpop.f32.mrb[3].mxu1 }
  0xf9   :  { %v646_v52 = vadd.f32 %v645_v50, %v644_v47  ;;  %v941_v53 = vadd.f32 %v681_v51, %v680_v49  ;;  %v378_v6 = vadd.f32 %v643_v46, %v950_v2 }
  0xfb   :  { %v381_v15 = vadd.f32 %v646_v52, %v950_v2 }
  0xfd   :  { %v647_v54 = vpop.f32.mrb[4].mxu0  ;;  %v683_v55 = vpop.f32.mrb[4].mxu1 }
  0xfe   :  { %v648_v56 = vpop.f32.mrb[5].mxu0  ;;  %v684_v57 = vpop.f32.mrb[5].mxu1 }
  0xff   :  { %v649_v58 = vadd.f32 %v648_v56, %v647_v54  ;;  %v650_v59 = vpop.f32.mrb[6].mxu0  ;;  %v943_v60 = vadd.f32 %v684_v57, %v683_v55  ;;  %v686_v61 = vpop.f32.mrb[6].mxu1 }
 0x100   :  { %v651_v62 = vpop.f32.mrb[7].mxu0  ;;  %v687_v63 = vpop.f32.mrb[7].mxu1 }
 0x101   :  { %v652_v0 = vadd.f32 %v651_v62, %v650_v59  ;;  %v945_v1 = vadd.f32 %v687_v63, %v686_v61  ;;  %v386_v3 = vadd.f32 %v649_v58, %v950_v2  ;;  %v434_v63 = vadd.f32 %v943_v60, %v950_v2 }
 0x103   :  { %v389_v10 = vadd.f32 %v652_v0, %v950_v2 }
 0x105   :  { %v653_v4 = vpop.f32.mrb[8].mxu0  ;;  %v705_v5 = vpop.f32.mrb[8].mxu1 }
 0x106   :  { %v483_v7 = vadd.f32 %v705_v5, %v386_v3  ;;  %v654_v8 = vpop.f32.mrb[9].mxu0  ;;  %v474_v9 = vpop.f32.mrb[9].mxu1 }
 0x107   :  { %v655_v11 = vadd.f32 %v654_v8, %v653_v4  ;;  %v475_v12 = vadd.f32 %v474_v9, %v378_v6  ;;  %v656_v13 = vpop.f32.mrb[10].mxu0  ;;  %v706_v14 = vpop.f32.mrb[10].mxu1  ;;  %v426_v6 = vadd.f32 %v939_v48, %v950_v2 }
 0x108   :  { %v539_v16 = vmax.f32 %v483_v7, 0.0  ;;  %v486_v17 = vadd.f32 %v706_v14, %v389_v10  ;;  %v657_v18 = vpop.f32.mrb[11].mxu0  ;;  %v477_v19 = vpop.f32.mrb[11].mxu1  ;;  %v437_v10 = vadd.f32 %v945_v1, %v950_v2 }
 0x109   :  { %v537_v20 = vmax.f32 %v475_v12, 0.0  ;;  %v658_v21 = vadd.f32 %v657_v18, %v656_v13  ;;  %v478_v22 = vadd.f32 %v477_v19, %v381_v15  ;;  %v394_v27 = vadd.f32 %v655_v11, %v950_v2 }
 0x10a   :  { %556 = vst.msk [vmem:[%s1039_s3 + $0x10] sm:$0xff] %vm553_vm1, %v539_v16  ;;  %v540_v23 = vmax.f32 %v486_v17, 0.0  ;;  %v429_v15 = vadd.f32 %v941_v53, %v950_v2 }
 0x10b   :  { %554 = vst.msk [vmem:[%s1039_s3] sm:$0xff] %vm553_vm1, %v537_v20  ;;  %v538_v24 = vmax.f32 %v478_v22, 0.0  ;;  %v397_v34 = vadd.f32 %v658_v21, %v950_v2 }
 0x10c   :  { %557 = vst.msk [vmem:[%s1039_s3 + $0x18] sm:$0xff] %vm553_vm1, %v540_v23 }
 0x10d   :  { %555 = vst.msk [vmem:[%s1039_s3 + $0x8] sm:$0xff] %vm553_vm1, %v538_v24  ;;  %v659_v25 = vpop.f32.mrb[12].mxu0  ;;  %v709_v26 = vpop.f32.mrb[12].mxu1 }
 0x10e   :  { %v660_v28 = vpop.f32.mrb[13].mxu0  ;;  %v490_v29 = vpop.f32.mrb[13].mxu1 }
 0x10f   :  { %v661_v30 = vadd.f32 %v660_v28, %v659_v25  ;;  %v491_v31 = vadd.f32 %v490_v29, %v394_v27  ;;  %v662_v32 = vpop.f32.mrb[14].mxu0  ;;  %v710_v33 = vpop.f32.mrb[14].mxu1 }
 0x110   :  { %v663_v35 = vpop.f32.mrb[15].mxu0  ;;  %v493_v36 = vpop.f32.mrb[15].mxu1 }
 0x111   :  { %v402_v37 = vadd.f32 %v661_v30, %v950_v2  ;;  %v541_v38 = vmax.f32 %v491_v31, 0.0  ;;  %v664_v39 = vadd.f32 %v663_v35, %v662_v32  ;;  %v494_v40 = vadd.f32 %v493_v36, %v397_v34 }
 0x113   :  { %v499_v41 = vadd.f32 %v709_v26, %v402_v37  ;;  %558 = vst.msk [vmem:[%s1039_s3 + $0x20] sm:$0xff] %vm553_vm1, %v541_v38  ;;  %v405_v42 = vadd.f32 %v664_v39, %v950_v2  ;;  %v542_v43 = vmax.f32 %v494_v40, 0.0 }
 0x115   :  { %v543_v44 = vmax.f32 %v499_v41, 0.0  ;;  %v502_v45 = vadd.f32 %v710_v33, %v405_v42  ;;  %559 = vst.msk [vmem:[%s1039_s3 + $0x28] sm:$0xff] %vm553_vm1, %v542_v43  ;;  %v665_v46 = vpop.f32.mrb[16].mxu0  ;;  %v713_v47 = vpop.f32.mrb[16].mxu1 }
 0x116   :  { %v666_v49 = vpop.f32.mrb[17].mxu0  ;;  %v506_v50 = vpop.f32.mrb[17].mxu1 }
 0x117   :  { %560 = vst.msk [vmem:[%s1039_s3 + $0x30] sm:$0xff] %vm553_vm1, %v543_v44  ;;  %v544_v51 = vmax.f32 %v502_v45, 0.0  ;;  %v667_v52 = vadd.f32 %v666_v49, %v665_v46  ;;  %v668_v54 = vpop.f32.mrb[18].mxu0  ;;  %v714_v55 = vpop.f32.mrb[18].mxu1 }
 0x118   :  { %v669_v56 = vpop.f32.mrb[19].mxu0  ;;  %v509_v57 = vpop.f32.mrb[19].mxu1 }
 0x119   :  { %561 = vst.msk [vmem:[%s1039_s3 + $0x38] sm:$0xff] %vm553_vm1, %v544_v51  ;;  %v410_v58 = vadd.f32 %v667_v52, %v950_v2  ;;  %v670_v59 = vadd.f32 %v669_v56, %v668_v54 }
 0x11b   :  { %v507_v61 = vadd.f32 %v506_v50, %v410_v58  ;;  %v413_v62 = vadd.f32 %v670_v59, %v950_v2 }
 0x11d   :  { %v545_v0 = vmax.f32 %v507_v61, 0.0  ;;  %v510_v3 = vadd.f32 %v509_v57, %v413_v62  ;;  %v671_v4 = vpop.f32.mrb[20].mxu0  ;;  %v717_v5 = vpop.f32.mrb[20].mxu1 }
 0x11e   :  { %v531_v7 = vadd.f32 %v717_v5, %v434_v63  ;;  %v672_v8 = vpop.f32.mrb[21].mxu0  ;;  %v522_v9 = vpop.f32.mrb[21].mxu1 }
 0x11f   :  { %562 = vst.msk [vmem:[%s1039_s3 + $0x40] sm:$0xff] %vm553_vm1, %v545_v0  ;;  %v546_v11 = vmax.f32 %v510_v3, 0.0  ;;  %v673_v60 = vadd.f32 %v672_v8, %v671_v4  ;;  %v523_v12 = vadd.f32 %v522_v9, %v426_v6  ;;  %v674_v13 = vpop.f32.mrb[22].mxu0  ;;  %v718_v14 = vpop.f32.mrb[22].mxu1 }
 0x120   :  { %v551_v48 = vmax.f32 %v531_v7, 0.0  ;;  %v534_v16 = vadd.f32 %v718_v14, %v437_v10  ;;  %v675_v17 = vpop.f32.mrb[23].mxu0  ;;  %v525_v18 = vpop.f32.mrb[23].mxu1 }
 0x121   :  { %563 = vst.msk [vmem:[%s1039_s3 + $0x48] sm:$0xff] %vm553_vm1, %v546_v11  ;;  %v418_v1 = vadd.f32 %v673_v60, %v950_v2  ;;  %v549_v19 = vmax.f32 %v523_v12, 0.0  ;;  %v676_v20 = vadd.f32 %v675_v17, %v674_v13  ;;  %v526_v21 = vadd.f32 %v525_v18, %v429_v15 }
 0x122   :  { %568 = vst.msk [vmem:[%s1039_s3 + $0x70] sm:$0xff] %vm553_vm1, %v551_v48  ;;  %v552_v53 = vmax.f32 %v534_v16, 0.0 }
 0x123   :  { %v515_v22 = vadd.f32 %v713_v47, %v418_v1  ;;  %566 = vst.msk [vmem:[%s1039_s3 + $0x60] sm:$0xff] %vm553_vm1, %v549_v19  ;;  %v421_v23 = vadd.f32 %v676_v20, %v950_v2  ;;  %v550_v24 = vmax.f32 %v526_v21, 0.0 }
 0x124   :  { %569 = vst.msk [vmem:[%s1039_s3 + $0x78] sm:$0xff] %vm553_vm1, %v552_v53 }
 0x125   :  { %v547_v25 = vmax.f32 %v515_v22, 0.0  ;;  %v518_v26 = vadd.f32 %v714_v55, %v421_v23  ;;  %567 = vst.msk [vmem:[%s1039_s3 + $0x68] sm:$0xff] %vm553_vm1, %v550_v24 }
 0x127   :  { %564 = vst.msk [vmem:[%s1039_s3 + $0x50] sm:$0xff] %vm553_vm1, %v547_v25  ;;  %v548_v27 = vmax.f32 %v518_v26, 0.0 }
 0x129   :  { %565 = vst.msk [vmem:[%s1039_s3 + $0x58] sm:$0xff] %vm553_vm1, %v548_v27 }

// kernel: grid_world_synpo_forward.7
= control target key start
LH: loop header
LB: loop body
LE: loop exit
PB: predicated region body
PF: predicated region fallthrough
CT: control target
= control target key end

     0   :  { %vm372_vm0 = vcmask 523264   ;;  %s884_s1 = inlined_call_operand.vmem [shape: bf16[576,128], index: 1, kind: input, shape index: {}]   ;;  %s885_s0 = inlined_call_operand.vmem [shape: bf16[32,576], index: 0, kind: input, shape index: {}]   ;;  %s886_s2 = inlined_call_operand.vmem [shape: f32[1,128], index: 2, kind: input, shape index: {}]   ;;  %s887_s3 = inlined_call_operand.vmem [shape: f32[32,128], index: 3, kind: output, shape index: {}]  }
   0x1   :  { %v661_v0 = vld [vmem:[%s884_s1 + $0x40] sm:$0xff]   ;;  %v665_v4 = vld [vmem:[%s884_s1 + $0x48] sm:$0xff]   ;;  %v669_v8 = vld [vmem:[%s884_s1 + $0x50] sm:$0xff]  }
   0x2   :  { %v662_v1 = vld [vmem:[%s884_s1] sm:$0xff]   ;;  %587 = vmatprep.subr.bf16.mxu0 %v661_v0  ;;  %v666_v5 = vld [vmem:[%s884_s1 + $0x8] sm:$0xff]   ;;  %v670_v9 = vld [vmem:[%s884_s1 + $0x10] sm:$0xff]  }
   0x3   :  { %v663_v2 = vld [vmem:[%s884_s1 + $0xc0] sm:$0xff]   ;;  %588 = vmatpush3.bf16.msra.mxu0 %v662_v1  ;;  %v667_v6 = vld [vmem:[%s884_s1 + $0xc8] sm:$0xff]   ;;  %v671_v10 = vld [vmem:[%s884_s1 + $0xd0] sm:$0xff]  }
   0x4   :  { %v664_v3 = vld [vmem:[%s884_s1 + $0x80] sm:$0xff]   ;;  %615 = vmatprep.subr.bf16.mxu1 %v663_v2  ;;  %589 = vmatprep.subr.bf16.mxu0 %v665_v4  ;;  %v668_v7 = vld [vmem:[%s884_s1 + $0x88] sm:$0xff]   ;;  %v672_v11 = vld [vmem:[%s884_s1 + $0x90] sm:$0xff]  }
   0x5   :  { %616 = vmatpush3.bf16.msra.mxu1 %v664_v3  ;;  %v673_v12 = vld [vmem:[%s884_s1 + $0x58] sm:$0xff]   ;;  %v677_v16 = vld [vmem:[%s884_s1 + $0x60] sm:$0xff]   ;;  %v681_v20 = vld [vmem:[%s884_s1 + $0x68] sm:$0xff]  }
   0x6   :  { %617 = vmatprep.subr.bf16.mxu1 %v667_v6  ;;  %v674_v13 = vld [vmem:[%s884_s1 + $0x18] sm:$0xff]   ;;  %v678_v17 = vld [vmem:[%s884_s1 + $0x20] sm:$0xff]   ;;  %v682_v21 = vld [vmem:[%s884_s1 + $0x28] sm:$0xff]  }
   0x7   :  { %590 = vmatpush3.bf16.msra.mxu0 %v666_v5  ;;  %v675_v14 = vld [vmem:[%s884_s1 + $0xd8] sm:$0xff]   ;;  %v679_v18 = vld [vmem:[%s884_s1 + $0xe0] sm:$0xff]   ;;  %v683_v22 = vld [vmem:[%s884_s1 + $0xe8] sm:$0xff]  }
   0x8   :  { %591 = vmatprep.subr.bf16.mxu0 %v669_v8  ;;  %v676_v15 = vld [vmem:[%s884_s1 + $0x98] sm:$0xff]   ;;  %v680_v19 = vld [vmem:[%s884_s1 + $0xa0] sm:$0xff]   ;;  %v684_v23 = vld [vmem:[%s884_s1 + $0xa8] sm:$0xff]  }
   0x9   :  { %618 = vmatpush3.bf16.msra.mxu1 %v668_v7  ;;  %v685_v24 = vld [vmem:[%s884_s1 + $0x70] sm:$0xff]   ;;  %v689_v28 = vld [vmem:[%s884_s1 + $0x78] sm:$0xff]   ;;  %v696_v34 = vld [vmem:[%s884_s1 + $0x100] sm:$0xff]  }
   0xa   :  { %619 = vmatprep.subr.bf16.mxu1 %v671_v10  ;;  %v686_v25 = vld [vmem:[%s884_s1 + $0x30] sm:$0xff]   ;;  %v690_v29 = vld [vmem:[%s884_s1 + $0x38] sm:$0xff]   ;;  %v699_v36 = vld [vmem:[%s885_s0 + $0xc] ss:$20 sps:$4 sm:$0xff]  }
   0xb   :  { %592 = vmatpush3.bf16.msra.mxu0 %v670_v9  ;;  %v687_v26 = vld [vmem:[%s884_s1 + $0xf0] sm:$0xff]   ;;  %v691_v30 = vld [vmem:[%s884_s1 + $0xf8] sm:$0xff]   ;;  %v700_v37 = vld [vmem:[%s884_s1 + $0x108] sm:$0xff]   ;;  %460 = vmatprep.mubr.bf16.mxu1 %v699_v36 }
   0xc   :  { %593 = vmatprep.subr.bf16.mxu0 %v673_v12  ;;  %v688_v27 = vld [vmem:[%s884_s1 + $0xb0] sm:$0xff]   ;;  %v694_v32 = vld [vmem:[%s885_s0 + $0x4] ss:$20 sps:$4 sm:$0xff]   ;;  %v697_v35 = vld [vmem:[%s885_s0 + $0x8] ss:$20 sps:$4 sm:$0xff]  }
   0xd   :  { %620 = vmatpush3.bf16.msra.mxu1 %v672_v11  ;;  %v692_v31 = vld [vmem:[%s885_s0] ss:$20 sps:$4 sm:$0xff]   ;;  %v695_v33 = vld [vmem:[%s884_s1 + $0xb8] sm:$0xff]   ;;  %411 = vmatprep.mubr.bf16.mxu0 %v694_v32  ;;  %v707_v42 = vld [vmem:[%s885_s0 + $0x30] ss:$20 sps:$4 sm:$0xff]  }
   0xe   :  { %621 = vmatprep.subr.bf16.mxu1 %v675_v14  ;;  %v701_v38 = vld [vmem:[%s885_s0 + $0x2c] ss:$20 sps:$4 sm:$0xff]   ;;  %v703_v39 = vld [vmem:[%s885_s0 + $0x28] ss:$20 sps:$4 sm:$0xff]   ;;  %v704_v40 = vld [vmem:[%s884_s1 + $0x110] sm:$0xff]  }
   0xf   :  { %594 = vmatpush3.bf16.msra.mxu0 %v674_v13  ;;  %v705_v41 = vld [vmem:[%s885_s0 + $0x34] ss:$20 sps:$4 sm:$0xff]   ;;  %v708_v43 = vld [vmem:[%s884_s1 + $0x118] sm:$0xff]   ;;  %v709_v44 = vld [vmem:[%s885_s0 + $0x10] ss:$20 sps:$4 sm:$0xff]  }
  0x10   :  { %595 = vmatprep.subr.bf16.mxu0 %v677_v16  ;;  %v710_v45 = vld [vmem:[%s885_s0 + $0x38] ss:$20 sps:$4 sm:$0xff]   ;;  %v538_v47 = vld [vmem:[%s886_s2] ss:$0 sm:$0xff] }
  0x11   :  { %622 = vmatpush3.bf16.msra.mxu1 %v676_v15 }
  0x12   :  { %623 = vmatprep.subr.bf16.mxu1 %v679_v18 }
  0x13   :  { %596 = vmatpush3.bf16.msra.mxu0 %v678_v17 }
  0x14   :  { %597 = vmatprep.subr.bf16.mxu0 %v681_v20 }
  0x15   :  { %624 = vmatpush3.bf16.msra.mxu1 %v680_v19 }
  0x16   :  { %625 = vmatprep.subr.bf16.mxu1 %v683_v22 }
  0x17   :  { %598 = vmatpush3.bf16.msra.mxu0 %v682_v21 }
  0x18   :  { %599 = vmatprep.subr.bf16.mxu0 %v685_v24 }
  0x19   :  { %626 = vmatpush3.bf16.msra.mxu1 %v684_v23 }
  0x1a   :  { %627 = vmatprep.subr.bf16.mxu1 %v687_v26 }
  0x1b   :  { %600 = vmatpush3.bf16.msra.mxu0 %v686_v25 }
  0x1c   :  { %601 = vmatprep.subr.bf16.mxu0 %v689_v28 }
  0x1d   :  { %628 = vmatpush3.bf16.msra.mxu1 %v688_v27 }
  0x1e   :  { %629 = vmatprep.subr.bf16.mxu1 %v691_v30 }
  0x1f   :  { %602 = vmatpush3.bf16.msra.mxu0 %v690_v29 }
  0x20   :  { %649 = vmatprep.subr.bf16.mxu0 %v696_v34 }
  0x21   :  { %630 = vmatpush3.bf16.msra.mxu1 %v695_v33 }
  0x22   :  { %412 = vmatmul.mubr.bf16.vlgmr.msra.gmra.mrb[0].mxu0 %v692_v31 }
  0x23   :  { %650 = vmatpush3.bf16.msra.mxu0 %v696_v34  ;;  %419 = vmatprep.mubr.bf16.mxu0 %v701_v38 }
  0x24   :  { %461 = vmatmul.mubr.bf16.vlgmr.msra.gmra.mrb[0].mxu1 %v697_v35  ;;  %651 = vmatprep.subr.bf16.mxu0 %v700_v37 }
  0x25   :  { %468 = vmatprep.mubr.bf16.mxu1 %v705_v41 }
  0x27   :  { %652 = vmatpush3.bf16.msra.mxu0 %v700_v37 }
  0x28   :  { %653 = vmatprep.subr.bf16.mxu0 %v704_v40 }
  0x2a   :  { %420 = vmatmul.mubr.bf16.gmra.mrb[4].mxu0 %v703_v39 }
  0x2b   :  { %657 = vmatprep.mubr.msk.bf16.mxu0 %vm372_vm0, %v709_v44  ;;  %654 = vmatpush3.bf16.msra.mxu0 %v704_v40 }
  0x2c   :  { %469 = vmatmul.mubr.bf16.gmra.mrb[4].mxu1 %v707_v42  ;;  %655 = vmatprep.subr.bf16.mxu0 %v708_v43 }
  0x2f   :  { %656 = vmatpush3.bf16.msra.mxu0 %v708_v43 }
  0x32   :  { %658 = vmatmul.mubr.msk.bf16.vlgmr.msra.gmra.mrb[8].mxu0 %vm372_vm0, %v710_v45 }
  0xf5   :  { %v603_v46 = vpop.f32.mrb[0].mxu0 }
  0xf6   :  { %v604_v48 = vpop.f32.mrb[1].mxu0 }
  0xf7   :  { %v605_v49 = vadd.f32 %v604_v48, %v603_v46  ;;  %v606_v50 = vpop.f32.mrb[2].mxu0  ;;  %v631_v51 = vpop.f32.mrb[0].mxu1 }
  0xf8   :  { %v607_v52 = vpop.f32.mrb[3].mxu0  ;;  %v632_v55 = vpop.f32.mrb[1].mxu1 }
  0xf9   :  { %v414_v53 = vadd.f32 %v605_v49, %v538_v47  ;;  %v608_v54 = vadd.f32 %v607_v52, %v606_v50  ;;  %v633_v56 = vadd.f32 %v632_v55, %v631_v51  ;;  %v634_v57 = vpop.f32.mrb[2].mxu1 }
  0xfa   :  { %v635_v59 = vpop.f32.mrb[3].mxu1 }
  0xfb   :  { %v417_v58 = vadd.f32 %v608_v54, %v538_v47  ;;  %v636_v60 = vadd.f32 %v635_v59, %v634_v57  ;;  %v463_v61 = vadd.f32 %v633_v56, %v414_v53 }
  0xfd   :  { %v609_v62 = vpop.f32.mrb[4].mxu0  ;;  %v466_v0 = vadd.f32 %v636_v60, %v417_v58 }
  0xfe   :  { %v610_v63 = vpop.f32.mrb[5].mxu0 }
  0xff   :  { %v611_v1 = vadd.f32 %v610_v63, %v609_v62  ;;  %v612_v2 = vpop.f32.mrb[6].mxu0  ;;  %v637_v3 = vpop.f32.mrb[4].mxu1 }
 0x100   :  { %v613_v4 = vpop.f32.mrb[7].mxu0  ;;  %v638_v7 = vpop.f32.mrb[5].mxu1 }
 0x101   :  { %v422_v5 = vadd.f32 %v611_v1, %v538_v47  ;;  %v614_v6 = vadd.f32 %v613_v4, %v612_v2  ;;  %v639_v8 = vadd.f32 %v638_v7, %v637_v3  ;;  %v640_v9 = vpop.f32.mrb[6].mxu1 }
 0x102   :  { %v641_v11 = vpop.f32.mrb[7].mxu1 }
 0x103   :  { %v425_v10 = vadd.f32 %v614_v6, %v538_v47  ;;  %v642_v12 = vadd.f32 %v641_v11, %v640_v9  ;;  %v471_v13 = vadd.f32 %v639_v8, %v422_v5 }
 0x105   :  { %v659_v14 = vpop.f32.mrb[8].mxu0  ;;  %v474_v15 = vadd.f32 %v642_v12, %v425_v10 }
 0x106   :  { %v520_v16 = vadd.f32 %v659_v14, %v471_v13  ;;  %v511_v17 = vpop.f32.mrb[9].mxu0 }
 0x107   :  { %v512_v18 = vadd.f32 %v511_v17, %v463_v61  ;;  %v660_v19 = vpop.f32.mrb[10].mxu0 }
 0x108   :  { %v528_v20 = vmax.f32 %v520_v16, 0.0  ;;  %v523_v21 = vadd.f32 %v660_v19, %v474_v15  ;;  %v514_v22 = vpop.f32.mrb[11].mxu0 }
 0x109   :  { %v526_v23 = vmax.f32 %v512_v18, 0.0  ;;  %v515_v24 = vadd.f32 %v514_v22, %v466_v0 }
 0x10a   :  { %532 = vst [vmem:[%s887_s3 + $0x10] sm:$0xff] %v528_v20  ;;  %v529_v25 = vmax.f32 %v523_v21, 0.0 }
 0x10b   :  { %530 = vst [vmem:[%s887_s3] sm:$0xff] %v526_v23  ;;  %v527_v26 = vmax.f32 %v515_v24, 0.0 }
 0x10c   :  { %533 = vst [vmem:[%s887_s3 + $0x18] sm:$0xff] %v529_v25 }
 0x10d   :  { %531 = vst [vmem:[%s887_s3 + $0x8] sm:$0xff] %v527_v26 }

// kernel: grid_world_synpo_forward.8
= control target key start
LH: loop header
LB: loop body
LE: loop exit
PB: predicated region body
PF: predicated region fallthrough
CT: control target
= control target key end

     0   :  { %vm1125_vm0 = vmmov 0   ;;  %vm836_vm1 = vcmask 261120   ;;  %s1383_s1 = inlined_call_operand.vmem [shape: bf16[1152,32], index: 1, kind: input, shape index: {}]   ;;  %s1384_s0 = inlined_call_operand.vmem [shape: bf16[8,1152], index: 0, kind: input, shape index: {}]   ;;  %s1385_s2 = inlined_call_operand.vmem [shape: f32[1,32], index: 2, kind: input, shape index: {}]   ;;  %s1386_s3 = inlined_call_operand.vmem [shape: f32[8,32], index: 3, kind: output, shape index: {}]  }
   0x1   :  { %v1043_v0 = vld [vmem:[%s1383_s1 + $0x40] sm:$0xff]   ;;  %v1047_v4 = vld [vmem:[%s1383_s1 + $0x48] sm:$0xff]   ;;  %v1051_v8 = vld [vmem:[%s1383_s1 + $0x50] sm:$0xff]  }
   0x2   :  { %v1044_v1 = vld [vmem:[%s1383_s1] sm:$0xff]   ;;  %924 = vmatprep.subr.bf16.mxu0 %v1043_v0  ;;  %v1048_v5 = vld [vmem:[%s1383_s1 + $0x8] sm:$0xff]   ;;  %v1052_v9 = vld [vmem:[%s1383_s1 + $0x10] sm:$0xff]  }
   0x3   :  { %v1045_v2 = vld [vmem:[%s1383_s1 + $0xc0] sm:$0xff]   ;;  %925 = vmatpush3.bf16.msra.mxu0 %v1044_v1  ;;  %v1049_v6 = vld [vmem:[%s1383_s1 + $0xc8] sm:$0xff]   ;;  %v1053_v10 = vld [vmem:[%s1383_s1 + $0xd0] sm:$0xff]  }
   0x4   :  { %v1046_v3 = vld [vmem:[%s1383_s1 + $0x80] sm:$0xff]   ;;  %946 = vmatprep.subr.bf16.mxu1 %v1045_v2  ;;  %926 = vmatprep.subr.bf16.mxu0 %v1047_v4  ;;  %v1050_v7 = vld [vmem:[%s1383_s1 + $0x88] sm:$0xff]   ;;  %v1054_v11 = vld [vmem:[%s1383_s1 + $0x90] sm:$0xff]  }
   0x5   :  { %947 = vmatpush3.bf16.msra.mxu1 %v1046_v3  ;;  %v1055_v12 = vld [vmem:[%s1383_s1 + $0x58] sm:$0xff]   ;;  %v1059_v16 = vld [vmem:[%s1383_s1 + $0x60] sm:$0xff]   ;;  %v1063_v20 = vld [vmem:[%s1383_s1 + $0x68] sm:$0xff]  }
   0x6   :  { %948 = vmatprep.subr.bf16.mxu1 %v1049_v6  ;;  %v1056_v13 = vld [vmem:[%s1383_s1 + $0x18] sm:$0xff]   ;;  %v1060_v17 = vld [vmem:[%s1383_s1 + $0x20] sm:$0xff]   ;;  %v1064_v21 = vld [vmem:[%s1383_s1 + $0x28] sm:$0xff]  }
   0x7   :  { %927 = vmatpush3.bf16.msra.mxu0 %v1048_v5  ;;  %v1057_v14 = vld [vmem:[%s1383_s1 + $0xd8] sm:$0xff]   ;;  %v1061_v18 = vld [vmem:[%s1383_s1 + $0xe0] sm:$0xff]   ;;  %v1065_v22 = vld [vmem:[%s1383_s1 + $0xe8] sm:$0xff]  }
   0x8   :  { %928 = vmatprep.subr.bf16.mxu0 %v1051_v8  ;;  %v1058_v15 = vld [vmem:[%s1383_s1 + $0x98] sm:$0xff]   ;;  %v1062_v19 = vld [vmem:[%s1383_s1 + $0xa0] sm:$0xff]   ;;  %v1066_v23 = vld [vmem:[%s1383_s1 + $0xa8] sm:$0xff]  }
   0x9   :  { %949 = vmatpush3.bf16.msra.mxu1 %v1050_v7  ;;  %v1067_v24 = vld [vmem:[%s1383_s1 + $0x70] sm:$0xff]   ;;  %v1071_v28 = vld [vmem:[%s1383_s1 + $0x78] sm:$0xff]   ;;  %v15_v31 = vld [vmem:[%s1384_s0] sm:$0xff] }
   0xa   :  { %950 = vmatprep.subr.bf16.mxu1 %v1053_v10  ;;  %v1068_v25 = vld [vmem:[%s1383_s1 + $0x30] sm:$0xff]   ;;  %v1072_v29 = vld [vmem:[%s1383_s1 + $0x38] sm:$0xff]   ;;  %v843_v32 = vcombine.low %v15_v31, %v15_v31  ;;  %v844_v33 = vcombine.high %v15_v31, %v15_v31  ;;  %v1077_v35 = vld [vmem:[%s1383_s1 + $0x140] sm:$0xff]  }
   0xb   :  { %929 = vmatpush3.bf16.msra.mxu0 %v1052_v9  ;;  %v1069_v26 = vld [vmem:[%s1383_s1 + $0xf0] sm:$0xff]   ;;  %v1073_v30 = vld [vmem:[%s1383_s1 + $0xf8] sm:$0xff]   ;;  %v16_v36 = vld [vmem:[%s1384_s0 + $0x8] sm:$0xff]  ;;  %v1124_v9 = vmov 0.0  }
   0xc   :  { %930 = vmatprep.subr.bf16.mxu0 %v1055_v12  ;;  %v1070_v27 = vld [vmem:[%s1383_s1 + $0xb0] sm:$0xff]   ;;  %v1076_v34 = vld [vmem:[%s1383_s1 + $0xb8] sm:$0xff]   ;;  %667 = vmatprep.mubr.bf16.mxu0 %v844_v33  ;;  %v845_v37 = vcombine.low %v16_v36, %v16_v36  ;;  %v846_v38 = vcombine.high %v16_v36, %v16_v36  ;;  %v1080_v39 = vld [vmem:[%s1383_s1 + $0x100] sm:$0xff]  }
   0xd   :  { %951 = vmatpush3.bf16.msra.mxu1 %v1054_v11  ;;  %v1081_v40 = vld [vmem:[%s1383_s1 + $0x1c0] sm:$0xff]   ;;  %v1083_v42 = vld [vmem:[%s1383_s1 + $0x148] sm:$0xff]   ;;  %v1087_v46 = vld [vmem:[%s1383_s1 + $0x150] sm:$0xff]  }
   0xe   :  { %952 = vmatprep.subr.bf16.mxu1 %v1057_v14  ;;  %707 = vmatprep.mubr.bf16.mxu1 %v846_v38  ;;  %v1082_v41 = vld [vmem:[%s1383_s1 + $0x180] sm:$0xff]   ;;  %v1084_v43 = vld [vmem:[%s1383_s1 + $0x108] sm:$0xff]   ;;  %v1088_v47 = vld [vmem:[%s1383_s1 + $0x110] sm:$0xff]  }
   0xf   :  { %931 = vmatpush3.bf16.msra.mxu0 %v1056_v13  ;;  %v1085_v44 = vld [vmem:[%s1383_s1 + $0x1c8] sm:$0xff]   ;;  %v1089_v48 = vld [vmem:[%s1383_s1 + $0x1d0] sm:$0xff]   ;;  %v1091_v50 = vld [vmem:[%s1383_s1 + $0x158] sm:$0xff]  }
  0x10   :  { %932 = vmatprep.subr.bf16.mxu0 %v1059_v16  ;;  %v1086_v45 = vld [vmem:[%s1383_s1 + $0x188] sm:$0xff]   ;;  %v1090_v49 = vld [vmem:[%s1383_s1 + $0x190] sm:$0xff]   ;;  %v1092_v51 = vld [vmem:[%s1383_s1 + $0x118] sm:$0xff]  }
  0x11   :  { %953 = vmatpush3.bf16.msra.mxu1 %v1058_v15  ;;  %v1093_v52 = vld [vmem:[%s1383_s1 + $0x1d8] sm:$0xff]   ;;  %v1095_v54 = vld [vmem:[%s1383_s1 + $0x160] sm:$0xff]   ;;  %v1099_v58 = vld [vmem:[%s1383_s1 + $0x168] sm:$0xff]  }
  0x12   :  { %954 = vmatprep.subr.bf16.mxu1 %v1061_v18  ;;  %v1094_v53 = vld [vmem:[%s1383_s1 + $0x198] sm:$0xff]   ;;  %v1096_v55 = vld [vmem:[%s1383_s1 + $0x120] sm:$0xff]   ;;  %v1100_v59 = vld [vmem:[%s1383_s1 + $0x128] sm:$0xff]  }
  0x13   :  { %933 = vmatpush3.bf16.msra.mxu0 %v1060_v17  ;;  %v1097_v56 = vld [vmem:[%s1383_s1 + $0x1e0] sm:$0xff]   ;;  %v1101_v60 = vld [vmem:[%s1383_s1 + $0x1e8] sm:$0xff]   ;;  %v1103_v62 = vld [vmem:[%s1383_s1 + $0x170] sm:$0xff]  }
  0x14   :  { %934 = vmatprep.subr.bf16.mxu0 %v1063_v20  ;;  %v1098_v57 = vld [vmem:[%s1383_s1 + $0x1a0] sm:$0xff]   ;;  %v1102_v61 = vld [vmem:[%s1383_s1 + $0x1a8] sm:$0xff]   ;;  %v1104_v63 = vld [vmem:[%s1383_s1 + $0x130] sm:$0xff]  }
  0x15   :  { %955 = vmatpush3.bf16.msra.mxu1 %v1062_v19  ;;  %v1105_v0 = vld [vmem:[%s1383_s1 + $0x1f0] sm:$0xff]   ;;  %v1107_v2 = vld [vmem:[%s1383_s1 + $0x178] sm:$0xff]   ;;  %v1115_v13 = vld [vmem:[%s1383_s1 + $0x200] sm:$0xff]  }
  0x16   :  { %956 = vmatprep.subr.bf16.mxu1 %v1065_v22  ;;  %v1106_v1 = vld [vmem:[%s1383_s1 + $0x1b0] sm:$0xff]   ;;  %v1108_v3 = vld [vmem:[%s1383_s1 + $0x138] sm:$0xff]   ;;  %v1116_v14 = vld [vmem:[%s1383_s1 + $0x208] sm:$0xff]  }
  0x17   :  { %935 = vmatpush3.bf16.msra.mxu0 %v1064_v21  ;;  %v1109_v4 = vld [vmem:[%s1383_s1 + $0x1f8] sm:$0xff]   ;;  %v17_v5 = vld [vmem:[%s1384_s0 + $0x10] sm:$0xff]  ;;  %v1119_v17 = vld [vmem:[%s1383_s1 + $0x220] sm:$0xff]  }
  0x18   :  { %936 = vmatprep.subr.bf16.mxu0 %v1067_v24  ;;  %v847_v6 = vcombine.low %v17_v5, %v17_v5  ;;  %v848_v7 = vcombine.high %v17_v5, %v17_v5  ;;  %v1112_v8 = vld [vmem:[%s1383_s1 + $0x1b8] sm:$0xff]   ;;  %v1117_v15 = vld [vmem:[%s1383_s1 + $0x210] sm:$0xff]   ;;  %v1120_v18 = vld [vmem:[%s1383_s1 + $0x228] sm:$0xff]  }
  0x19   :  { %957 = vmatpush3.bf16.msra.mxu1 %v1066_v23  ;;  %v18_v10 = vld [vmem:[%s1384_s0 + $0x18] sm:$0xff]  ;;  %v1121_v19 = vld [vmem:[%s1383_s1 + $0x230] sm:$0xff]   ;;  %v1123_v21 = vld [vmem:[%s1384_s0 + $0x20] ss:$0 sps:$4 sm:$0xff]  }
  0x1a   :  { %958 = vmatprep.subr.bf16.mxu1 %v1069_v26  ;;  %v849_v11 = vcombine.low %v18_v10, %v18_v10  ;;  %v850_v12 = vcombine.high %v18_v10, %v18_v10  ;;  %v1118_v16 = vld [vmem:[%s1383_s1 + $0x218] sm:$0xff]   ;;  %v842_v23 = vld [vmem:[%s1385_s2] ss:$0 sm:$0xff] }
  0x1b   :  { %937 = vmatpush3.bf16.msra.mxu0 %v1068_v25  ;;  %v1122_v20 = vld [vmem:[%s1383_s1 + $0x238] sm:$0xff]  }
  0x1c   :  { %938 = vmatprep.subr.bf16.mxu0 %v1071_v28 }
  0x1d   :  { %959 = vmatpush3.bf16.msra.mxu1 %v1070_v27 }
  0x1e   :  { %960 = vmatprep.subr.bf16.mxu1 %v1073_v30 }
  0x1f   :  { %939 = vmatpush3.bf16.msra.mxu0 %v1072_v29 }
  0x20   :  { %968 = vmatprep.subr.bf16.mxu0 %v1077_v35 }
  0x21   :  { %961 = vmatpush3.bf16.msra.mxu1 %v1076_v34 }
  0x22   :  { %668 = vmatmul.mubr.bf16.vlgmr.msra.gmra.mrb[0].mxu0 %v843_v32  ;;  %990 = vmatprep.subr.bf16.mxu1 %v1081_v40 }
  0x23   :  { %969 = vmatpush3.bf16.msra.mxu0 %v1080_v39  ;;  %747 = vmatprep.mubr.bf16.mxu0 %v848_v7 }
  0x24   :  { %708 = vmatmul.mubr.bf16.vlgmr.msra.gmra.mrb[0].mxu1 %v845_v37  ;;  %970 = vmatprep.subr.bf16.mxu0 %v1083_v42 }
  0x25   :  { %991 = vmatpush3.bf16.msra.mxu1 %v1082_v41  ;;  %787 = vmatprep.mubr.bf16.mxu1 %v850_v12 }
  0x26   :  { %992 = vmatprep.subr.bf16.mxu1 %v1085_v44 }
  0x27   :  { %971 = vmatpush3.bf16.msra.mxu0 %v1084_v43 }
  0x28   :  { %972 = vmatprep.subr.bf16.mxu0 %v1087_v46 }
  0x29   :  { %993 = vmatpush3.bf16.msra.mxu1 %v1086_v45 }
  0x2a   :  { %994 = vmatprep.subr.bf16.mxu1 %v1089_v48 }
  0x2b   :  { %973 = vmatpush3.bf16.msra.mxu0 %v1088_v47 }
  0x2c   :  { %974 = vmatprep.subr.bf16.mxu0 %v1091_v50 }
  0x2d   :  { %995 = vmatpush3.bf16.msra.mxu1 %v1090_v49 }
  0x2e   :  { %996 = vmatprep.subr.bf16.mxu1 %v1093_v52 }
  0x2f   :  { %975 = vmatpush3.bf16.msra.mxu0 %v1092_v51 }
  0x30   :  { %976 = vmatprep.subr.bf16.mxu0 %v1095_v54 }
  0x31   :  { %997 = vmatpush3.bf16.msra.mxu1 %v1094_v53 }
  0x32   :  { %998 = vmatprep.subr.bf16.mxu1 %v1097_v56 }
  0x33   :  { %977 = vmatpush3.bf16.msra.mxu0 %v1096_v55 }
  0x34   :  { %978 = vmatprep.subr.bf16.mxu0 %v1099_v58 }
  0x35   :  { %999 = vmatpush3.bf16.msra.mxu1 %v1098_v57 }
  0x36   :  { %1000 = vmatprep.subr.bf16.mxu1 %v1101_v60 }
  0x37   :  { %979 = vmatpush3.bf16.msra.mxu0 %v1100_v59 }
  0x38   :  { %980 = vmatprep.subr.bf16.mxu0 %v1103_v62 }
  0x39   :  { %1001 = vmatpush3.bf16.msra.mxu1 %v1102_v61 }
  0x3a   :  { %1002 = vmatprep.subr.bf16.mxu1 %v1105_v0 }
  0x3b   :  { %981 = vmatpush3.bf16.msra.mxu0 %v1104_v63 }
  0x3c   :  { %982 = vmatprep.subr.bf16.mxu0 %v1107_v2 }
  0x3d   :  { %1003 = vmatpush3.bf16.msra.mxu1 %v1106_v1 }
  0x3e   :  { %1004 = vmatprep.subr.bf16.mxu1 %v1109_v4 }
  0x3f   :  { %983 = vmatpush3.bf16.msra.mxu0 %v1108_v3 }
  0x40   :  { %1021 = vmatprep.subr.bf16.mxu0 %v1124_v9 }
  0x41   :  { %1005 = vmatpush3.bf16.msra.mxu1 %v1112_v8 }
  0x42   :  { %748 = vmatmul.mubr.bf16.vlgmr.msra.gmra.mrb[4].mxu0 %v847_v6 }
  0x43   :  { %1022 = vmatpush3.bf16.msra.mxu0 %v1115_v13  ;;  %1037 = vmatprep.mubr.msk.bf16.mxu0 %vm1125_vm0, %v1124_v9 }
  0x44   :  { %788 = vmatmul.mubr.bf16.vlgmr.msra.gmra.mrb[4].mxu1 %v849_v11  ;;  %1023 = vmatprep.subr.bf16.mxu0 %v1124_v9 }
  0x47   :  { %1024 = vmatpush3.bf16.msra.mxu0 %v1116_v14 }
  0x48   :  { %1025 = vmatprep.subr.bf16.mxu0 %v1124_v9 }
  0x4b   :  { %1026 = vmatpush3.bf16.msra.mxu0 %v1117_v15 }
  0x4c   :  { %1027 = vmatprep.subr.bf16.mxu0 %v1124_v9 }
  0x4f   :  { %1028 = vmatpush3.bf16.msra.mxu0 %v1118_v16 }
  0x50   :  { %1029 = vmatprep.subr.bf16.mxu0 %v1124_v9 }
  0x53   :  { %1030 = vmatpush3.bf16.msra.mxu0 %v1119_v17 }
  0x54   :  { %1031 = vmatprep.subr.bf16.mxu0 %v1124_v9 }
  0x57   :  { %1032 = vmatpush3.bf16.msra.mxu0 %v1120_v18 }
  0x58   :  { %1033 = vmatprep.subr.bf16.mxu0 %v1124_v9 }
  0x5b   :  { %1034 = vmatpush3.bf16.msra.mxu0 %v1121_v19 }
  0x5c   :  { %1035 = vmatprep.subr.bf16.mxu0 %v1124_v9 }
  0x5f   :  { %1036 = vmatpush3.bf16.msra.mxu0 %v1122_v20 }
  0x62   :  { %1038 = vmatmul.mubr.bf16.vlgmr.msra.gmra.mrb[8].mxu0 %v1123_v21 }
  0xf5   :  { %v940_v22 = vpop.f32.mrb[0].mxu0 }
  0xf6   :  { %v941_v24 = vpop.f32.mrb[1].mxu0 }
  0xf7   :  { %v942_v25 = vadd.f32 %v941_v24, %v940_v22  ;;  %v943_v26 = vpop.f32.mrb[2].mxu0  ;;  %v962_v27 = vpop.f32.mrb[0].mxu1 }
  0xf8   :  { %v944_v28 = vpop.f32.mrb[3].mxu0  ;;  %v963_v29 = vpop.f32.mrb[1].mxu1 }
  0xf9   :  { %v670_v30 = vadd.f32 %v942_v25, %v842_v23  ;;  %v964_v31 = vadd.f32 %v963_v29, %v962_v27  ;;  %v965_v32 = vpop.f32.mrb[2].mxu1 }
  0xfa   :  { %v966_v33 = vpop.f32.mrb[3].mxu1 }
  0xfb   :  { %v710_v34 = vadd.f32 %v964_v31, %v670_v30 }
 0x115   :  { %v984_v35 = vpop.f32.mrb[4].mxu0 }
 0x116   :  { %v985_v36 = vpop.f32.mrb[5].mxu0 }
 0x117   :  { %v986_v37 = vadd.f32 %v985_v36, %v984_v35  ;;  %v987_v38 = vpop.f32.mrb[6].mxu0  ;;  %v1006_v39 = vpop.f32.mrb[4].mxu1 }
 0x118   :  { %v988_v40 = vpop.f32.mrb[7].mxu0  ;;  %v1007_v41 = vpop.f32.mrb[5].mxu1 }
 0x119   :  { %v750_v42 = vadd.f32 %v986_v37, %v710_v34  ;;  %v1008_v43 = vadd.f32 %v1007_v41, %v1006_v39  ;;  %v1009_v44 = vpop.f32.mrb[6].mxu1 }
 0x11a   :  { %v1010_v45 = vpop.f32.mrb[7].mxu1 }
 0x11b   :  { %v790_v46 = vadd.f32 %v1008_v43, %v750_v42 }
 0x135   :  { %v829_v47 = vpop.f32.mrb[8].mxu0 }
 0x136   :  { %v830_v48 = vadd.f32 %v829_v47, %v790_v46  ;;  %v1039_v49 = vpop.f32.mrb[9].mxu0 }
 0x137   :  { %v832_v50 = vpop.f32.mrb[10].mxu0 }
 0x138   :  { %v835_v51 = vmax.f32 %v830_v48, 0.0  ;;  %v1040_v52 = vpop.f32.mrb[11].mxu0 }
 0x13a   :  { %837 = vst.msk [vmem:[%s1386_s3] sm:$0xff] %vm836_vm1, %v835_v51 }

// kernel: grid_world_synpo_forward.9
= control target key start
LH: loop header
LB: loop body
LE: loop exit
PB: predicated region body
PF: predicated region fallthrough
CT: control target
= control target key end

     0   :  { %vm201_vm0 = vcmask 1041408   ;;  %v6594_v0 = vmov 0.0|0.0   ;;  %vm6595_vm1 = vmmov 1   ;;  %v6596_v4 = vmov 0.0   ;;  %s6601_s27 = smov 32   ;;  %s8810_s5 = inlined_call_operand.vmem [shape: f32[10,16], index: 5, kind: input, shape index: {}]   ;;  %s8811_s6 = inlined_call_operand.vmem [shape: f32[10,16], index: 6, kind: input, shape index: {}]   ;;  %s8812_s1 = inlined_call_operand.vmem [shape: f32[2,10], index: 1, kind: input, shape index: {}]   ;;  %s8813_s2 = inlined_call_operand.vmem [shape: f32[2,10], index: 2, kind: input, shape index: {}]   ;;  %s8814_s7 = inlined_call_operand.vmem [shape: bf16[32,128], index: 7, kind: input, shape index: {}]   ;;  %s8815_s3 = inlined_call_operand.vmem [shape: bf16[128,32], index: 3, kind: input, shape index: {}]   ;;  %s8816_s9 = inlined_call_operand.vmem [shape: bf16[128,32], index: 9, kind: input, shape index: {}]   ;;  %s8817_s0 = inlined_call_operand.vmem [shape: f32[2,128], index: 0, kind: input, shape index: {}]   ;;  %s8818_s11 = inlined_call_operand.vmem [shape: bf16[32,128], index: 11, kind: input, shape index: {}]   ;;  %s8819_s15 = inlined_call_operand.vmem [shape: bf16[32,256], index: 15, kind: input, shape index: {}]   ;;  %s8820_s16 = inlined_call_operand.vmem [shape: bf16[32,256], index: 16, kind: input, shape index: {}]   ;;  %s8821_s13 = inlined_call_operand.vmem [shape: bf16[128,32], index: 13, kind: input, shape index: {}]   ;;  %s8822_s4 = inlined_call_operand.vmem [shape: f32[1,32], index: 4, kind: input, shape index: {}]   ;;  %s8823_s8 = inlined_call_operand.vmem [shape: f32[1,128], index: 8, kind: input, shape index: {}]   ;;  %s8824_s12 = inlined_call_operand.vmem [shape: f32[1,128], index: 12, kind: input, shape index: {}]   ;;  %s8825_s19 = inlined_call_operand.vmem [shape: f32[256,8], index: 19, kind: input, shape index: {}]   ;;  %s8826_s20 = inlined_call_operand.vmem [shape: bf16[256,2048], index: 20, kind: input, shape index: {}]   ;;  %s8827_s14 = inlined_call_operand.vmem [shape: f32[1,32], index: 14, kind: input, shape index: {}]   ;;  %s8828_s10 = inlined_call_operand.vmem [shape: f32[1,32], index: 10, kind: input, shape index: {}]   ;;  %s8829_s22 = inlined_call_operand.vmem [shape: bf16[2048,256], index: 22, kind: input, shape index: {}]   ;;  %s8830_s18 = inlined_call_operand.vmem [shape: f32[1,8], index: 18, kind: input, shape index: {}]   ;;  %s8831_s21 = inlined_call_operand.vmem [shape: f32[1,2048], index: 21, kind: input, shape index: {}]   ;;  %s8832_s24 = inlined_call_operand.vmem [shape: bf16[256,160], index: 24, kind: input, shape index: {}]   ;;  %s8833_s23 = inlined_call_operand.vmem [shape: f32[1,256], index: 23, kind: input, shape index: {}]   ;;  %s8834_s17 = inlined_call_operand.vmem [shape: f32[1,8], index: 17, kind: input, shape index: {}]   ;;  %s8835_s25 = inlined_call_operand.vmem [shape: f32[2,256], index: 25, kind: output, shape index: {}]  }
   0x1   :  { %8843 = sst [smem:[#allocation2_spill]] %s8810_s5  ;;  %6006 = vmatprep.subr.bf16.mxu1 %v6594_v0  ;;  %vm6740_vm2 = vmpackc.low %vm201_vm0, %vm6595_vm1  ;;  %5916 = vmatprep.subr.bf16.mxu0 %v6596_v4  ;;  %vm6597_vm3 = vmmov 0   ;;  %vm197_vm4 = vcmask 80896   ;;  %vm276_vm5 = vcmask 123904   ;;  %vm373_vm6 = vcmask 130048  }
   0x2   :  { %8844 = sst [smem:[#allocation3_spill]] %s8811_s6  ;;  %5940 = vmatprep.mubr.msk.f32.mxu1 %vm6597_vm3, %v6596_v4  ;;  %5932 = vmatprep.mubr.msk.bf16.mxu0 %vm6597_vm3, %v6596_v4  ;;  %vm399_vm7 = vcmask 261120   ;;  %v6599_v51 = vmov 0   ;;  %v6146_v55 = vld [vmem:[%s8820_s16 + $0x4] ss:$8 sps:$4 sm:$0xff]   ;;  %vm877_vm8 = vcmask 523264  }
   0x3   :  { %8845 = sst [smem:[#allocation4_spill]] %s8812_s1  ;;  %s8856_s6 = sld [smem:[#allocation3_spill]]  ;;  %v5211_v56 = vld [vmem:[%s8822_s4] ss:$0 sm:$0xff]  ;;  %v6149_v63 = vld [vmem:[%s8820_s16 + $0x14] ss:$8 sps:$4 sm:$0xff]  }
   0x4   :  { %8846 = sst [smem:[#allocation5_spill]] %s8813_s2  ;;  %v6144_v60 = vld [vmem:[%s8820_s16] ss:$8 sps:$4 sm:$0xff]   ;;  %vm879_vm9 = vcmask 785408   ;;  %vm5190_vm10 = vcmask 64512   ;;  %vm5193_vm11 = vcmask 392192  }
   0x5   :  { %8847 = sst [smem:[#allocation6_spill]] %s8814_s7  ;;  %s8858_s29 = sld [smem:[#allocation5_spill]] }
   0x6   :  { %8848 = sst [smem:[#allocation7_spill]] %s8815_s3  ;;  %s8859_s30 = sld [smem:[#allocation6_spill]] }
   0x7   :  { %8849 = sst [smem:[#allocation8_spill]] %s8816_s9  ;;  %s8853_s9 = sld [smem:[#allocation2_spill]] }
   0x8   :  { %8850 = sst [smem:[#allocation9_spill]] %s8817_s0  ;;  %s6598_s3 = smov 16  }
   0x9   :  { %8851 = sst [smem:[#allocation10_spill]] %s8818_s11  ;;  %v284_v6 = vld [vmem:[%s8856_s6] sm:$0xff]  ;;  %v285_v7 = vld [vmem:[%s8856_s6 + $0x8] sm:$0x3]  ;;  %s8860_s11 = sld [smem:[#allocation7_spill]] }
   0xa   :  { %8852 = sst [smem:[#allocation11_spill]] %s8819_s15  ;;  %s8857_s15 = sld [smem:[#allocation4_spill]]  ;;  %v6011_v9 = vpack.c.bf16 %v285_v7, %v284_v6 }
   0xb   :  { %v283_v10 = vld [vmem:[%s8858_s29] sm:$0x3]  ;;  %s8862_s5 = sld [smem:[#allocation8_spill]]  ;;  %s8863_s0 = sld [smem:[#allocation11_spill]] }
   0xc   :  { %v6118_v19 = vld [vmem:[%s8859_s30] sm:$0xff]   ;;  %v6119_v22 = vld [vmem:[%s8859_s30 + $0x8] sm:$0xff]   ;;  %s8864_s7 = sld [smem:[#allocation10_spill]] }
   0xd   :  { %v195_v1 = vld [vmem:[%s8853_s9] sm:$0xff]  ;;  %v196_v2 = vld [vmem:[%s8853_s9 + $0x8] sm:$0x3] }
   0xe   :  { %v6007_v5 = vpack.c.bf16 %v196_v2, %v195_v1  ;;  %v6147_v1 = vld [vmem:[%s8820_s16 + $0x10] ss:$8 sps:$4 sm:$0xff]   ;;  %v5224_v2 = vld [vmem:[%s8823_s8] ss:$0 sm:$0xff]  ;;  %s6602_s16 = smov 96   ;;  %s6603_s8 = smov 8  }
   0xf   :  { %v6120_v23 = vld [vmem:[%s8860_s11] sm:$0xff]   ;;  %v6121_v24 = vld [vmem:[%s8860_s11 + $0x8] sm:$0xff]   ;;  %v6122_v26 = vld [vmem:[%s8860_s11 + $0x10] sm:$0xff]  }
  0x10   :  { %6009 = vmatpush3.bf16.msk.msra.mxu1 %vm6740_vm2, %v6007_v5  ;;  %v194_v8 = vld [vmem:[%s8857_s15] sm:$0x3]  ;;  %5917 = vmatpush3.bf16.msra.mxu0 %v6120_v23  ;;  %v6123_v28 = vld [vmem:[%s8860_s11 + $0x18] sm:$0xff]   ;;  %v6125_v30 = vld [vmem:[%s8860_s11 + $0x28] sm:$0xff]   ;;  %s8861_s15 = sld [smem:[#allocation9_spill]] }
  0x11   :  { %6010 = vmatprep.subr.bf16.mxu1 %v6594_v0  ;;  %5918 = vmatprep.subr.bf16.mxu0 %v6596_v4  ;;  %v6124_v29 = vld [vmem:[%s8860_s11 + $0x20] sm:$0xff]   ;;  %v6126_v31 = vld [vmem:[%s8860_s11 + $0x30] sm:$0xff]   ;;  %v6127_v32 = vld [vmem:[%s8860_s11 + $0x38] sm:$0xff]  }
  0x12   :  { %v6128_v35 = vld [vmem:[%s8862_s5] sm:$0xff]   ;;  %v6129_v36 = vld [vmem:[%s8862_s5 + $0x8] sm:$0xff]   ;;  %v6130_v37 = vld [vmem:[%s8862_s5 + $0x10] sm:$0xff]  }
  0x13   :  { %5941 = vmatmul.mubr.msk.f32.vlgmr.msra.gmra.mrb[0].mxu1 %vm197_vm4, %v194_v8  ;;  %v6131_v38 = vld [vmem:[%s8862_s5 + $0x18] sm:$0xff]   ;;  %v6132_v39 = vld [vmem:[%s8862_s5 + $0x20] sm:$0xff]   ;;  %v6133_v40 = vld [vmem:[%s8862_s5 + $0x28] sm:$0xff]  }
  0x14   :  { %6013 = vmatpush3.bf16.msk.msra.mxu1 %vm6740_vm2, %v6011_v9  ;;  %5947 = vmatprep.mubr.msk.f32.mxu1 %vm6597_vm3, %v6596_v4  ;;  %v6134_v48 = vld [vmem:[%s8862_s5 + $0x30] sm:$0xff]   ;;  %v6135_v49 = vld [vmem:[%s8862_s5 + $0x38] sm:$0xff]   ;;  %v6138_v50 = vld [vmem:[%s8863_s0] ss:$8 sps:$4 sm:$0xff]  }
  0x15   :  { %5950 = vmatprep.subr.bf16.mxu1 %v6596_v4  ;;  %5919 = vmatpush3.bf16.msra.mxu0 %v6121_v24  ;;  %v6140_v52 = vld [vmem:[%s8863_s0 + $0x4] ss:$8 sps:$4 sm:$0xff]   ;;  %v6143_v53 = vld [vmem:[%s8863_s0 + $0x14] ss:$8 sps:$4 sm:$0xff]   ;;  %v6141_v54 = vld [vmem:[%s8863_s0 + $0x10] ss:$8 sps:$4 sm:$0xff]  }
  0x16   :  { %5920 = vmatprep.subr.bf16.mxu0 %v6596_v4  ;;  %v81_v33 = vld [vmem:[%s8861_s15] sm:$0x3] }
  0x17   :  { %5948 = vmatmul.mubr.msk.f32.vlgmr.msra.gmra.mrb[2].mxu1 %vm197_vm4, %v283_v10  ;;  %v82_v34 = vpack.c.bf16 %v81_v33, %v81_v33  ;;  %v6136_v10 = vld [vmem:[%s8864_s7] sm:$0xff]  }
  0x18   :  { %5954 = vmatprep.mubr.msk.bf16.mxu1 %vm6597_vm3, %v6596_v4  ;;  %5951 = vmatpush3.bf16.msra.mxu1 %v6118_v19  ;;  %v6156_v19 = vld [vmem:[%s8821_s13 + $0x30] sm:$0xff]  }
  0x19   :  { %5952 = vmatprep.subr.bf16.mxu1 %v6596_v4  ;;  %5921 = vmatpush3.bf16.msra.mxu0 %v6122_v26 }
  0x1a   :  { %5922 = vmatprep.subr.bf16.mxu0 %v6596_v4 }
  0x1c   :  { %5953 = vmatpush3.bf16.msra.mxu1 %v6119_v22 }
  0x1d   :  { %5923 = vmatpush3.bf16.msra.mxu0 %v6123_v28  ;;  %760 = vmatprep.subr.bf16.mxu1 %v6140_v52  ;;  %v915_v52 = vld [vmem:[%s8825_s19 + $0xa8] sm:$0xff] }
  0x1e   :  { %5924 = vmatprep.subr.bf16.mxu0 %v6596_v4 }
  0x21   :  { %5925 = vmatpush3.bf16.msra.mxu0 %v6124_v29 }
  0x22   :  { %5926 = vmatprep.subr.bf16.mxu0 %v6596_v4 }
  0x25   :  { %5927 = vmatpush3.bf16.msra.mxu0 %v6125_v30 }
  0x26   :  { %5928 = vmatprep.subr.bf16.mxu0 %v6596_v4 }
  0x29   :  { %5929 = vmatpush3.bf16.msra.mxu0 %v6126_v31 }
  0x2a   :  { %5930 = vmatprep.subr.bf16.mxu0 %v6596_v4 }
  0x2d   :  { %5931 = vmatpush3.bf16.msra.mxu0 %v6127_v32  ;;  %v5237_v32 = vld [vmem:[%s8824_s12] ss:$0 sm:$0xff] }
  0x2e   :  { %5958 = vmatprep.subr.bf16.mxu0 %v6596_v4 }
  0x30   :  { %5933 = vmatmul.mubr.bf16.vlgmr.msra.gmra.mrb[0].mxu0 %v82_v34 }
  0x31   :  { %5959 = vmatpush3.bf16.msra.mxu0 %v6128_v35  ;;  %5974 = vmatprep.mubr.msk.bf16.mxu0 %vm6597_vm3, %v6596_v4 }
  0x32   :  { %5960 = vmatprep.subr.bf16.mxu0 %v6596_v4 }
  0x35   :  { %5961 = vmatpush3.bf16.msra.mxu0 %v6129_v36 }
  0x36   :  { %5962 = vmatprep.subr.bf16.mxu0 %v6596_v4 }
  0x39   :  { %5963 = vmatpush3.bf16.msra.mxu0 %v6130_v37 }
  0x3a   :  { %5964 = vmatprep.subr.bf16.mxu0 %v6596_v4 }
  0x3d   :  { %5965 = vmatpush3.bf16.msra.mxu0 %v6131_v38 }
  0x3e   :  { %5966 = vmatprep.subr.bf16.mxu0 %v6596_v4 }
  0x41   :  { %5967 = vmatpush3.bf16.msra.mxu0 %v6132_v39 }
  0x42   :  { %5968 = vmatprep.subr.bf16.mxu0 %v6596_v4 }
  0x45   :  { %5969 = vmatpush3.bf16.msra.mxu0 %v6133_v40  ;;  %v910_v40 = vld [vmem:[%s8825_s19 + $0x80] sm:$0xff] }
  0x46   :  { %5970 = vmatprep.subr.bf16.mxu0 %v6596_v4 }
  0x49   :  { %5971 = vmatpush3.bf16.msra.mxu0 %v6134_v48 }
  0x4a   :  { %5972 = vmatprep.subr.bf16.mxu0 %v6596_v4 }
  0x4d   :  { %5973 = vmatpush3.bf16.msra.mxu0 %v6135_v49  ;;  %v896_v49 = vld [vmem:[%s8825_s19 + $0x10] sm:$0xff] }
  0x4e   :  { %5978 = vmatprep.subr.bf16.mxu0 %v6596_v4 }
  0xe6   :  { %v6770_v11 = vpop.f32.mrb[0].mxu1 }
  0xe7   :  { %v5942_v12 = vpop.f32.mrb[1].mxu1  ;;  %v275_v16 = vmul.f32 %v6770_v11, %v6770_v11 }
  0xe8   :  { %v6137_v12 = vld [vmem:[%s8864_s7 + $0x8] sm:$0xff]  }
  0xe9   :  { %v277_v18 = vsel %vm276_vm5, %v275_v16, 0.0  ;;  %v6153_v16 = vld [vmem:[%s8821_s13 + $0x18] sm:$0xff]  }
  0xea   :  { %v358_v13 = vpop.f32.mrb[2].mxu1 }
  0xeb   :  { %v5949_v14 = vpop.f32.mrb[3].mxu1  ;;  %v362_v15 = vmul.f32 %v358_v13, %v358_v13 }
  0xec   :  { %v6151_v14 = vld [vmem:[%s8821_s13 + $0x8] sm:$0xff]  }
  0xed   :  { %v363_v17 = vsel %vm276_vm5, %v362_v15, 0.0  ;;  %v6152_v15 = vld [vmem:[%s8821_s13 + $0x10] sm:$0xff]  }
  0xee   :  { %364 = vadd.xlane.f32.xlu0 %v363_v17  ;;  %v6154_v17 = vld [vmem:[%s8821_s13 + $0x20] sm:$0xff]  }
  0xf2   :  { %278 = vadd.xlane.f32.xlu0 %v277_v18  ;;  %v6155_v18 = vld [vmem:[%s8821_s13 + $0x28] sm:$0xff]  }
 0x103   :  { %v188_v57 = vpop.f32.mrb[0].mxu0 }
 0x104   :  { %v189_v58 = vadd.f32 %v5211_v56, %v188_v57  ;;  %v5934_v59 = vpop.f32.mrb[1].mxu0  ;;  %v899_v56 = vld [vmem:[%s8825_s19 + $0x28] sm:$0xff]  ;;  %v916_v57 = vld [vmem:[%s8825_s19 + $0xb0] sm:$0xff] }
 0x105   :  { %v191_v61 = vpop.f32.mrb[2].mxu0 }
 0x106   :  { %v732_v62 = vpack.c.bf16 %v189_v58, %v189_v58  ;;  %v5935_v0 = vpop.f32.mrb[3].mxu0  ;;  %v917_v58 = vld [vmem:[%s8825_s19 + $0xb8] sm:$0xff]  ;;  %v900_v61 = vld [vmem:[%s8825_s19 + $0x30] sm:$0xff] }
 0x107   :  { %v919_v0 = vld [vmem:[%s8825_s19 + $0xc8] sm:$0xff] }
 0x17b   :  { %v365_v20 = vpop.xlane.xlu0 %364 }
 0x17c   :  { %v366_v21 = vmax.f32 %v365_v20, 1e-24  ;;  %v6157_v20 = vld [vmem:[%s8821_s13 + $0x38] sm:$0xff]  }
 0x17e   :  { %6590 = vrsqrt.f32 %v366_v21 }
 0x17f   :  { %v279_v41 = vpop.xlane.xlu0 %278 }
 0x180   :  { %v280_v42 = vmax.f32 %v279_v41, 1e-24  ;;  %v911_v41 = vld [vmem:[%s8825_s19 + $0x88] sm:$0xff] }
 0x182   :  { %6592 = vrsqrt.f32 %v280_v42  ;;  %v894_v42 = vld [vmem:[%s8825_s19] sm:$0xff] }
 0x188   :  { %v6591_v25 = vpop.eup %6590 }
 0x189   :  { %v368_v27 = vmul.f32 %v6591_v25, %v358_v13  ;;  %v6150_v13 = vld [vmem:[%s8821_s13] sm:$0xff]  }
 0x18b   :  { %370 = vrot.lane.b32.xlu1 %v368_v27, %s6598_s3 }
 0x18c   :  { %v6593_v43 = vpop.eup %6592 }
 0x18d   :  { %v282_v44 = vmul.f32 %v6593_v43, %v6770_v11  ;;  %v6014_v43 = vpack.c.bf16 %v911_v41, %v910_v40  ;;  %v1092_v40 = vld [vmem:[%s8826_s20 + $0x30] sm:$0xff] }
 0x18e   :  { %v1100_v41 = vld [vmem:[%s8826_s20 + $0x70] sm:$0xff] }
 0x1fd   :  { %v371_v45 = vpop.permute.xlu1 %370 }
 0x1fe   :  { %v374_v46 = vsel %vm373_vm6, %v282_v44, %v371_v45  ;;  %v895_v44 = vld [vmem:[%s8825_s19 + $0x8] sm:$0xff]  ;;  %v912_v45 = vld [vmem:[%s8825_s19 + $0x90] sm:$0xff] }
 0x1ff   :  { %v375_v47 = vpack.c.bf16 %v374_v46, %v374_v46  ;;  %v913_v46 = vld [vmem:[%s8825_s19 + $0x98] sm:$0xff] }
 0x200   :  { %v6018_v48 = vpack.c.bf16 %v913_v46, %v912_v45 }
 0x201   :  { %5955 = vmatmul.mubr.msk.bf16.vlgmr.msra.gmra.mrb[4].mxu1 %vm399_vm7, %v375_v47 }
 0x202   :  { %792 = vmatprep.mubr.bf16.mxu1 %v6599_v51  ;;  %761 = vmatpush1.bf16.msra.mxu1 %v6138_v50  ;;  %v897_v50 = vld [vmem:[%s8825_s19 + $0x18] sm:$0xff] }
 0x203   :  { %762 = vmatprep.subr.bf16.mxu1 %v6143_v53  ;;  %v6020_v53 = vpack.c.bf16 %v897_v50, %v896_v49  ;;  %v1102_v50 = vld [vmem:[%s8826_s20 + $0x80] sm:$0xff] }
 0x206   :  { %763 = vmatpush1.bf16.msra.mxu1 %v6141_v54 }
 0x207   :  { %825 = vmatprep.subr.bf16.mxu1 %v6146_v55  ;;  %v898_v55 = vld [vmem:[%s8825_s19 + $0x20] sm:$0xff] }
 0x208   :  { %v6024_v59 = vpack.c.bf16 %v899_v56, %v898_v55 }
 0x209   :  { %5254 = vmatmul.mubr.msk.bf16.vlgmr.msra.gmra.mrb[8].mxu1 %vm399_vm7, %v732_v62 }
 0x20a   :  { %826 = vmatpush1.bf16.msra.mxu1 %v6144_v60  ;;  %857 = vmatprep.mubr.bf16.mxu1 %v6599_v51  ;;  %v914_v51 = vld [vmem:[%s8825_s19 + $0xa0] sm:$0xff]  ;;  %v6026_v60 = vpack.c.bf16 %v917_v58, %v916_v57 }
 0x20b   :  { %827 = vmatprep.subr.bf16.mxu1 %v6149_v63  ;;  %v6022_v54 = vpack.c.bf16 %v915_v52, %v914_v51  ;;  %v918_v63 = vld [vmem:[%s8825_s19 + $0xc0] sm:$0xff] }
 0x20c   :  { %v1118_v57 = vld [vmem:[%s8826_s20 + $0x100] sm:$0xff] }
 0x20d   :  { %v1126_v58 = vld [vmem:[%s8826_s20 + $0x140] sm:$0xff] }
 0x20e   :  { %828 = vmatpush1.bf16.msra.mxu1 %v6147_v1 }
 0x20f   :  { %6015 = vmatprep.subr.bf16.mxu1 %v6014_v43 }
 0x211   :  { %5259 = vmatmul.mubr.msk.bf16.vlgmr.msra.gmra.mrb[12].mxu1 %vm399_vm7, %v732_v62  ;;  %v901_v62 = vld [vmem:[%s8825_s19 + $0x38] sm:$0xff] }
 0x212   :  { %v6028_v1 = vpack.c.bf16 %v901_v62, %v900_v61  ;;  %v1142_v61 = vld [vmem:[%s8826_s20 + $0x1c0] sm:$0xff]  ;;  %v5294_v62 = vcombine.low %v1118_v57, %v1126_v58 }
 0x2d4   :  { %v437_v3 = vpop.f32.mrb[4].mxu1 }
 0x2d5   :  { %v438_v5 = vadd.f32 %v5224_v2, %v437_v3  ;;  %v5956_v6 = vpop.f32.mrb[5].mxu1  ;;  %v6030_v2 = vpack.c.bf16 %v919_v0, %v918_v63  ;;  %v902_v3 = vld [vmem:[%s8825_s19 + $0x40] sm:$0xff] }
 0x2d6   :  { %v440_v7 = vpop.f32.mrb[6].mxu1  ;;  %v920_v6 = vld [vmem:[%s8825_s19 + $0xd0] sm:$0xff] }
 0x2d7   :  { %v443_v8 = vmax.f32 %v438_v5, 0.0  ;;  %v5957_v9 = vpop.f32.mrb[7].mxu1  ;;  %v903_v5 = vld [vmem:[%s8825_s19 + $0x48] sm:$0xff]  ;;  %v921_v7 = vld [vmem:[%s8825_s19 + $0xd8] sm:$0xff] }
 0x2d8   :  { %v6034_v9 = vpack.c.bf16 %v921_v7, %v920_v6  ;;  %v1108_v7 = vld [vmem:[%s8826_s20 + $0xb0] sm:$0xff] }
 0x2d9   :  { %v444_v11 = vpack.c.bf16 %v443_v8, %v443_v8  ;;  %v6032_v8 = vpack.c.bf16 %v903_v5, %v902_v3  ;;  %v1150_v3 = vld [vmem:[%s8826_s20 + $0x200] sm:$0xff] }
 0x2da   :  { %v1158_v5 = vld [vmem:[%s8826_s20 + $0x240] sm:$0xff] }
 0x2db   :  { %5975 = vmatmul.mubr.bf16.vlgmr.msra.gmra.mrb[4].mxu0 %v444_v11  ;;  %v905_v11 = vld [vmem:[%s8825_s19 + $0x58] sm:$0xff] }
 0x2dc   :  { %5979 = vmatpush3.bf16.msra.mxu0 %v6136_v10  ;;  %5982 = vmatprep.mubr.msk.bf16.mxu0 %vm6597_vm3, %v6596_v4  ;;  %v6930_v21 = vpop.f32.mrb[8].mxu1  ;;  %v904_v10 = vld [vmem:[%s8825_s19 + $0x50] sm:$0xff] }
 0x2dd   :  { %5980 = vmatprep.subr.bf16.mxu0 %v6596_v4  ;;  %v6932_v22 = vpop.f32.mrb[9].mxu1 }
 0x2de   :  { %v798_v23 = vpop.f32.mrb[10].mxu1  ;;  %v7071_v55 = vpack.c.bf16 %v6932_v22, %v6932_v22 }
 0x2df   :  { %v799_v24 = vpop.f32.mrb[11].mxu1 }
 0x2e0   :  { %5981 = vmatpush3.bf16.msra.mxu0 %v6137_v12  ;;  %v922_v12 = vld [vmem:[%s8825_s19 + $0xe0] sm:$0xff]  ;;  %v908_v24 = vld [vmem:[%s8825_s19 + $0x70] sm:$0xff] }
 0x2e1   :  { %5986 = vmatprep.subr.bf16.mxu0 %v6596_v4 }
 0x2e3   :  { %5983 = vmatmul.mubr.msk.bf16.vlgmr.msra.gmra.mrb[8].mxu0 %vm399_vm7, %v375_v47  ;;  %v6016_v47 = vpack.c.bf16 %v895_v44, %v894_v42  ;;  %v5275_v44 = vcombine.high %v1092_v40, %v1100_v41 }
 0x2e4   :  { %5987 = vmatpush3.bf16.msra.mxu0 %v6150_v13  ;;  %6002 = vmatprep.mubr.msk.bf16.mxu0 %vm6597_vm3, %v6596_v4  ;;  %v6934_v25 = vpop.f32.mrb[12].mxu1  ;;  %v923_v13 = vld [vmem:[%s8825_s19 + $0xe8] sm:$0xff] }
 0x2e5   :  { %5988 = vmatprep.subr.bf16.mxu0 %v6596_v4  ;;  %v6936_v26 = vpop.f32.mrb[13].mxu1  ;;  %6017 = vmatpush3.bf16.msra.mxu1 %v6016_v47 }
 0x2e6   :  { %v863_v27 = vpop.f32.mrb[14].mxu1  ;;  %6019 = vmatprep.subr.bf16.mxu1 %v6018_v48 }
 0x2e7   :  { %v864_v28 = vpop.f32.mrb[15].mxu1  ;;  %v909_v27 = vld [vmem:[%s8825_s19 + $0x78] sm:$0xff] }
 0x2e8   :  { %5989 = vmatpush3.bf16.msra.mxu0 %v6151_v14  ;;  %v6036_v14 = vpack.c.bf16 %v905_v11, %v904_v10  ;;  %v6044_v28 = vpack.c.bf16 %v909_v27, %v908_v24  ;;  %v1190_v24 = vld [vmem:[%s8826_s20 + $0x340] sm:$0xff]  ;;  %v1140_v27 = vld [vmem:[%s8826_s20 + $0x1b0] sm:$0xff] }
 0x2e9   :  { %5990 = vmatprep.subr.bf16.mxu0 %v6596_v4  ;;  %6021 = vmatpush3.bf16.msra.mxu1 %v6020_v53 }
 0x2ea   :  { %6023 = vmatprep.subr.bf16.mxu1 %v6022_v54 }
 0x2ec   :  { %5991 = vmatpush3.bf16.msra.mxu0 %v6152_v15  ;;  %v6038_v15 = vpack.c.bf16 %v923_v13, %v922_v12  ;;  %v5327_v12 = vcombine.high %v1150_v3, %v1158_v5  ;;  %v1166_v13 = vld [vmem:[%s8826_s20 + $0x280] sm:$0xff] }
 0x2ed   :  { %5992 = vmatprep.subr.bf16.mxu0 %v6596_v4  ;;  %6025 = vmatpush3.bf16.msra.mxu1 %v6024_v59 }
 0x2ee   :  { %6027 = vmatprep.subr.bf16.mxu1 %v6026_v60 }
 0x2f0   :  { %5993 = vmatpush3.bf16.msra.mxu0 %v6153_v16  ;;  %v906_v16 = vld [vmem:[%s8825_s19 + $0x60] sm:$0xff] }
 0x2f1   :  { %5994 = vmatprep.subr.bf16.mxu0 %v6596_v4  ;;  %6029 = vmatpush3.bf16.msra.mxu1 %v6028_v1 }
 0x2f2   :  { %6031 = vmatprep.subr.bf16.mxu1 %v6030_v2 }
 0x2f4   :  { %5995 = vmatpush3.bf16.msra.mxu0 %v6154_v17  ;;  %v907_v17 = vld [vmem:[%s8825_s19 + $0x68] sm:$0xff] }
 0x2f5   :  { %5996 = vmatprep.subr.bf16.mxu0 %v6596_v4  ;;  %6033 = vmatpush3.bf16.msra.mxu1 %v6032_v8 }
 0x2f6   :  { %6035 = vmatprep.subr.bf16.mxu1 %v6034_v9 }
 0x2f8   :  { %5997 = vmatpush3.bf16.msra.mxu0 %v6155_v18  ;;  %v6040_v18 = vpack.c.bf16 %v907_v17, %v906_v16  ;;  %v1124_v16 = vld [vmem:[%s8826_s20 + $0x130] sm:$0xff]  ;;  %v5326_v17 = vcombine.low %v1150_v3, %v1158_v5 }
 0x2f9   :  { %5998 = vmatprep.subr.bf16.mxu0 %v6596_v4  ;;  %6037 = vmatpush3.bf16.msra.mxu1 %v6036_v14 }
 0x2fa   :  { %6039 = vmatprep.subr.bf16.mxu1 %v6038_v15 }
 0x2fc   :  { %5999 = vmatpush3.bf16.msra.mxu0 %v6156_v19  ;;  %v924_v19 = vld [vmem:[%s8825_s19 + $0xf0] sm:$0xff] }
 0x2fd   :  { %6000 = vmatprep.subr.bf16.mxu0 %v6596_v4  ;;  %6041 = vmatpush3.bf16.msra.mxu1 %v6040_v18 }
 0x300   :  { %6001 = vmatpush3.bf16.msra.mxu0 %v6157_v20  ;;  %v925_v20 = vld [vmem:[%s8825_s19 + $0xf8] sm:$0xff]  ;;  %s6600_s19 = smov 64  }
 0x301   :  { %6047 = vmatprep.subr.bf16.mxu0 %v6014_v43  ;;  %v6042_v23 = vpack.c.bf16 %v925_v20, %v924_v19  ;;  %v5274_v43 = vcombine.low %v1092_v40, %v1100_v41  ;;  %v1214_v41 = vld [vmem:[%s8826_s20 + $0x400] sm:$0xff] }
 0x303   :  { %6043 = vmatprep.subr.bf16.mxu1 %v6042_v23 }
 0x304   :  { %6045 = vmatpush3.bf16.msra.mxu1 %v6044_v28 }
 0x305   :  { %2952 = vmatprep.subr.bf16.mxu1 %v5275_v44  ;;  %v1180_v44 = vld [vmem:[%s8826_s20 + $0x2f0] sm:$0xff] }
 0x3ae   :  { %v6938_v29 = vpop.f32.mrb[4].mxu0 }
 0x3af   :  { %v5976_v4 = vpop.f32.mrb[5].mxu0 }
 0x3b0   :  { %v553_v30 = vpop.f32.mrb[6].mxu0  ;;  %v1086_v4 = vld [vmem:[%s8826_s20] sm:$0xff] }
 0x3b1   :  { %v5977_v31 = vpop.f32.mrb[7].mxu0  ;;  %v1094_v30 = vld [vmem:[%s8826_s20 + $0x40] sm:$0xff] }
 0x3b2   :  { %v5263_v31 = vcombine.high %v1086_v4, %v1094_v30 }
 0x3b6   :  { %v613_v33 = vpop.f32.mrb[8].mxu0 }
 0x3b7   :  { %v614_v34 = vadd.f32 %v5237_v32, %v613_v33  ;;  %v5984_v35 = vpop.f32.mrb[9].mxu0  ;;  %v5262_v32 = vcombine.low %v1086_v4, %v1094_v30  ;;  %v5241_v33 = vld [vmem:[%s8827_s14] ss:$0 sm:$0xff] }
 0x3b8   :  { %v616_v36 = vpop.f32.mrb[10].mxu0 }
 0x3b9   :  { %v619_v37 = vmax.f32 %v614_v34, 0.0  ;;  %v5985_v38 = vpop.f32.mrb[11].mxu0 }
 0x3bb   :  { %v620_v39 = vpack.c.bf16 %v619_v37, %v619_v37 }
 0x3bd   :  { %6003 = vmatmul.mubr.bf16.vlgmr.msra.gmra.mrb[12].mxu0 %v620_v39  ;;  %v5228_v39 = vld [vmem:[%s8828_s10] ss:$0 sm:$0xff] }
 0x3be   :  { %6049 = vmatpush3.bf16.msra.mxu0 %v6016_v47  ;;  %v551_v42 = vadd.f32 %v5228_v39, %v6938_v29  ;;  %v1110_v29 = vld [vmem:[%s8826_s20 + $0xc0] sm:$0xff] }
 0x3bf   :  { %6051 = vmatprep.subr.bf16.mxu0 %v6018_v48 }
 0x3c2   :  { %6053 = vmatpush3.bf16.msra.mxu0 %v6020_v53 }
 0x3c3   :  { %6055 = vmatprep.subr.bf16.mxu0 %v6022_v54  ;;  %v5279_v54 = vcombine.high %v1102_v50, %v1110_v29 }
 0x3c6   :  { %6057 = vmatpush3.bf16.msra.mxu0 %v6024_v59 }
 0x3c7   :  { %6059 = vmatprep.subr.bf16.mxu0 %v6026_v60  ;;  %v1134_v60 = vld [vmem:[%s8826_s20 + $0x180] sm:$0xff] }
 0x3c8   :  { %v5311_v0 = vcombine.high %v1134_v60, %v1142_v61  ;;  %v5310_v11 = vcombine.low %v1134_v60, %v1142_v61 }
 0x3ca   :  { %6061 = vmatpush3.bf16.msra.mxu0 %v6028_v1 }
 0x3cb   :  { %6063 = vmatprep.subr.bf16.mxu0 %v6030_v2 }
 0x3ce   :  { %6065 = vmatpush3.bf16.msra.mxu0 %v6032_v8  ;;  %v1116_v8 = vld [vmem:[%s8826_s20 + $0xf0] sm:$0xff] }
 0x3cf   :  { %6067 = vmatprep.subr.bf16.mxu0 %v6034_v9 }
 0x3d2   :  { %6069 = vmatpush3.bf16.msra.mxu0 %v6036_v14  ;;  %v5291_v14 = vcombine.high %v1108_v7, %v1116_v8 }
 0x3d3   :  { %6071 = vmatprep.subr.bf16.mxu0 %v6038_v15  ;;  %v1174_v15 = vld [vmem:[%s8826_s20 + $0x2c0] sm:$0xff] }
 0x3d4   :  { %v5343_v19 = vcombine.high %v1166_v13, %v1174_v15  ;;  %v5342_v4 = vcombine.low %v1166_v13, %v1174_v15 }
 0x3d6   :  { %6073 = vmatpush3.bf16.msra.mxu0 %v6040_v18  ;;  %v5290_v18 = vcombine.low %v1108_v7, %v1116_v8  ;;  %v1278_v8 = vld [vmem:[%s8826_s20 + $0x600] sm:$0xff] }
 0x3d7   :  { %6075 = vmatprep.subr.bf16.mxu0 %v6042_v23  ;;  %v1182_v23 = vld [vmem:[%s8826_s20 + $0x300] sm:$0xff] }
 0x3da   :  { %6077 = vmatpush3.bf16.msra.mxu0 %v6044_v28  ;;  %v1148_v28 = vld [vmem:[%s8826_s20 + $0x1f0] sm:$0xff] }
 0x3db   :  { %2706 = vmatprep.subr.bf16.mxu0 %v5263_v31  ;;  %v5359_v31 = vcombine.high %v1182_v23, %v1190_v24 }
 0x490   :  { %v726_v34 = vpop.f32.mrb[12].mxu0 }
 0x491   :  { %v727_v35 = vadd.f32 %v5241_v33, %v726_v34  ;;  %v6004_v36 = vpop.f32.mrb[13].mxu0  ;;  %v1198_v33 = vld [vmem:[%s8826_s20 + $0x380] sm:$0xff] }
 0x492   :  { %v729_v37 = vpop.f32.mrb[14].mxu0  ;;  %v1206_v34 = vld [vmem:[%s8826_s20 + $0x3c0] sm:$0xff]  ;;  %v1164_v36 = vld [vmem:[%s8826_s20 + $0x270] sm:$0xff] }
 0x493   :  { %885 = vrot.lane.b32.xlu0 %v727_v35, %s6600_s19  ;;  %882 = vrot.lane.b32.xlu1 %v727_v35, %s6601_s27  ;;  %v6005_v38 = vpop.f32.mrb[15].mxu0  ;;  %v5358_v37 = vcombine.low %v1182_v23, %v1190_v24  ;;  %v5375_v39 = vcombine.high %v1198_v33, %v1206_v34 }
 0x494   :  { %v5322_v38 = vcombine.low %v1140_v27, %v1148_v28 }
 0x497   :  { %888 = vrot.lane.b32.xlu1 %v727_v35, %s6602_s16 }
 0x49b   :  { %867 = vrot.lane.b32.xlu1 %v551_v42, %s6601_s27 }
 0x49f   :  { %870 = vrot.lane.b32.xlu1 %v551_v42, %s6600_s19 }
 0x4a3   :  { %873 = vrot.lane.b32.xlu1 %v551_v42, %s6602_s16 }
 0x505   :  { %v883_v45 = vpop.permute.xlu1 %882  ;;  %v886_v46 = vpop.permute.xlu0 %885 }
 0x506   :  { %v891_v47 = vsel %vm399_vm7, %v727_v35, %v883_v45  ;;  %v1156_v35 = vld [vmem:[%s8826_s20 + $0x230] sm:$0xff]  ;;  %v5374_v45 = vcombine.low %v1198_v33, %v1206_v34 }
 0x507   :  { %v892_v48 = vsel %vm877_vm8, %v891_v47, %v886_v46  ;;  %v5339_v40 = vcombine.high %v1156_v35, %v1164_v36  ;;  %v5338_v46 = vcombine.low %v1156_v35, %v1164_v36  ;;  %v1326_v35 = vld [vmem:[%s8826_s20 + $0x780] sm:$0xff] }
 0x508   :  { %v1334_v36 = vld [vmem:[%s8826_s20 + $0x7c0] sm:$0xff] }
 0x509   :  { %v889_v49 = vpop.permute.xlu1 %888 }
 0x50a   :  { %v893_v51 = vsel %vm879_vm9, %v892_v48, %v889_v49  ;;  %v1230_v49 = vld [vmem:[%s8826_s20 + $0x480] sm:$0xff] }
 0x50b   :  { %v1005_v52 = vmul.f32 %v893_v51, %v6934_v25  ;;  %v1006_v53 = vmul.f32 %v893_v51, %v6936_v26  ;;  %v5278_v25 = vcombine.low %v1102_v50, %v1110_v29  ;;  %v5295_v26 = vcombine.high %v1118_v57, %v1126_v58  ;;  %v1238_v50 = vld [vmem:[%s8826_s20 + $0x4c0] sm:$0xff]  ;;  %v1188_v29 = vld [vmem:[%s8826_s20 + $0x330] sm:$0xff] }
 0x50c   :  { %v1196_v51 = vld [vmem:[%s8826_s20 + $0x370] sm:$0xff]  ;;  %v1246_v57 = vld [vmem:[%s8826_s20 + $0x500] sm:$0xff] }
 0x50d   :  { %1078 = vmatprep.mubr.f32.mxu0 %v1006_v53  ;;  %v868_v56 = vpop.permute.xlu1 %867  ;;  %v1254_v58 = vld [vmem:[%s8826_s20 + $0x540] sm:$0xff]  ;;  %v5370_v60 = vcombine.low %v1188_v29, %v1196_v51 }
 0x50e   :  { %1079 = vmatmul.mubr.f32.vlgmr.msra.gmra.mrb[16].mxu0 %v1005_v52  ;;  %v876_v63 = vsel %vm399_vm7, %v551_v42, %v868_v56  ;;  %v1222_v42 = vld [vmem:[%s8826_s20 + $0x440] sm:$0xff]  ;;  %v5371_v56 = vcombine.high %v1188_v29, %v1196_v51  ;;  %v5423_v61 = vcombine.high %v1246_v57, %v1254_v58  ;;  %v5422_v3 = vcombine.low %v1246_v57, %v1254_v58  ;;  %v1103_v29 = vld [vmem:[%s8826_s20 + $0x88] sm:$0xff] }
 0x50f   :  { %2707 = vmatpush1.bf16.msra.mxu0 %v5262_v32  ;;  %2738 = vmatprep.mubr.bf16.mxu0 %v7071_v55  ;;  %v5323_v32 = vcombine.high %v1140_v27, %v1148_v28  ;;  %v5391_v47 = vcombine.high %v1214_v41, %v1222_v42  ;;  %v5390_v52 = vcombine.low %v1214_v41, %v1222_v42  ;;  %v1310_v27 = vld [vmem:[%s8826_s20 + $0x700] sm:$0xff]  ;;  %v1111_v51 = vld [vmem:[%s8826_s20 + $0xc8] sm:$0xff] }
 0x510   :  { %2708 = vmatprep.subr.bf16.mxu0 %v5279_v54  ;;  %v5407_v54 = vcombine.high %v1230_v49, %v1238_v50  ;;  %v1318_v28 = vld [vmem:[%s8826_s20 + $0x740] sm:$0xff]  ;;  %v5503_v41 = vcombine.high %v1326_v35, %v1334_v36  ;;  %v5281_v58 = vcombine.high %v1103_v29, %v1111_v51 }
 0x511   :  { %v871_v59 = vpop.permute.xlu1 %870  ;;  %v5487_v33 = vcombine.high %v1310_v27, %v1318_v28 }
 0x512   :  { %v878_v1 = vsel %vm877_vm8, %v876_v63, %v871_v59  ;;  %v5406_v59 = vcombine.low %v1230_v49, %v1238_v50  ;;  %v1262_v63 = vld [vmem:[%s8826_s20 + $0x580] sm:$0xff] }
 0x513   :  { %2709 = vmatpush1.bf16.msra.mxu0 %v5278_v25  ;;  %v1204_v25 = vld [vmem:[%s8826_s20 + $0x3b0] sm:$0xff] }
 0x514   :  { %2710 = vmatprep.subr.bf16.mxu0 %v5295_v26  ;;  %v1212_v26 = vld [vmem:[%s8826_s20 + $0x3f0] sm:$0xff] }
 0x515   :  { %v874_v2 = vpop.permute.xlu1 %873  ;;  %v5386_v5 = vcombine.low %v1204_v25, %v1212_v26 }
 0x516   :  { %v880_v6 = vsel %vm879_vm9, %v878_v1, %v874_v2  ;;  %v1220_v1 = vld [vmem:[%s8826_s20 + $0x430] sm:$0xff] }
 0x517   :  { %v926_v9 = vmul.f32 %v880_v6, %v6930_v21  ;;  %v927_v10 = vmul.f32 %v880_v6, %v6932_v22  ;;  %2711 = vmatpush1.bf16.msra.mxu0 %v5294_v62  ;;  %v1132_v22 = vld [vmem:[%s8826_s20 + $0x170] sm:$0xff]  ;;  %v5387_v62 = vcombine.high %v1204_v25, %v1212_v26  ;;  %v1119_v26 = vld [vmem:[%s8826_s20 + $0x108] sm:$0xff] }
 0x518   :  { %2712 = vmatprep.subr.bf16.mxu0 %v5311_v0  ;;  %v5307_v20 = vcombine.high %v1124_v16, %v1132_v22  ;;  %v5306_v30 = vcombine.low %v1124_v16, %v1132_v22  ;;  %v1270_v0 = vld [vmem:[%s8826_s20 + $0x5c0] sm:$0xff]  ;;  %v1228_v2 = vld [vmem:[%s8826_s20 + $0x470] sm:$0xff] }
 0x519   :  { %999 = vmatprep.mubr.f32.mxu1 %v927_v10  ;;  %v5439_v6 = vcombine.high %v1262_v63, %v1270_v0  ;;  %v5403_v7 = vcombine.high %v1220_v1, %v1228_v2  ;;  %v1236_v10 = vld [vmem:[%s8826_s20 + $0x4b0] sm:$0xff]  ;;  %v5402_v13 = vcombine.low %v1220_v1, %v1228_v2  ;;  %v1294_v16 = vld [vmem:[%s8826_s20 + $0x680] sm:$0xff]  ;;  %v1135_v1 = vld [vmem:[%s8826_s20 + $0x188] sm:$0xff] }
 0x51a   :  { %1000 = vmatmul.mubr.f32.vlgmr.msra.gmra.mrb[16].mxu1 %v926_v9  ;;  %v1286_v9 = vld [vmem:[%s8826_s20 + $0x640] sm:$0xff]  ;;  %v1143_v2 = vld [vmem:[%s8826_s20 + $0x1c8] sm:$0xff] }
 0x51b   :  { %2713 = vmatpush1.bf16.msra.mxu0 %v5310_v11  ;;  %2953 = vmatpush1.bf16.msra.mxu1 %v5274_v43  ;;  %v1172_v43 = vld [vmem:[%s8826_s20 + $0x2b0] sm:$0xff]  ;;  %v1302_v22 = vld [vmem:[%s8826_s20 + $0x6c0] sm:$0xff] }
 0x51c   :  { %2984 = vmatprep.mubr.bf16.mxu1 %v7071_v55  ;;  %2714 = vmatprep.subr.bf16.mxu0 %v5327_v12  ;;  %v5355_v48 = vcombine.high %v1172_v43, %v1180_v44  ;;  %v5354_v53 = vcombine.low %v1172_v43, %v1180_v44  ;;  %v1244_v11 = vld [vmem:[%s8826_s20 + $0x4f0] sm:$0xff]  ;;  %v5438_v12 = vcombine.low %v1262_v63, %v1270_v0  ;;  %v1087_v43 = vld [vmem:[%s8826_s20 + $0x8] sm:$0xff] }
 0x51d   :  { %2954 = vmatprep.subr.bf16.mxu1 %v5291_v14  ;;  %v5455_v14 = vcombine.high %v1278_v8, %v1286_v9  ;;  %v5419_v15 = vcombine.high %v1236_v10, %v1244_v11  ;;  %v5471_v23 = vcombine.high %v1294_v16, %v1302_v22  ;;  %v1095_v44 = vld [vmem:[%s8826_s20 + $0x48] sm:$0xff] }
 0x51e   :  { %v5265_v49 = vcombine.high %v1087_v43, %v1095_v44 }
 0x51f   :  { %2715 = vmatpush1.bf16.msra.mxu0 %v5326_v17  ;;  %2955 = vmatpush1.bf16.msra.mxu1 %v5290_v18  ;;  %v1252_v17 = vld [vmem:[%s8826_s20 + $0x530] sm:$0xff] }
 0x520   :  { %2716 = vmatprep.subr.bf16.mxu0 %v5343_v19  ;;  %2956 = vmatprep.subr.bf16.mxu1 %v5307_v20  ;;  %v1260_v18 = vld [vmem:[%s8826_s20 + $0x570] sm:$0xff]  ;;  %v5454_v19 = vcombine.low %v1278_v8, %v1286_v9  ;;  %v5418_v20 = vcombine.low %v1236_v10, %v1244_v11  ;;  %v1159_v8 = vld [vmem:[%s8826_s20 + $0x248] sm:$0xff]  ;;  %v5312_v9 = vcombine.low %v1135_v1, %v1143_v2 }
 0x521   :  { %v5435_v24 = vcombine.high %v1252_v17, %v1260_v18  ;;  %v1167_v11 = vld [vmem:[%s8826_s20 + $0x288] sm:$0xff] }
 0x523   :  { %2717 = vmatpush1.bf16.msra.mxu0 %v5342_v4  ;;  %2957 = vmatpush1.bf16.msra.mxu1 %v5306_v30  ;;  %v1268_v4 = vld [vmem:[%s8826_s20 + $0x5b0] sm:$0xff] }
 0x524   :  { %2718 = vmatprep.subr.bf16.mxu0 %v5359_v31  ;;  %2958 = vmatprep.subr.bf16.mxu1 %v5323_v32  ;;  %v1276_v30 = vld [vmem:[%s8826_s20 + $0x5f0] sm:$0xff]  ;;  %v5470_v31 = vcombine.low %v1294_v16, %v1302_v22  ;;  %v5434_v32 = vcombine.low %v1252_v17, %v1260_v18  ;;  %v1191_v16 = vld [vmem:[%s8826_s20 + $0x348] sm:$0xff] }
 0x525   :  { %v5451_v34 = vcombine.high %v1268_v4, %v1276_v30  ;;  %v1199_v18 = vld [vmem:[%s8826_s20 + $0x388] sm:$0xff] }
 0x527   :  { %2719 = vmatpush1.bf16.msra.mxu0 %v5358_v37  ;;  %2959 = vmatpush1.bf16.msra.mxu1 %v5322_v38  ;;  %v1284_v37 = vld [vmem:[%s8826_s20 + $0x630] sm:$0xff] }
 0x528   :  { %2720 = vmatprep.subr.bf16.mxu0 %v5375_v39  ;;  %2960 = vmatprep.subr.bf16.mxu1 %v5339_v40  ;;  %v1292_v38 = vld [vmem:[%s8826_s20 + $0x670] sm:$0xff]  ;;  %v5486_v39 = vcombine.low %v1310_v27, %v1318_v28  ;;  %v5450_v40 = vcombine.low %v1268_v4, %v1276_v30  ;;  %v1223_v27 = vld [vmem:[%s8826_s20 + $0x448] sm:$0xff] }
 0x529   :  { %v5467_v42 = vcombine.high %v1284_v37, %v1292_v38  ;;  %v1231_v4 = vld [vmem:[%s8826_s20 + $0x488] sm:$0xff] }
 0x52a   :  { %v1239_v30 = vld [vmem:[%s8826_s20 + $0x4c8] sm:$0xff] }
 0x52b   :  { %2721 = vmatpush1.bf16.msra.mxu0 %v5374_v45  ;;  %2961 = vmatpush1.bf16.msra.mxu1 %v5338_v46  ;;  %v1300_v45 = vld [vmem:[%s8826_s20 + $0x6b0] sm:$0xff] }
 0x52c   :  { %2722 = vmatprep.subr.bf16.mxu0 %v5391_v47  ;;  %2962 = vmatprep.subr.bf16.mxu1 %v5355_v48  ;;  %v1308_v46 = vld [vmem:[%s8826_s20 + $0x6f0] sm:$0xff]  ;;  %v5502_v47 = vcombine.low %v1326_v35, %v1334_v36  ;;  %v5466_v48 = vcombine.low %v1284_v37, %v1292_v38  ;;  %v1247_v35 = vld [vmem:[%s8826_s20 + $0x508] sm:$0xff]  ;;  %v5409_v37 = vcombine.high %v1231_v4, %v1239_v30 }
 0x52d   :  { %v5483_v50 = vcombine.high %v1300_v45, %v1308_v46  ;;  %v5482_v57 = vcombine.low %v1300_v45, %v1308_v46  ;;  %v6163_v36 = vld [vmem:[%s8829_s22 + $0x14] ss:$8 sps:$4 sm:$0xff]   ;;  %v1255_v38 = vld [vmem:[%s8826_s20 + $0x548] sm:$0xff] }
 0x52e   :  { %v6164_v45 = vld [vmem:[%s8829_s22 + $0x20] ss:$8 sps:$4 sm:$0xff]   ;;  %v5424_v46 = vcombine.low %v1247_v35, %v1255_v38 }
 0x52f   :  { %2723 = vmatpush1.bf16.msra.mxu0 %v5390_v52  ;;  %2963 = vmatpush1.bf16.msra.mxu1 %v5354_v53  ;;  %v1316_v52 = vld [vmem:[%s8826_s20 + $0x730] sm:$0xff] }
 0x530   :  { %2724 = vmatprep.subr.bf16.mxu0 %v5407_v54  ;;  %2964 = vmatprep.subr.bf16.mxu1 %v5371_v56  ;;  %v1324_v53 = vld [vmem:[%s8826_s20 + $0x770] sm:$0xff]  ;;  %v5264_v54 = vcombine.low %v1087_v43, %v1095_v44  ;;  %v7262_v56 = vpack.c.bf16 %v6930_v21, %v6930_v21  ;;  %v1271_v43 = vld [vmem:[%s8826_s20 + $0x5c8] sm:$0xff] }
 0x531   :  { %v5499_v25 = vcombine.high %v1316_v52, %v1324_v53  ;;  %v1332_v21 = vld [vmem:[%s8826_s20 + $0x7b0] sm:$0xff]  ;;  %v6166_v44 = vld [vmem:[%s8829_s22 + $0x24] ss:$8 sps:$4 sm:$0xff]  }
 0x533   :  { %2725 = vmatpush1.bf16.msra.mxu0 %v5406_v59  ;;  %2965 = vmatpush1.bf16.msra.mxu1 %v5370_v60  ;;  %v1127_v59 = vld [vmem:[%s8826_s20 + $0x148] sm:$0xff]  ;;  %v1340_v60 = vld [vmem:[%s8826_s20 + $0x7f0] sm:$0xff] }
 0x534   :  { %2726 = vmatprep.subr.bf16.mxu0 %v5423_v61  ;;  %2966 = vmatprep.subr.bf16.mxu1 %v5387_v62  ;;  %v5280_v61 = vcombine.low %v1103_v29, %v1111_v51  ;;  %v5498_v62 = vcombine.low %v1316_v52, %v1324_v53  ;;  %v5297_v63 = vcombine.high %v1119_v26, %v1127_v59  ;;  %v6167_v29 = vld [vmem:[%s8829_s22 + $0x30] ss:$8 sps:$4 sm:$0xff]   ;;  %v1295_v52 = vld [vmem:[%s8826_s20 + $0x688] sm:$0xff] }
 0x535   :  { %v5515_v0 = vcombine.high %v1332_v21, %v1340_v60  ;;  %v1303_v53 = vld [vmem:[%s8826_s20 + $0x6c8] sm:$0xff] }
 0x537   :  { %2727 = vmatpush1.bf16.msra.mxu0 %v5422_v3  ;;  %2967 = vmatpush1.bf16.msra.mxu1 %v5386_v5  ;;  %v5296_v3 = vcombine.low %v1119_v26, %v1127_v59  ;;  %v5514_v5 = vcombine.low %v1332_v21, %v1340_v60  ;;  %v1311_v26 = vld [vmem:[%s8826_s20 + $0x708] sm:$0xff]  ;;  %v6175_v21 = vld [vmem:[%s8829_s22 + $0x54] ss:$8 sps:$4 sm:$0xff]   ;;  %v5473_v60 = vcombine.high %v1295_v52, %v1303_v53 }
 0x538   :  { %2728 = vmatprep.subr.bf16.mxu0 %v5439_v6  ;;  %2968 = vmatprep.subr.bf16.mxu1 %v5403_v7  ;;  %v5313_v6 = vcombine.high %v1135_v1, %v1143_v2  ;;  %v1151_v7 = vld [vmem:[%s8826_s20 + $0x208] sm:$0xff] }
 0x539   :  { %v5329_v10 = vcombine.high %v1151_v7, %v1159_v8  ;;  %v1319_v59 = vld [vmem:[%s8826_s20 + $0x748] sm:$0xff] }
 0x53a   :  { %v6178_v1 = vld [vmem:[%s8829_s22 + $0x64] ss:$8 sps:$4 sm:$0xff]   ;;  %v5489_v2 = vcombine.high %v1311_v26, %v1319_v59 }
 0x53b   :  { %2729 = vmatpush1.bf16.msra.mxu0 %v5438_v12  ;;  %2969 = vmatpush1.bf16.msra.mxu1 %v5402_v13  ;;  %v1175_v12 = vld [vmem:[%s8826_s20 + $0x2c8] sm:$0xff]  ;;  %v5328_v13 = vcombine.low %v1151_v7, %v1159_v8  ;;  %v1096_v7 = vld [vmem:[%s8826_s20 + $0x50] sm:$0xff] }
 0x53c   :  { %2730 = vmatprep.subr.bf16.mxu0 %v5455_v14  ;;  %2970 = vmatprep.subr.bf16.mxu1 %v5419_v15  ;;  %v5345_v14 = vcombine.high %v1167_v11, %v1175_v12  ;;  %v1183_v15 = vld [vmem:[%s8826_s20 + $0x308] sm:$0xff]  ;;  %v5344_v22 = vcombine.low %v1167_v11, %v1175_v12  ;;  %v6181_v8 = vld [vmem:[%s8829_s22 + $0x74] ss:$8 sps:$4 sm:$0xff]  }
 0x53d   :  { %v5361_v17 = vcombine.high %v1183_v15, %v1191_v16  ;;  %v1104_v12 = vld [vmem:[%s8826_s20 + $0x90] sm:$0xff] }
 0x53f   :  { %2731 = vmatpush1.bf16.msra.mxu0 %v5454_v19  ;;  %2971 = vmatpush1.bf16.msra.mxu1 %v5418_v20  ;;  %v1207_v19 = vld [vmem:[%s8826_s20 + $0x3c8] sm:$0xff]  ;;  %v5360_v20 = vcombine.low %v1183_v15, %v1191_v16 }
 0x540   :  { %2732 = vmatprep.subr.bf16.mxu0 %v5471_v23  ;;  %2972 = vmatprep.subr.bf16.mxu1 %v5435_v24  ;;  %v5377_v23 = vcombine.high %v1199_v18, %v1207_v19  ;;  %v1215_v24 = vld [vmem:[%s8826_s20 + $0x408] sm:$0xff]  ;;  %v5376_v28 = vcombine.low %v1199_v18, %v1207_v19  ;;  %v6187_v18 = vld [vmem:[%s8829_s22 + $0x94] ss:$8 sps:$4 sm:$0xff]  }
 0x541   :  { %v6182_v16 = vld [vmem:[%s8829_s22 + $0x80] ss:$8 sps:$4 sm:$0xff]  }
 0x543   :  { %2733 = vmatpush1.bf16.msra.mxu0 %v5470_v31  ;;  %2973 = vmatpush1.bf16.msra.mxu1 %v5434_v32  ;;  %v5393_v31 = vcombine.high %v1215_v24, %v1223_v27  ;;  %v6158_v32 = vld [vmem:[%s8829_s22] ss:$8 sps:$4 sm:$0xff]  }
 0x544   :  { %2734 = vmatprep.subr.bf16.mxu0 %v5487_v33  ;;  %2974 = vmatprep.subr.bf16.mxu1 %v5451_v34  ;;  %v6160_v33 = vld [vmem:[%s8829_s22 + $0x4] ss:$8 sps:$4 sm:$0xff]   ;;  %v5392_v34 = vcombine.low %v1215_v24, %v1223_v27  ;;  %v1136_v27 = vld [vmem:[%s8826_s20 + $0x190] sm:$0xff] }
 0x547   :  { %2735 = vmatpush1.bf16.msra.mxu0 %v5486_v39  ;;  %2975 = vmatpush1.bf16.msra.mxu1 %v5450_v40  ;;  %v6161_v39 = vld [vmem:[%s8829_s22 + $0x10] ss:$8 sps:$4 sm:$0xff]   ;;  %v5408_v40 = vcombine.low %v1231_v4, %v1239_v30  ;;  %v6190_v4 = vld [vmem:[%s8829_s22 + $0xa4] ss:$8 sps:$4 sm:$0xff]  }
 0x548   :  { %2736 = vmatprep.subr.bf16.mxu0 %v5503_v41  ;;  %2976 = vmatprep.subr.bf16.mxu1 %v5467_v42  ;;  %v5425_v41 = vcombine.high %v1247_v35, %v1255_v38  ;;  %v1263_v42 = vld [vmem:[%s8826_s20 + $0x588] sm:$0xff]  ;;  %v6193_v35 = vld [vmem:[%s8829_s22 + $0xb4] ss:$8 sps:$4 sm:$0xff]  }
 0x549   :  { %v5440_v51 = vcombine.low %v1263_v42, %v1271_v43 }
 0x54b   :  { %2737 = vmatpush1.bf16.msra.mxu0 %v5502_v47  ;;  %2977 = vmatpush1.bf16.msra.mxu1 %v5466_v48  ;;  %v1279_v47 = vld [vmem:[%s8826_s20 + $0x608] sm:$0xff] }
 0x54c   :  { %2747 = vmatprep.subr.bf16.mxu0 %v5265_v49  ;;  %2978 = vmatprep.subr.bf16.mxu1 %v5483_v50  ;;  %v1287_v48 = vld [vmem:[%s8826_s20 + $0x648] sm:$0xff]  ;;  %v6169_v49 = vld [vmem:[%s8829_s22 + $0x34] ss:$8 sps:$4 sm:$0xff]   ;;  %v5441_v50 = vcombine.high %v1263_v42, %v1271_v43 }
 0x54d   :  { %v6194_v43 = vld [vmem:[%s8829_s22 + $0xc0] ss:$8 sps:$4 sm:$0xff]  }
 0x54e   :  { %2739 = vmatmul.mubr.bf16.vlgmr.msra.gmra.mrb[20].mxu0 %v7262_v56 }
 0x54f   :  { %2748 = vmatpush1.bf16.msra.mxu0 %v5264_v54  ;;  %2779 = vmatprep.mubr.bf16.mxu0 %v7071_v55  ;;  %v6172_v54 = vld [vmem:[%s8829_s22 + $0x44] ss:$8 sps:$4 sm:$0xff]  }
 0x550   :  { %2979 = vmatpush1.bf16.msra.mxu1 %v5482_v57  ;;  %2749 = vmatprep.subr.bf16.mxu0 %v5281_v58  ;;  %v5457_v57 = vcombine.high %v1279_v47, %v1287_v48  ;;  %v6170_v58 = vld [vmem:[%s8829_s22 + $0x40] ss:$8 sps:$4 sm:$0xff]  }
 0x551   :  { %2980 = vmatprep.subr.bf16.mxu1 %v5499_v25  ;;  %v5456_v25 = vcombine.low %v1279_v47, %v1287_v48  ;;  %v6199_v47 = vld [vmem:[%s8829_s22 + $0xd4] ss:$8 sps:$4 sm:$0xff]  }
 0x553   :  { %2750 = vmatpush1.bf16.msra.mxu0 %v5280_v61  ;;  %v6173_v61 = vld [vmem:[%s8829_s22 + $0x50] ss:$8 sps:$4 sm:$0xff]  }
 0x554   :  { %2981 = vmatpush1.bf16.msra.mxu1 %v5498_v62  ;;  %2751 = vmatprep.subr.bf16.mxu0 %v5297_v63  ;;  %v5472_v62 = vcombine.low %v1295_v52, %v1303_v53  ;;  %v1327_v63 = vld [vmem:[%s8826_s20 + $0x788] sm:$0xff]  ;;  %v1208_v53 = vld [vmem:[%s8826_s20 + $0x3d0] sm:$0xff] }
 0x555   :  { %2982 = vmatprep.subr.bf16.mxu1 %v5515_v0  ;;  %v1335_v0 = vld [vmem:[%s8826_s20 + $0x7c8] sm:$0xff] }
 0x556   :  { %v5504_v11 = vcombine.low %v1327_v63, %v1335_v0  ;;  %v6202_v52 = vld [vmem:[%s8829_s22 + $0xe4] ss:$8 sps:$4 sm:$0xff]  }
 0x557   :  { %2752 = vmatpush1.bf16.msra.mxu0 %v5296_v3  ;;  %v6176_v3 = vld [vmem:[%s8829_s22 + $0x60] ss:$8 sps:$4 sm:$0xff]  }
 0x558   :  { %2983 = vmatpush1.bf16.msra.mxu1 %v5514_v5  ;;  %2753 = vmatprep.subr.bf16.mxu0 %v5313_v6  ;;  %v5488_v5 = vcombine.low %v1311_v26, %v1319_v59  ;;  %v1088_v6 = vld [vmem:[%s8826_s20 + $0x10] sm:$0xff] }
 0x559   :  { %4614 = vmatprep.subr.bf16.mxu1 %v6160_v33  ;;  %v5267_v15 = vcombine.high %v1088_v6, %v1096_v7  ;;  %v1152_v33 = vld [vmem:[%s8826_s20 + $0x210] sm:$0xff] }
 0x55a   :  { %v1224_v26 = vld [vmem:[%s8826_s20 + $0x450] sm:$0xff] }
 0x55b   :  { %2985 = vmatmul.mubr.bf16.vlgmr.msra.gmra.mrb[20].mxu1 %v7262_v56  ;;  %2754 = vmatpush1.bf16.msra.mxu0 %v5312_v9  ;;  %v5505_v9 = vcombine.high %v1327_v63, %v1335_v0  ;;  %v6205_v59 = vld [vmem:[%s8829_s22 + $0xf4] ss:$8 sps:$4 sm:$0xff]   ;;  %v6208_v63 = vld [vmem:[%s8829_s22 + $0x104] ss:$8 sps:$4 sm:$0xff]  }
 0x55c   :  { %2755 = vmatprep.subr.bf16.mxu0 %v5329_v10  ;;  %4615 = vmatpush1.bf16.msra.mxu1 %v6158_v32  ;;  %v6179_v10 = vld [vmem:[%s8829_s22 + $0x70] ss:$8 sps:$4 sm:$0xff]  }
 0x55d   :  { %4616 = vmatprep.subr.bf16.mxu1 %v6163_v36  ;;  %v1240_v0 = vld [vmem:[%s8826_s20 + $0x4d0] sm:$0xff] }
 0x55f   :  { %2756 = vmatpush1.bf16.msra.mxu0 %v5328_v13  ;;  %v1112_v13 = vld [vmem:[%s8826_s20 + $0xd0] sm:$0xff] }
 0x560   :  { %2757 = vmatprep.subr.bf16.mxu0 %v5345_v14  ;;  %4617 = vmatpush1.bf16.msra.mxu1 %v6161_v39  ;;  %v6184_v14 = vld [vmem:[%s8829_s22 + $0x84] ss:$8 sps:$4 sm:$0xff]   ;;  %v5283_v19 = vcombine.high %v1104_v12, %v1112_v13  ;;  %v5282_v24 = vcombine.low %v1104_v12, %v1112_v13  ;;  %v1168_v39 = vld [vmem:[%s8826_s20 + $0x290] sm:$0xff] }
 0x561   :  { %4618 = vmatprep.subr.bf16.mxu1 %v6166_v44  ;;  %v1280_v12 = vld [vmem:[%s8826_s20 + $0x610] sm:$0xff] }
 0x562   :  { %v1288_v13 = vld [vmem:[%s8826_s20 + $0x650] sm:$0xff] }
 0x563   :  { %2758 = vmatpush1.bf16.msra.mxu0 %v5344_v22  ;;  %v5266_v22 = vcombine.low %v1088_v6, %v1096_v7 }
 0x564   :  { %2759 = vmatprep.subr.bf16.mxu0 %v5361_v17  ;;  %4619 = vmatpush1.bf16.msra.mxu1 %v6164_v45  ;;  %v1120_v17 = vld [vmem:[%s8826_s20 + $0x110] sm:$0xff] }
 0x565   :  { %4620 = vmatprep.subr.bf16.mxu1 %v6169_v49  ;;  %v1184_v45 = vld [vmem:[%s8826_s20 + $0x310] sm:$0xff] }
 0x566   :  { %v6197_v49 = vld [vmem:[%s8829_s22 + $0xd0] ss:$8 sps:$4 sm:$0xff]  }
 0x567   :  { %2760 = vmatpush1.bf16.msra.mxu0 %v5360_v20  ;;  %v1128_v20 = vld [vmem:[%s8826_s20 + $0x150] sm:$0xff] }
 0x568   :  { %2761 = vmatprep.subr.bf16.mxu0 %v5377_v23  ;;  %4621 = vmatpush1.bf16.msra.mxu1 %v6167_v29  ;;  %v6185_v23 = vld [vmem:[%s8829_s22 + $0x90] ss:$8 sps:$4 sm:$0xff]   ;;  %v5299_v30 = vcombine.high %v1120_v17, %v1128_v20  ;;  %v5298_v32 = vcombine.low %v1120_v17, %v1128_v20  ;;  %v5458_v17 = vcombine.low %v1280_v12, %v1288_v13 }
 0x569   :  { %4622 = vmatprep.subr.bf16.mxu1 %v6172_v54  ;;  %v6200_v54 = vld [vmem:[%s8829_s22 + $0xe0] ss:$8 sps:$4 sm:$0xff]   ;;  %v1320_v20 = vld [vmem:[%s8826_s20 + $0x750] sm:$0xff] }
 0x56b   :  { %2762 = vmatpush1.bf16.msra.mxu0 %v5376_v28  ;;  %v1144_v28 = vld [vmem:[%s8826_s20 + $0x1d0] sm:$0xff] }
 0x56c   :  { %2763 = vmatprep.subr.bf16.mxu0 %v5393_v31  ;;  %4623 = vmatpush1.bf16.msra.mxu1 %v6170_v58  ;;  %v6188_v31 = vld [vmem:[%s8829_s22 + $0xa0] ss:$8 sps:$4 sm:$0xff]   ;;  %v5315_v36 = vcombine.high %v1136_v27, %v1144_v28  ;;  %v5314_v38 = vcombine.low %v1136_v27, %v1144_v28  ;;  %v1328_v27 = vld [vmem:[%s8826_s20 + $0x790] sm:$0xff] }
 0x56d   :  { %4624 = vmatprep.subr.bf16.mxu1 %v6175_v21  ;;  %v6203_v21 = vld [vmem:[%s8829_s22 + $0xf0] ss:$8 sps:$4 sm:$0xff]  }
 0x56e   :  { %v1336_v28 = vld [vmem:[%s8826_s20 + $0x7d0] sm:$0xff] }
 0x56f   :  { %2764 = vmatpush1.bf16.msra.mxu0 %v5392_v34  ;;  %v1160_v34 = vld [vmem:[%s8826_s20 + $0x250] sm:$0xff] }
 0x570   :  { %2765 = vmatprep.subr.bf16.mxu0 %v5409_v37  ;;  %4625 = vmatpush1.bf16.msra.mxu1 %v6173_v61  ;;  %v6191_v37 = vld [vmem:[%s8829_s22 + $0xb0] ss:$8 sps:$4 sm:$0xff]   ;;  %v5331_v42 = vcombine.high %v1152_v33, %v1160_v34  ;;  %v5330_v44 = vcombine.low %v1152_v33, %v1160_v34  ;;  %v5506_v33 = vcombine.low %v1328_v27, %v1336_v28 }
 0x571   :  { %4626 = vmatprep.subr.bf16.mxu1 %v6178_v1 }
 0x573   :  { %2766 = vmatpush1.bf16.msra.mxu0 %v5408_v40  ;;  %v1176_v40 = vld [vmem:[%s8826_s20 + $0x2d0] sm:$0xff] }
 0x574   :  { %2767 = vmatprep.subr.bf16.mxu0 %v5425_v41  ;;  %4627 = vmatpush1.bf16.msra.mxu1 %v6176_v3  ;;  %v6196_v41 = vld [vmem:[%s8829_s22 + $0xc4] ss:$8 sps:$4 sm:$0xff]   ;;  %v5347_v48 = vcombine.high %v1168_v39, %v1176_v40  ;;  %v1248_v3 = vld [vmem:[%s8826_s20 + $0x510] sm:$0xff] }
 0x575   :  { %4628 = vmatprep.subr.bf16.mxu1 %v6181_v8  ;;  %v1264_v8 = vld [vmem:[%s8826_s20 + $0x590] sm:$0xff] }
 0x577   :  { %2768 = vmatpush1.bf16.msra.mxu0 %v5424_v46  ;;  %v1192_v46 = vld [vmem:[%s8826_s20 + $0x350] sm:$0xff] }
 0x578   :  { %2769 = vmatprep.subr.bf16.mxu0 %v5441_v50  ;;  %4629 = vmatpush1.bf16.msra.mxu1 %v6179_v10  ;;  %v5346_v50 = vcombine.low %v1168_v39, %v1176_v40  ;;  %v5363_v29 = vcombine.high %v1184_v45, %v1192_v46  ;;  %v1121_v39 = vld [vmem:[%s8826_s20 + $0x118] sm:$0xff] }
 0x579   :  { %4630 = vmatprep.subr.bf16.mxu1 %v6184_v14  ;;  %v1129_v40 = vld [vmem:[%s8826_s20 + $0x158] sm:$0xff] }
 0x57b   :  { %2770 = vmatpush1.bf16.msra.mxu0 %v5440_v51  ;;  %v1200_v51 = vld [vmem:[%s8826_s20 + $0x390] sm:$0xff] }
 0x57c   :  { %2771 = vmatprep.subr.bf16.mxu0 %v5457_v57  ;;  %4631 = vmatpush1.bf16.msra.mxu1 %v6182_v16  ;;  %v5362_v57 = vcombine.low %v1184_v45, %v1192_v46  ;;  %v5379_v58 = vcombine.high %v1200_v51, %v1208_v53  ;;  %v1296_v16 = vld [vmem:[%s8826_s20 + $0x690] sm:$0xff]  ;;  %v5300_v45 = vcombine.low %v1121_v39, %v1129_v40 }
 0x57d   :  { %4632 = vmatprep.subr.bf16.mxu1 %v6187_v18 }
 0x57f   :  { %2772 = vmatpush1.bf16.msra.mxu0 %v5456_v25  ;;  %v1216_v25 = vld [vmem:[%s8826_s20 + $0x410] sm:$0xff] }
 0x580   :  { %2773 = vmatprep.subr.bf16.mxu0 %v5473_v60  ;;  %4633 = vmatpush1.bf16.msra.mxu1 %v6185_v23  ;;  %v5378_v60 = vcombine.low %v1200_v51, %v1208_v53  ;;  %v5395_v61 = vcombine.high %v1216_v25, %v1224_v26  ;;  %v5394_v1 = vcombine.low %v1216_v25, %v1224_v26  ;;  %v1177_v51 = vld [vmem:[%s8826_s20 + $0x2d8] sm:$0xff]  ;;  %v5261_v25 = vld [vmem:[%s8830_s18] ss:$0 sm:$0xff] }
 0x581   :  { %4634 = vmatprep.subr.bf16.mxu1 %v6190_v4 }
 0x583   :  { %2774 = vmatpush1.bf16.msra.mxu0 %v5472_v62  ;;  %v1232_v62 = vld [vmem:[%s8826_s20 + $0x490] sm:$0xff] }
 0x584   :  { %2775 = vmatprep.subr.bf16.mxu0 %v5489_v2  ;;  %4635 = vmatpush1.bf16.msra.mxu1 %v6188_v31  ;;  %v5411_v2 = vcombine.high %v1232_v62, %v1240_v0  ;;  %v5410_v6 = vcombine.low %v1232_v62, %v1240_v0  ;;  %v1089_v31 = vld [vmem:[%s8826_s20 + $0x18] sm:$0xff] }
 0x585   :  { %4636 = vmatprep.subr.bf16.mxu1 %v6193_v35  ;;  %v1105_v35 = vld [vmem:[%s8826_s20 + $0x98] sm:$0xff] }
 0x587   :  { %2776 = vmatpush1.bf16.msra.mxu0 %v5488_v5  ;;  %v1256_v5 = vld [vmem:[%s8826_s20 + $0x550] sm:$0xff] }
 0x588   :  { %2777 = vmatprep.subr.bf16.mxu0 %v5505_v9  ;;  %4637 = vmatpush1.bf16.msra.mxu1 %v6191_v37  ;;  %v5427_v7 = vcombine.high %v1248_v3, %v1256_v5  ;;  %v1272_v9 = vld [vmem:[%s8826_s20 + $0x5d0] sm:$0xff]  ;;  %v5426_v10 = vcombine.low %v1248_v3, %v1256_v5  ;;  %v1225_v3 = vld [vmem:[%s8826_s20 + $0x458] sm:$0xff] }
 0x589   :  { %4638 = vmatprep.subr.bf16.mxu1 %v6196_v41  ;;  %v5442_v14 = vcombine.low %v1264_v8, %v1272_v9 }
 0x58b   :  { %2778 = vmatpush1.bf16.msra.mxu0 %v5504_v11  ;;  %v5443_v11 = vcombine.high %v1264_v8, %v1272_v9  ;;  %v1241_v8 = vld [vmem:[%s8826_s20 + $0x4d8] sm:$0xff] }
 0x58c   :  { %2788 = vmatprep.subr.bf16.mxu0 %v5267_v15  ;;  %4639 = vmatpush1.bf16.msra.mxu1 %v6194_v43  ;;  %v5459_v15 = vcombine.high %v1280_v12, %v1288_v13  ;;  %v1137_v43 = vld [vmem:[%s8826_s20 + $0x198] sm:$0xff] }
 0x58d   :  { %4640 = vmatprep.subr.bf16.mxu1 %v6199_v47  ;;  %v1153_v47 = vld [vmem:[%s8826_s20 + $0x218] sm:$0xff] }
 0x58e   :  { %2780 = vmatmul.mubr.bf16.vlgmr.msra.gmra.mrb[24].mxu0 %v7262_v56  ;;  %v1249_v12 = vld [vmem:[%s8826_s20 + $0x518] sm:$0xff] }
 0x58f   :  { %2789 = vmatpush1.bf16.msra.mxu0 %v5266_v22  ;;  %2820 = vmatprep.mubr.bf16.mxu0 %v7071_v55  ;;  %v1304_v22 = vld [vmem:[%s8826_s20 + $0x6d0] sm:$0xff]  ;;  %v1257_v13 = vld [vmem:[%s8826_s20 + $0x558] sm:$0xff] }
 0x590   :  { %2790 = vmatprep.subr.bf16.mxu0 %v5283_v19  ;;  %4641 = vmatpush1.bf16.msra.mxu1 %v6197_v49  ;;  %v5475_v18 = vcombine.high %v1296_v16, %v1304_v22  ;;  %v1312_v19 = vld [vmem:[%s8826_s20 + $0x710] sm:$0xff]  ;;  %v5474_v23 = vcombine.low %v1296_v16, %v1304_v22  ;;  %v5429_v22 = vcombine.high %v1249_v12, %v1257_v13 }
 0x591   :  { %4642 = vmatprep.subr.bf16.mxu1 %v6202_v52  ;;  %v5490_v4 = vcombine.low %v1312_v19, %v1320_v20 }
 0x593   :  { %2791 = vmatpush1.bf16.msra.mxu0 %v5282_v24  ;;  %v5491_v24 = vcombine.high %v1312_v19, %v1320_v20  ;;  %v5428_v19 = vcombine.low %v1249_v12, %v1257_v13  ;;  %v1202_v12 = vld [vmem:[%s8826_s20 + $0x3a0] sm:$0xff] }
 0x594   :  { %2792 = vmatprep.subr.bf16.mxu0 %v5299_v30  ;;  %4643 = vmatpush1.bf16.msra.mxu1 %v6200_v54  ;;  %v5507_v30 = vcombine.high %v1328_v27, %v1336_v28  ;;  %v1185_v54 = vld [vmem:[%s8826_s20 + $0x318] sm:$0xff]  ;;  %v1210_v13 = vld [vmem:[%s8826_s20 + $0x3e0] sm:$0xff] }
 0x595   :  { %4644 = vmatprep.subr.bf16.mxu1 %v6205_v59  ;;  %v1201_v59 = vld [vmem:[%s8826_s20 + $0x398] sm:$0xff] }
 0x597   :  { %2793 = vmatpush1.bf16.msra.mxu0 %v5298_v32  ;;  %v1097_v32 = vld [vmem:[%s8826_s20 + $0x58] sm:$0xff] }
 0x598   :  { %2794 = vmatprep.subr.bf16.mxu0 %v5315_v36  ;;  %4645 = vmatpush1.bf16.msra.mxu1 %v6203_v21  ;;  %v5269_v34 = vcombine.high %v1089_v31, %v1097_v32  ;;  %v1113_v36 = vld [vmem:[%s8826_s20 + $0xd8] sm:$0xff]  ;;  %v5268_v37 = vcombine.low %v1089_v31, %v1097_v32 }
 0x599   :  { %4655 = vmatprep.subr.bf16.mxu1 %v6208_v63  ;;  %v5284_v41 = vcombine.low %v1105_v35, %v1113_v36 }
 0x59b   :  { %2795 = vmatpush1.bf16.msra.mxu0 %v5314_v38  ;;  %v5285_v38 = vcombine.high %v1105_v35, %v1113_v36 }
 0x59c   :  { %2796 = vmatprep.subr.bf16.mxu0 %v5331_v42  ;;  %v5301_v42 = vcombine.high %v1121_v39, %v1129_v40 }
 0x59f   :  { %2797 = vmatpush1.bf16.msra.mxu0 %v5330_v44  ;;  %v1145_v44 = vld [vmem:[%s8826_s20 + $0x1d8] sm:$0xff] }
 0x5a0   :  { %2798 = vmatprep.subr.bf16.mxu0 %v5347_v48  ;;  %v5317_v46 = vcombine.high %v1137_v43, %v1145_v44  ;;  %v1161_v48 = vld [vmem:[%s8826_s20 + $0x258] sm:$0xff]  ;;  %v5316_v49 = vcombine.low %v1137_v43, %v1145_v44 }
 0x5a1   :  { %v5332_v52 = vcombine.low %v1153_v47, %v1161_v48 }
 0x5a3   :  { %2799 = vmatpush1.bf16.msra.mxu0 %v5346_v50  ;;  %v5333_v50 = vcombine.high %v1153_v47, %v1161_v48 }
 0x5a4   :  { %2800 = vmatprep.subr.bf16.mxu0 %v5363_v29  ;;  %v1169_v29 = vld [vmem:[%s8826_s20 + $0x298] sm:$0xff] }
 0x5a5   :  { %v5349_v53 = vcombine.high %v1169_v29, %v1177_v51 }
 0x5a7   :  { %2801 = vmatpush1.bf16.msra.mxu0 %v5362_v57  ;;  %v1193_v57 = vld [vmem:[%s8826_s20 + $0x358] sm:$0xff] }
 0x5a8   :  { %2802 = vmatprep.subr.bf16.mxu0 %v5379_v58  ;;  %v5348_v58 = vcombine.low %v1169_v29, %v1177_v51  ;;  %v5365_v26 = vcombine.high %v1185_v54, %v1193_v57  ;;  %v5364_v63 = vcombine.low %v1185_v54, %v1193_v57  ;;  %v1346_v54 = vlaneseq }
 0x5ab   :  { %2803 = vmatpush1.bf16.msra.mxu0 %v5378_v60  ;;  %v1209_v60 = vld [vmem:[%s8826_s20 + $0x3d8] sm:$0xff] }
 0x5ac   :  { %2804 = vmatprep.subr.bf16.mxu0 %v5395_v61  ;;  %v5381_v0 = vcombine.high %v1201_v59, %v1209_v60  ;;  %v5380_v5 = vcombine.low %v1201_v59, %v1209_v60  ;;  %v7689_v59 = vshrl.u32 %v1346_v54, 7  ;;  %v6220_v54 = vld [vmem:[%s8829_s22 + $0x144] ss:$8 sps:$4 sm:$0xff]  }
 0x5af   :  { %2805 = vmatpush1.bf16.msra.mxu0 %v5394_v1  ;;  %v1217_v1 = vld [vmem:[%s8826_s20 + $0x418] sm:$0xff] }
 0x5b0   :  { %2806 = vmatprep.subr.bf16.mxu0 %v5411_v2  ;;  %v5396_v9 = vcombine.low %v1217_v1, %v1225_v3 }
 0x5b3   :  { %2807 = vmatpush1.bf16.msra.mxu0 %v5410_v6  ;;  %v5397_v6 = vcombine.high %v1217_v1, %v1225_v3  ;;  %v7703_v1 = vld [vmem:[%s8831_s21] sm:$0xff] }
 0x5b4   :  { %2808 = vmatprep.subr.bf16.mxu0 %v5427_v7  ;;  %v1233_v7 = vld [vmem:[%s8826_s20 + $0x498] sm:$0xff] }
 0x5b5   :  { %v5412_v16 = vcombine.low %v1233_v7, %v1241_v8 }
 0x5b7   :  { %2809 = vmatpush1.bf16.msra.mxu0 %v5426_v10  ;;  %v5413_v10 = vcombine.high %v1233_v7, %v1241_v8 }
 0x5b8   :  { %2810 = vmatprep.subr.bf16.mxu0 %v5443_v11 }
 0x5bb   :  { %2811 = vmatpush1.bf16.msra.mxu0 %v5442_v14 }
 0x5bc   :  { %2812 = vmatprep.subr.bf16.mxu0 %v5459_v15 }
 0x5bf   :  { %2813 = vmatpush1.bf16.msra.mxu0 %v5458_v17  ;;  %v1265_v17 = vld [vmem:[%s8826_s20 + $0x598] sm:$0xff] }
 0x5c0   :  { %2814 = vmatprep.subr.bf16.mxu0 %v5475_v18  ;;  %v1273_v18 = vld [vmem:[%s8826_s20 + $0x5d8] sm:$0xff] }
 0x5c1   :  { %v5445_v20 = vcombine.high %v1265_v17, %v1273_v18  ;;  %v5444_v27 = vcombine.low %v1265_v17, %v1273_v18 }
 0x5c3   :  { %2815 = vmatpush1.bf16.msra.mxu0 %v5474_v23  ;;  %v1281_v23 = vld [vmem:[%s8826_s20 + $0x618] sm:$0xff] }
 0x5c4   :  { %2816 = vmatprep.subr.bf16.mxu0 %v5491_v24  ;;  %v1289_v24 = vld [vmem:[%s8826_s20 + $0x658] sm:$0xff] }
 0x5c5   :  { %v5461_v28 = vcombine.high %v1281_v23, %v1289_v24  ;;  %v5460_v31 = vcombine.low %v1281_v23, %v1289_v24  ;;  %v5383_v23 = vcombine.high %v1202_v12, %v1210_v13 }
 0x5c7   :  { %2817 = vmatpush1.bf16.msra.mxu0 %v5490_v4  ;;  %v1297_v4 = vld [vmem:[%s8826_s20 + $0x698] sm:$0xff] }
 0x5c8   :  { %2818 = vmatprep.subr.bf16.mxu0 %v5507_v30  ;;  %v1305_v30 = vld [vmem:[%s8826_s20 + $0x6d8] sm:$0xff] }
 0x5c9   :  { %v5477_v32 = vcombine.high %v1297_v4, %v1305_v30  ;;  %v5476_v35 = vcombine.low %v1297_v4, %v1305_v30  ;;  %v6206_v30 = vld [vmem:[%s8829_s22 + $0x100] ss:$8 sps:$4 sm:$0xff]  }
 0x5cb   :  { %2819 = vmatpush1.bf16.msra.mxu0 %v5506_v33  ;;  %v1313_v33 = vld [vmem:[%s8826_s20 + $0x718] sm:$0xff] }
 0x5cc   :  { %2829 = vmatprep.subr.bf16.mxu0 %v5269_v34  ;;  %v1321_v34 = vld [vmem:[%s8826_s20 + $0x758] sm:$0xff] }
 0x5cd   :  { %v5493_v36 = vcombine.high %v1313_v33, %v1321_v34  ;;  %v5492_v39 = vcombine.low %v1313_v33, %v1321_v34  ;;  %v6211_v33 = vld [vmem:[%s8829_s22 + $0x114] ss:$8 sps:$4 sm:$0xff]  }
 0x5ce   :  { %2821 = vmatmul.mubr.bf16.vlgmr.msra.gmra.mrb[28].mxu0 %v7262_v56 }
 0x5cf   :  { %2830 = vmatpush1.bf16.msra.mxu0 %v5268_v37  ;;  %2861 = vmatprep.mubr.bf16.mxu0 %v7071_v55  ;;  %v1329_v37 = vld [vmem:[%s8826_s20 + $0x798] sm:$0xff] }
 0x5d0   :  { %2831 = vmatprep.subr.bf16.mxu0 %v5285_v38  ;;  %v1337_v38 = vld [vmem:[%s8826_s20 + $0x7d8] sm:$0xff] }
 0x5d1   :  { %v5509_v40 = vcombine.high %v1329_v37, %v1337_v38  ;;  %v5508_v43 = vcombine.low %v1329_v37, %v1337_v38  ;;  %v6209_v37 = vld [vmem:[%s8829_s22 + $0x110] ss:$8 sps:$4 sm:$0xff]  }
 0x5d3   :  { %2832 = vmatpush1.bf16.msra.mxu0 %v5284_v41  ;;  %v1090_v41 = vld [vmem:[%s8826_s20 + $0x20] sm:$0xff] }
 0x5d4   :  { %2833 = vmatprep.subr.bf16.mxu0 %v5301_v42  ;;  %v1098_v42 = vld [vmem:[%s8826_s20 + $0x60] sm:$0xff] }
 0x5d5   :  { %v5271_v44 = vcombine.high %v1090_v41, %v1098_v42  ;;  %v5270_v47 = vcombine.low %v1090_v41, %v1098_v42  ;;  %v1250_v41 = vld [vmem:[%s8826_s20 + $0x520] sm:$0xff] }
 0x5d6   :  { %v1258_v42 = vld [vmem:[%s8826_s20 + $0x560] sm:$0xff] }
 0x5d7   :  { %2834 = vmatpush1.bf16.msra.mxu0 %v5300_v45  ;;  %v1106_v45 = vld [vmem:[%s8826_s20 + $0xa0] sm:$0xff] }
 0x5d8   :  { %2835 = vmatprep.subr.bf16.mxu0 %v5317_v46  ;;  %v1114_v46 = vld [vmem:[%s8826_s20 + $0xe0] sm:$0xff] }
 0x5d9   :  { %v5287_v48 = vcombine.high %v1106_v45, %v1114_v46  ;;  %v5286_v29 = vcombine.low %v1106_v45, %v1114_v46  ;;  %v6212_v45 = vld [vmem:[%s8829_s22 + $0x120] ss:$8 sps:$4 sm:$0xff]  }
 0x5db   :  { %2836 = vmatpush1.bf16.msra.mxu0 %v5316_v49  ;;  %v1122_v49 = vld [vmem:[%s8826_s20 + $0x120] sm:$0xff] }
 0x5dc   :  { %2837 = vmatprep.subr.bf16.mxu0 %v5333_v50  ;;  %v1130_v50 = vld [vmem:[%s8826_s20 + $0x160] sm:$0xff] }
 0x5dd   :  { %v5303_v51 = vcombine.high %v1122_v49, %v1130_v50  ;;  %v5302_v57 = vcombine.low %v1122_v49, %v1130_v50  ;;  %v5431_v49 = vcombine.high %v1250_v41, %v1258_v42 }
 0x5df   :  { %2838 = vmatpush1.bf16.msra.mxu0 %v5332_v52  ;;  %v1138_v52 = vld [vmem:[%s8826_s20 + $0x1a0] sm:$0xff] }
 0x5e0   :  { %2839 = vmatprep.subr.bf16.mxu0 %v5349_v53  ;;  %v1146_v53 = vld [vmem:[%s8826_s20 + $0x1e0] sm:$0xff] }
 0x5e1   :  { %v5913_v21 = vpop.f32.mrb[16].mxu0 }
 0x5e2   :  { %v5914_v61 = vpop.f32.mrb[17].mxu0 }
 0x5e3   :  { %v5915_v62 = vadd.f32 %v5914_v61, %v5913_v21  ;;  %2840 = vmatpush1.bf16.msra.mxu0 %v5348_v58  ;;  %v5319_v58 = vcombine.high %v1138_v52, %v1146_v53  ;;  %v5318_v21 = vcombine.low %v1138_v52, %v1146_v53  ;;  %v1170_v61 = vld [vmem:[%s8826_s20 + $0x2a0] sm:$0xff]  ;;  %v6215_v52 = vld [vmem:[%s8829_s22 + $0x130] ss:$8 sps:$4 sm:$0xff]   ;;  %v5430_v53 = vcombine.low %v1250_v41, %v1258_v42  ;;  %v1139_v42 = vld [vmem:[%s8826_s20 + $0x1a8] sm:$0xff] }
 0x5e4   :  { %2841 = vmatprep.subr.bf16.mxu0 %v5365_v26  ;;  %v1162_v26 = vld [vmem:[%s8826_s20 + $0x260] sm:$0xff] }
 0x5e5   :  { %v1081_v2 = vadd.f32 %v5915_v62, %v5261_v25  ;;  %v1154_v25 = vld [vmem:[%s8826_s20 + $0x220] sm:$0xff] }
 0x5e6   :  { %v5335_v60 = vcombine.high %v1154_v25, %v1162_v26  ;;  %v1178_v62 = vld [vmem:[%s8826_s20 + $0x2e0] sm:$0xff] }
 0x5e7   :  { %2842 = vmatpush1.bf16.msra.mxu0 %v5364_v63  ;;  %5178 = vrot.lane.b32.xlu1 %v1081_v2, %s6603_s8  ;;  %v7698_v63 = vsub.s32 0, %v7689_v59  ;;  %v7706_v2 = vsub.s32 1, %v7689_v59  ;;  %v5351_v3 = vcombine.high %v1170_v61, %v1178_v62 }
 0x5e8   :  { %2843 = vmatprep.subr.bf16.mxu0 %v5381_v0  ;;  %v5334_v0 = vcombine.low %v1154_v25, %v1162_v26  ;;  %v1290_v25 = vld [vmem:[%s8826_s20 + $0x660] sm:$0xff] }
 0x5e9   :  { %v1349_v7 = vrot.slane %v7703_v1, %v7698_v63  ;;  %v1353_v8 = vrot.slane %v7703_v1, %v7706_v2  ;;  %v6218_v26 = vld [vmem:[%s8829_s22 + $0x140] ss:$8 sps:$4 sm:$0xff]  }
 0x5eb   :  { %2844 = vmatpush1.bf16.msra.mxu0 %v5380_v5  ;;  %v1186_v5 = vld [vmem:[%s8826_s20 + $0x320] sm:$0xff] }
 0x5ec   :  { %2845 = vmatprep.subr.bf16.mxu0 %v5397_v6  ;;  %v1194_v6 = vld [vmem:[%s8826_s20 + $0x360] sm:$0xff] }
 0x5ed   :  { %v5878_v11 = vpop.f32.mrb[16].mxu1  ;;  %v5366_v18 = vcombine.low %v1186_v5, %v1194_v6 }
 0x5ee   :  { %v5879_v14 = vpop.f32.mrb[17].mxu1 }
 0x5ef   :  { %v7625_v15 = vadd.f32 %v5879_v14, %v5878_v11  ;;  %2846 = vmatpush1.bf16.msra.mxu0 %v5396_v9  ;;  %v5350_v9 = vcombine.low %v1170_v61, %v1178_v62  ;;  %v1298_v62 = vld [vmem:[%s8826_s20 + $0x6a0] sm:$0xff] }
 0x5f0   :  { %2847 = vmatprep.subr.bf16.mxu0 %v5413_v10  ;;  %v5367_v10 = vcombine.high %v1186_v5, %v1194_v6  ;;  %v6226_v6 = vld [vmem:[%s8829_s22 + $0x164] ss:$8 sps:$4 sm:$0xff]  }
 0x5f3   :  { %2848 = vmatpush1.bf16.msra.mxu0 %v5412_v16 }
 0x5f4   :  { %2849 = vmatprep.subr.bf16.mxu0 %v5429_v22 }
 0x5f7   :  { %2850 = vmatpush1.bf16.msra.mxu0 %v5428_v19 }
 0x5f8   :  { %2851 = vmatprep.subr.bf16.mxu0 %v5445_v20 }
 0x5fb   :  { %2852 = vmatpush1.bf16.msra.mxu0 %v5444_v27  ;;  %v1218_v27 = vld [vmem:[%s8826_s20 + $0x420] sm:$0xff] }
 0x5fc   :  { %2853 = vmatprep.subr.bf16.mxu0 %v5461_v28  ;;  %v1226_v28 = vld [vmem:[%s8826_s20 + $0x460] sm:$0xff] }
 0x5fd   :  { %v5399_v34 = vcombine.high %v1218_v27, %v1226_v28  ;;  %v5398_v38 = vcombine.low %v1218_v27, %v1226_v28  ;;  %v6235_v28 = vld [vmem:[%s8829_s22 + $0x194] ss:$8 sps:$4 sm:$0xff]  }
 0x5ff   :  { %2854 = vmatpush1.bf16.msra.mxu0 %v5460_v31  ;;  %v5382_v31 = vcombine.low %v1202_v12, %v1210_v13  ;;  %v6229_v12 = vld [vmem:[%s8829_s22 + $0x174] ss:$8 sps:$4 sm:$0xff]  }
 0x600   :  { %2855 = vmatprep.subr.bf16.mxu0 %v5477_v32 }
 0x603   :  { %2856 = vmatpush1.bf16.msra.mxu0 %v5476_v35  ;;  %v1234_v35 = vld [vmem:[%s8826_s20 + $0x4a0] sm:$0xff] }
 0x604   :  { %2857 = vmatprep.subr.bf16.mxu0 %v5493_v36  ;;  %v1242_v36 = vld [vmem:[%s8826_s20 + $0x4e0] sm:$0xff] }
 0x605   :  { %v5414_v46 = vcombine.low %v1234_v35, %v1242_v36 }
 0x607   :  { %2858 = vmatpush1.bf16.msra.mxu0 %v5492_v39  ;;  %v6214_v39 = vld [vmem:[%s8829_s22 + $0x124] ss:$8 sps:$4 sm:$0xff]  }
 0x608   :  { %2859 = vmatprep.subr.bf16.mxu0 %v5509_v40  ;;  %v5415_v40 = vcombine.high %v1234_v35, %v1242_v36  ;;  %v1123_v36 = vld [vmem:[%s8826_s20 + $0x128] sm:$0xff] }
 0x60b   :  { %2860 = vmatpush1.bf16.msra.mxu0 %v5508_v43 }
 0x60c   :  { %2870 = vmatprep.subr.bf16.mxu0 %v5271_v44 }
 0x60e   :  { %2862 = vmatmul.mubr.bf16.vlgmr.msra.gmra.mrb[32].mxu0 %v7262_v56 }
 0x60f   :  { %2871 = vmatpush1.bf16.msra.mxu0 %v5270_v47  ;;  %2902 = vmatprep.mubr.bf16.mxu0 %v7071_v55 }
 0x610   :  { %2872 = vmatprep.subr.bf16.mxu0 %v5287_v48  ;;  %v6217_v48 = vld [vmem:[%s8829_s22 + $0x134] ss:$8 sps:$4 sm:$0xff]  }
 0x613   :  { %2873 = vmatpush1.bf16.msra.mxu0 %v5286_v29  ;;  %v1266_v29 = vld [vmem:[%s8826_s20 + $0x5a0] sm:$0xff] }
 0x614   :  { %2874 = vmatprep.subr.bf16.mxu0 %v5303_v51  ;;  %v1274_v51 = vld [vmem:[%s8826_s20 + $0x5e0] sm:$0xff] }
 0x617   :  { %2875 = vmatpush1.bf16.msra.mxu0 %v5302_v57  ;;  %v5447_v57 = vcombine.high %v1266_v29, %v1274_v51 }
 0x618   :  { %2876 = vmatprep.subr.bf16.mxu0 %v5319_v58  ;;  %v1282_v58 = vld [vmem:[%s8826_s20 + $0x620] sm:$0xff] }
 0x619   :  { %v5463_v61 = vcombine.high %v1282_v58, %v1290_v25  ;;  %v5462_v5 = vcombine.low %v1282_v58, %v1290_v25  ;;  %v1179_v58 = vld [vmem:[%s8826_s20 + $0x2e8] sm:$0xff]  ;;  %v1356_v25 = vsub.s32 2, %v7689_v59 }
 0x61b   :  { %2877 = vmatpush1.bf16.msra.mxu0 %v5318_v21  ;;  %v5446_v21 = vcombine.low %v1266_v29, %v1274_v51  ;;  %v1163_v29 = vld [vmem:[%s8826_s20 + $0x268] sm:$0xff] }
 0x61c   :  { %2878 = vmatprep.subr.bf16.mxu0 %v5335_v60  ;;  %v6223_v60 = vld [vmem:[%s8829_s22 + $0x154] ss:$8 sps:$4 sm:$0xff]   ;;  %v6242_v51 = vld [vmem:[%s8829_s22 + $0x1c0] ss:$8 sps:$4 sm:$0xff]  }
 0x61f   :  { %2879 = vmatpush1.bf16.msra.mxu0 %v5334_v0  ;;  %v1306_v0 = vld [vmem:[%s8826_s20 + $0x6e0] sm:$0xff] }
 0x620   :  { %2880 = vmatprep.subr.bf16.mxu0 %v5351_v3  ;;  %v6221_v3 = vld [vmem:[%s8829_s22 + $0x150] ss:$8 sps:$4 sm:$0xff]  }
 0x621   :  { %v2740_v11 = vpop.f32.mrb[20].mxu0 }
 0x622   :  { %v2741_v14 = vadd.f32 %v2740_v11, %v1349_v7  ;;  %v2742_v16 = vpop.f32.mrb[21].mxu0  ;;  %v5479_v7 = vcombine.high %v1298_v62, %v1306_v0  ;;  %v5478_v11 = vcombine.low %v1298_v62, %v1306_v0  ;;  %v1187_v0 = vld [vmem:[%s8826_s20 + $0x328] sm:$0xff] }
 0x623   :  { %v2743_v22 = vadd.f32 %v2742_v16, %v1353_v8  ;;  %v2744_v17 = vpop.f32.mrb[22].mxu0  ;;  %2881 = vmatpush1.bf16.msra.mxu0 %v5350_v9  ;;  %v1314_v8 = vld [vmem:[%s8826_s20 + $0x720] sm:$0xff] }
 0x624   :  { %v3034_v19 = vmax.f32 %v2741_v14, 0.0  ;;  %v2745_v20 = vpop.f32.mrb[23].mxu0  ;;  %2882 = vmatprep.subr.bf16.mxu0 %v5367_v10  ;;  %v1322_v9 = vld [vmem:[%s8826_s20 + $0x760] sm:$0xff] }
 0x625   :  { %v3035_v24 = vmax.f32 %v2743_v22, 0.0  ;;  %v6224_v10 = vld [vmem:[%s8829_s22 + $0x160] ss:$8 sps:$4 sm:$0xff]   ;;  %v5495_v13 = vcombine.high %v1314_v8, %v1322_v9  ;;  %v6227_v22 = vld [vmem:[%s8829_s22 + $0x170] ss:$8 sps:$4 sm:$0xff]   ;;  %v5494_v17 = vcombine.low %v1314_v8, %v1322_v9 }
 0x626   :  { %v3050_v32 = vpack.c.bf16 %v3034_v19, %v3034_v19  ;;  %v1330_v14 = vld [vmem:[%s8826_s20 + $0x7a0] sm:$0xff]  ;;  %v1091_v20 = vld [vmem:[%s8826_s20 + $0x28] sm:$0xff]  ;;  %v6253_v9 = vld [vmem:[%s8829_s22 + $0x1f4] ss:$8 sps:$4 sm:$0xff]  }
 0x627   :  { %v3051_v4 = vpack.c.bf16 %v3035_v24, %v3035_v24  ;;  %2883 = vmatpush1.bf16.msra.mxu0 %v5366_v18  ;;  %v1338_v16 = vld [vmem:[%s8826_s20 + $0x7e0] sm:$0xff] }
 0x628   :  { %2884 = vmatprep.subr.bf16.mxu0 %v5383_v23  ;;  %v6232_v18 = vld [vmem:[%s8829_s22 + $0x184] ss:$8 sps:$4 sm:$0xff]   ;;  %v5511_v19 = vcombine.high %v1330_v14, %v1338_v16  ;;  %v6230_v24 = vld [vmem:[%s8829_s22 + $0x180] ss:$8 sps:$4 sm:$0xff]   ;;  %v5510_v27 = vcombine.low %v1330_v14, %v1338_v16 }
 0x629   :  { %4646 = vmatprep.mubr.bf16.mxu1 %v3051_v4  ;;  %v1099_v23 = vld [vmem:[%s8826_s20 + $0x68] sm:$0xff] }
 0x62a   :  { %4647 = vmatmul.mubr.bf16.vlgmr.msra.gmra.mrb[24].mxu1 %v3050_v32  ;;  %v5273_v4 = vcombine.high %v1091_v20, %v1099_v23  ;;  %v6233_v32 = vld [vmem:[%s8829_s22 + $0x190] ss:$8 sps:$4 sm:$0xff]  }
 0x62b   :  { %4656 = vmatpush1.bf16.msra.mxu1 %v6206_v30  ;;  %2885 = vmatpush1.bf16.msra.mxu0 %v5382_v31  ;;  %v1107_v30 = vld [vmem:[%s8826_s20 + $0xa8] sm:$0xff] }
 0x62c   :  { %4657 = vmatprep.subr.bf16.mxu1 %v6211_v33  ;;  %2886 = vmatprep.subr.bf16.mxu0 %v5399_v34  ;;  %v1115_v31 = vld [vmem:[%s8826_s20 + $0xe8] sm:$0xff]  ;;  %v5272_v33 = vcombine.low %v1091_v20, %v1099_v23 }
 0x62d   :  { %v6238_v34 = vld [vmem:[%s8829_s22 + $0x1a4] ss:$8 sps:$4 sm:$0xff]   ;;  %v5289_v35 = vcombine.high %v1107_v30, %v1115_v31 }
 0x62e   :  { %v7754_v43 = vpop.f32.mrb[20].mxu1 }
 0x62f   :  { %v7756_v44 = vpop.f32.mrb[21].mxu1  ;;  %4658 = vmatpush1.bf16.msra.mxu1 %v6209_v37  ;;  %2887 = vmatpush1.bf16.msra.mxu0 %v5398_v38  ;;  %v1131_v37 = vld [vmem:[%s8826_s20 + $0x168] sm:$0xff] }
 0x630   :  { %v2990_v47 = vpop.f32.mrb[22].mxu1  ;;  %4659 = vmatprep.subr.bf16.mxu1 %v6214_v39  ;;  %2888 = vmatprep.subr.bf16.mxu0 %v5415_v40  ;;  %v6236_v38 = vld [vmem:[%s8829_s22 + $0x1a0] ss:$8 sps:$4 sm:$0xff]   ;;  %v5288_v39 = vcombine.low %v1107_v30, %v1115_v31  ;;  %v6241_v40 = vld [vmem:[%s8829_s22 + $0x1b4] ss:$8 sps:$4 sm:$0xff]   ;;  %v5305_v41 = vcombine.high %v1123_v36, %v1131_v37 }
 0x631   :  { %v2991_v50 = vpop.f32.mrb[23].mxu1  ;;  %v5304_v47 = vcombine.low %v1123_v36, %v1131_v37  ;;  %v1227_v30 = vld [vmem:[%s8826_s20 + $0x468] sm:$0xff] }
 0x632   :  { %v1155_v50 = vld [vmem:[%s8826_s20 + $0x228] sm:$0xff] }
 0x633   :  { %4660 = vmatpush1.bf16.msra.mxu1 %v6212_v45  ;;  %2889 = vmatpush1.bf16.msra.mxu0 %v5414_v46  ;;  %v1147_v45 = vld [vmem:[%s8826_s20 + $0x1e8] sm:$0xff]  ;;  %v6239_v46 = vld [vmem:[%s8829_s22 + $0x1b0] ss:$8 sps:$4 sm:$0xff]  }
 0x634   :  { %4661 = vmatprep.subr.bf16.mxu1 %v6217_v48  ;;  %2890 = vmatprep.subr.bf16.mxu0 %v5431_v49  ;;  %v6244_v48 = vld [vmem:[%s8829_s22 + $0x1c4] ss:$8 sps:$4 sm:$0xff]   ;;  %v5321_v49 = vcombine.high %v1139_v42, %v1147_v45 }
 0x635   :  { %v1235_v37 = vld [vmem:[%s8826_s20 + $0x4a8] sm:$0xff] }
 0x637   :  { %4662 = vmatpush1.bf16.msra.mxu1 %v6215_v52  ;;  %2891 = vmatpush1.bf16.msra.mxu0 %v5430_v53  ;;  %v5320_v52 = vcombine.low %v1139_v42, %v1147_v45  ;;  %v6247_v53 = vld [vmem:[%s8829_s22 + $0x1d4] ss:$8 sps:$4 sm:$0xff]   ;;  %v1251_v45 = vld [vmem:[%s8826_s20 + $0x528] sm:$0xff] }
 0x638   :  { %4663 = vmatprep.subr.bf16.mxu1 %v6220_v54  ;;  %2892 = vmatprep.subr.bf16.mxu0 %v5447_v57  ;;  %v5337_v54 = vcombine.high %v1155_v50, %v1163_v29  ;;  %v1171_v57 = vld [vmem:[%s8826_s20 + $0x2a8] sm:$0xff] }
 0x639   :  { %v5353_v62 = vcombine.high %v1171_v57, %v1179_v58  ;;  %v5352_v8 = vcombine.low %v1171_v57, %v1179_v58  ;;  %v1283_v58 = vld [vmem:[%s8826_s20 + $0x628] sm:$0xff] }
 0x63b   :  { %4664 = vmatpush1.bf16.msra.mxu1 %v6218_v26  ;;  %2893 = vmatpush1.bf16.msra.mxu0 %v5446_v21  ;;  %v6245_v26 = vld [vmem:[%s8829_s22 + $0x1d0] ss:$8 sps:$4 sm:$0xff]   ;;  %v5336_v21 = vcombine.low %v1155_v50, %v1163_v29  ;;  %v1267_v29 = vld [vmem:[%s8826_s20 + $0x5a8] sm:$0xff] }
 0x63c   :  { %4665 = vmatprep.subr.bf16.mxu1 %v6223_v60  ;;  %2894 = vmatprep.subr.bf16.mxu0 %v5463_v61  ;;  %v1360_v60 = vsub.s32 3, %v7689_v59  ;;  %v6250_v61 = vld [vmem:[%s8829_s22 + $0x1e4] ss:$8 sps:$4 sm:$0xff]  }
 0x63f   :  { %4666 = vmatpush1.bf16.msra.mxu1 %v6221_v3  ;;  %2895 = vmatpush1.bf16.msra.mxu0 %v5462_v5  ;;  %v1195_v3 = vld [vmem:[%s8826_s20 + $0x368] sm:$0xff]  ;;  %v1357_v5 = vrot.slane %v7703_v1, %v1356_v25 }
 0x640   :  { %4667 = vmatprep.subr.bf16.mxu1 %v6226_v6  ;;  %2896 = vmatprep.subr.bf16.mxu0 %v5479_v7  ;;  %v6248_v6 = vld [vmem:[%s8829_s22 + $0x1e0] ss:$8 sps:$4 sm:$0xff]   ;;  %v1361_v7 = vrot.slane %v7703_v1, %v1360_v60 }
 0x643   :  { %4668 = vmatpush1.bf16.msra.mxu1 %v6224_v10  ;;  %2897 = vmatpush1.bf16.msra.mxu0 %v5478_v11  ;;  %v5369_v10 = vcombine.high %v1187_v0, %v1195_v3 }
 0x644   :  { %4669 = vmatprep.subr.bf16.mxu1 %v6229_v12  ;;  %2898 = vmatprep.subr.bf16.mxu0 %v5495_v13  ;;  %v1203_v12 = vld [vmem:[%s8826_s20 + $0x3a8] sm:$0xff] }
 0x645   :  { %v1211_v13 = vld [vmem:[%s8826_s20 + $0x3e8] sm:$0xff] }
 0x647   :  { %4670 = vmatpush1.bf16.msra.mxu1 %v6227_v22  ;;  %2899 = vmatpush1.bf16.msra.mxu0 %v5494_v17 }
 0x648   :  { %4671 = vmatprep.subr.bf16.mxu1 %v6232_v18  ;;  %2900 = vmatprep.subr.bf16.mxu0 %v5511_v19  ;;  %v6251_v18 = vld [vmem:[%s8829_s22 + $0x1f0] ss:$8 sps:$4 sm:$0xff]   ;;  %v5368_v19 = vcombine.low %v1187_v0, %v1195_v3  ;;  %v1299_v3 = vld [vmem:[%s8826_s20 + $0x6a8] sm:$0xff] }
 0x64b   :  { %4672 = vmatpush1.bf16.msra.mxu1 %v6230_v24  ;;  %2901 = vmatpush1.bf16.msra.mxu0 %v5510_v27  ;;  %v6256_v24 = vld [vmem:[%s8829_s22 + $0x204] ss:$8 sps:$4 sm:$0xff]   ;;  %v5385_v27 = vcombine.high %v1203_v12, %v1211_v13 }
 0x64c   :  { %4673 = vmatprep.subr.bf16.mxu1 %v6235_v28  ;;  %2911 = vmatprep.subr.bf16.mxu0 %v5273_v4  ;;  %v1219_v4 = vld [vmem:[%s8826_s20 + $0x428] sm:$0xff] }
 0x64d   :  { %v5401_v36 = vcombine.high %v1219_v4, %v1227_v30 }
 0x64e   :  { %2903 = vmatmul.mubr.bf16.vlgmr.msra.gmra.mrb[36].mxu0 %v7262_v56 }
 0x64f   :  { %4674 = vmatpush1.bf16.msra.mxu1 %v6233_v32  ;;  %2912 = vmatpush1.bf16.msra.mxu0 %v5272_v33  ;;  %v6254_v32 = vld [vmem:[%s8829_s22 + $0x200] ss:$8 sps:$4 sm:$0xff]   ;;  %v5384_v33 = vcombine.low %v1203_v12, %v1211_v13 }
 0x650   :  { %2943 = vmatprep.mubr.bf16.mxu0 %v7071_v55  ;;  %4675 = vmatprep.subr.bf16.mxu1 %v6238_v34  ;;  %v6272_v12 = vld [vmem:[%s8829_s22 + $0x260] ss:$8 sps:$4 sm:$0xff]  }
 0x651   :  { %2913 = vmatprep.subr.bf16.mxu0 %v5289_v35  ;;  %v6259_v35 = vld [vmem:[%s8829_s22 + $0x214] ss:$8 sps:$4 sm:$0xff]  }
 0x653   :  { %4676 = vmatpush1.bf16.msra.mxu1 %v6236_v38  ;;  %2914 = vmatpush1.bf16.msra.mxu0 %v5288_v39  ;;  %v1243_v38 = vld [vmem:[%s8826_s20 + $0x4e8] sm:$0xff]  ;;  %v6257_v39 = vld [vmem:[%s8829_s22 + $0x210] ss:$8 sps:$4 sm:$0xff]  }
 0x654   :  { %4677 = vmatprep.subr.bf16.mxu1 %v6241_v40  ;;  %2915 = vmatprep.subr.bf16.mxu0 %v5305_v41  ;;  %v5400_v40 = vcombine.low %v1219_v4, %v1227_v30  ;;  %v6262_v41 = vld [vmem:[%s8829_s22 + $0x224] ss:$8 sps:$4 sm:$0xff]   ;;  %v5417_v42 = vcombine.high %v1235_v37, %v1243_v38  ;;  %v6283_v30 = vld [vmem:[%s8829_s22 + $0x294] ss:$8 sps:$4 sm:$0xff]  }
 0x657   :  { %4678 = vmatpush1.bf16.msra.mxu1 %v6239_v46  ;;  %2916 = vmatpush1.bf16.msra.mxu0 %v5304_v47  ;;  %v1259_v46 = vld [vmem:[%s8826_s20 + $0x568] sm:$0xff] }
 0x658   :  { %4679 = vmatprep.subr.bf16.mxu1 %v6244_v48  ;;  %2917 = vmatprep.subr.bf16.mxu0 %v5321_v49  ;;  %v6260_v47 = vld [vmem:[%s8829_s22 + $0x220] ss:$8 sps:$4 sm:$0xff]   ;;  %v5416_v48 = vcombine.low %v1235_v37, %v1243_v38  ;;  %v6265_v49 = vld [vmem:[%s8829_s22 + $0x234] ss:$8 sps:$4 sm:$0xff]   ;;  %v5433_v50 = vcombine.high %v1251_v45, %v1259_v46 }
 0x659   :  { %v1125_v38 = vld [vmem:[%s8826_s20 + $0x138] sm:$0xff] }
 0x65b   :  { %4680 = vmatpush1.bf16.msra.mxu1 %v6242_v51  ;;  %2918 = vmatpush1.bf16.msra.mxu0 %v5320_v52  ;;  %v1275_v51 = vld [vmem:[%s8826_s20 + $0x5e8] sm:$0xff]  ;;  %v6263_v52 = vld [vmem:[%s8829_s22 + $0x230] ss:$8 sps:$4 sm:$0xff]  }
 0x65c   :  { %4681 = vmatprep.subr.bf16.mxu1 %v6247_v53  ;;  %2919 = vmatprep.subr.bf16.mxu0 %v5337_v54  ;;  %v5432_v53 = vcombine.low %v1251_v45, %v1259_v46  ;;  %v6268_v54 = vld [vmem:[%s8829_s22 + $0x244] ss:$8 sps:$4 sm:$0xff]   ;;  %v5449_v57 = vcombine.high %v1267_v29, %v1275_v51  ;;  %v1141_v46 = vld [vmem:[%s8826_s20 + $0x1b8] sm:$0xff] }
 0x65f   :  { %4682 = vmatpush1.bf16.msra.mxu1 %v6245_v26  ;;  %2920 = vmatpush1.bf16.msra.mxu0 %v5336_v21  ;;  %v1291_v26 = vld [vmem:[%s8826_s20 + $0x668] sm:$0xff] }
 0x660   :  { %4683 = vmatprep.subr.bf16.mxu1 %v6250_v61  ;;  %2921 = vmatprep.subr.bf16.mxu0 %v5353_v62  ;;  %v6266_v21 = vld [vmem:[%s8829_s22 + $0x240] ss:$8 sps:$4 sm:$0xff]   ;;  %v5448_v61 = vcombine.low %v1267_v29, %v1275_v51  ;;  %v6271_v62 = vld [vmem:[%s8829_s22 + $0x254] ss:$8 sps:$4 sm:$0xff]   ;;  %v5465_v0 = vcombine.high %v1283_v58, %v1291_v26 }
 0x661   :  { %v2781_v11 = vpop.f32.mrb[24].mxu0  ;;  %v1157_v29 = vld [vmem:[%s8826_s20 + $0x238] sm:$0xff] }
 0x662   :  { %v2782_v14 = vadd.f32 %v2781_v11, %v1357_v5  ;;  %v2783_v16 = vpop.f32.mrb[25].mxu0  ;;  %v1307_v5 = vld [vmem:[%s8826_s20 + $0x6e8] sm:$0xff]  ;;  %v1165_v51 = vld [vmem:[%s8826_s20 + $0x278] sm:$0xff] }
 0x663   :  { %v2784_v22 = vadd.f32 %v2783_v16, %v1361_v7  ;;  %4684 = vmatpush1.bf16.msra.mxu1 %v6248_v6  ;;  %v2785_v17 = vpop.f32.mrb[26].mxu0  ;;  %2922 = vmatpush1.bf16.msra.mxu0 %v5352_v8  ;;  %v6269_v6 = vld [vmem:[%s8829_s22 + $0x250] ss:$8 sps:$4 sm:$0xff]   ;;  %v5464_v7 = vcombine.low %v1283_v58, %v1291_v26  ;;  %v6274_v8 = vld [vmem:[%s8829_s22 + $0x264] ss:$8 sps:$4 sm:$0xff]   ;;  %v5480_v13 = vcombine.low %v1299_v3, %v1307_v5 }
 0x664   :  { %v3036_v20 = vmax.f32 %v2782_v14, 0.0  ;;  %v2786_v23 = vpop.f32.mrb[27].mxu0  ;;  %4685 = vmatprep.subr.bf16.mxu1 %v6253_v9  ;;  %2923 = vmatprep.subr.bf16.mxu0 %v5369_v10  ;;  %v5481_v9 = vcombine.high %v1299_v3, %v1307_v5  ;;  %v1315_v10 = vld [vmem:[%s8826_s20 + $0x728] sm:$0xff]  ;;  %v6277_v14 = vld [vmem:[%s8829_s22 + $0x274] ss:$8 sps:$4 sm:$0xff]   ;;  %v1368_v5 = vsub.s32 5, %v7689_v59 }
 0x665   :  { %v3037_v28 = vmax.f32 %v2784_v22, 0.0  ;;  %v1323_v11 = vld [vmem:[%s8826_s20 + $0x768] sm:$0xff]  ;;  %v1173_v58 = vld [vmem:[%s8826_s20 + $0x2b8] sm:$0xff] }
 0x666   :  { %v3052_v34 = vpack.c.bf16 %v3036_v20, %v3036_v20  ;;  %v5497_v16 = vcombine.high %v1315_v10, %v1323_v11  ;;  %v1331_v22 = vld [vmem:[%s8826_s20 + $0x7a8] sm:$0xff]  ;;  %v1181_v26 = vld [vmem:[%s8826_s20 + $0x2f8] sm:$0xff] }
 0x667   :  { %v3053_v31 = vpack.c.bf16 %v3037_v28, %v3037_v28  ;;  %4686 = vmatpush1.bf16.msra.mxu1 %v6251_v18  ;;  %2924 = vmatpush1.bf16.msra.mxu0 %v5368_v19  ;;  %v1339_v17 = vld [vmem:[%s8826_s20 + $0x7e8] sm:$0xff]  ;;  %v6275_v18 = vld [vmem:[%s8829_s22 + $0x270] ss:$8 sps:$4 sm:$0xff]   ;;  %v5496_v19 = vcombine.low %v1315_v10, %v1323_v11  ;;  %v5357_v3 = vcombine.high %v1173_v58, %v1181_v26 }
 0x668   :  { %4696 = vmatprep.subr.bf16.mxu1 %v6256_v24  ;;  %2925 = vmatprep.subr.bf16.mxu0 %v5385_v27  ;;  %v6280_v20 = vld [vmem:[%s8829_s22 + $0x284] ss:$8 sps:$4 sm:$0xff]   ;;  %v5513_v23 = vcombine.high %v1331_v22, %v1339_v17  ;;  %v1093_v24 = vld [vmem:[%s8826_s20 + $0x38] sm:$0xff]  ;;  %v6278_v28 = vld [vmem:[%s8829_s22 + $0x280] ss:$8 sps:$4 sm:$0xff]   ;;  %v5512_v4 = vcombine.low %v1331_v22, %v1339_v17  ;;  %v1369_v10 = vrot.slane %v7703_v1, %v1368_v5 }
 0x669   :  { %4687 = vmatprep.mubr.bf16.mxu1 %v3053_v31  ;;  %v1101_v27 = vld [vmem:[%s8826_s20 + $0x78] sm:$0xff]  ;;  %v5356_v11 = vcombine.low %v1173_v58, %v1181_v26  ;;  %v6316_v58 = vld [vmem:[%s8829_s22 + $0x344] ss:$8 sps:$4 sm:$0xff]  }
 0x66a   :  { %4688 = vmatmul.mubr.bf16.vlgmr.msra.gmra.mrb[24].mxu1 %v3052_v34  ;;  %v5277_v31 = vcombine.high %v1093_v24, %v1101_v27  ;;  %v6281_v34 = vld [vmem:[%s8829_s22 + $0x290] ss:$8 sps:$4 sm:$0xff]  }
 0x66b   :  { %4697 = vmatpush1.bf16.msra.mxu1 %v6254_v32  ;;  %2926 = vmatpush1.bf16.msra.mxu0 %v5384_v33  ;;  %v1109_v32 = vld [vmem:[%s8826_s20 + $0xb8] sm:$0xff] }
 0x66c   :  { %4698 = vmatprep.subr.bf16.mxu1 %v6259_v35  ;;  %2927 = vmatprep.subr.bf16.mxu0 %v5401_v36  ;;  %v1117_v33 = vld [vmem:[%s8826_s20 + $0xf8] sm:$0xff]  ;;  %v5276_v35 = vcombine.low %v1093_v24, %v1101_v27  ;;  %v6286_v36 = vld [vmem:[%s8829_s22 + $0x2a4] ss:$8 sps:$4 sm:$0xff]  }
 0x66d   :  { %v5293_v37 = vcombine.high %v1109_v32, %v1117_v33  ;;  %v1213_v22 = vld [vmem:[%s8826_s20 + $0x3f8] sm:$0xff] }
 0x66f   :  { %4699 = vmatpush1.bf16.msra.mxu1 %v6257_v39  ;;  %2928 = vmatpush1.bf16.msra.mxu0 %v5400_v40  ;;  %v1133_v39 = vld [vmem:[%s8826_s20 + $0x178] sm:$0xff]  ;;  %v6284_v40 = vld [vmem:[%s8829_s22 + $0x2a0] ss:$8 sps:$4 sm:$0xff]  }
 0x670   :  { %4700 = vmatprep.subr.bf16.mxu1 %v6262_v41  ;;  %2929 = vmatprep.subr.bf16.mxu0 %v5417_v42  ;;  %v5292_v41 = vcombine.low %v1109_v32, %v1117_v33  ;;  %v6289_v42 = vld [vmem:[%s8829_s22 + $0x2b4] ss:$8 sps:$4 sm:$0xff]   ;;  %v5309_v45 = vcombine.high %v1125_v38, %v1133_v39 }
 0x671   :  { %v1221_v32 = vld [vmem:[%s8826_s20 + $0x438] sm:$0xff] }
 0x672   :  { %v1229_v33 = vld [vmem:[%s8826_s20 + $0x478] sm:$0xff] }
 0x673   :  { %4701 = vmatpush1.bf16.msra.mxu1 %v6260_v47  ;;  %2930 = vmatpush1.bf16.msra.mxu0 %v5416_v48  ;;  %v1149_v47 = vld [vmem:[%s8826_s20 + $0x1f8] sm:$0xff]  ;;  %v5308_v48 = vcombine.low %v1125_v38, %v1133_v39  ;;  %v5405_v39 = vcombine.high %v1221_v32, %v1229_v33 }
 0x674   :  { %4702 = vmatprep.subr.bf16.mxu1 %v6265_v49  ;;  %2931 = vmatprep.subr.bf16.mxu0 %v5433_v50  ;;  %v6292_v49 = vld [vmem:[%s8829_s22 + $0x2c4] ss:$8 sps:$4 sm:$0xff]   ;;  %v5325_v50 = vcombine.high %v1141_v46, %v1149_v47  ;;  %v6307_v38 = vld [vmem:[%s8829_s22 + $0x314] ss:$8 sps:$4 sm:$0xff]  }
 0x677   :  { %4703 = vmatpush1.bf16.msra.mxu1 %v6263_v52  ;;  %2932 = vmatpush1.bf16.msra.mxu0 %v5432_v53  ;;  %v6290_v52 = vld [vmem:[%s8829_s22 + $0x2c0] ss:$8 sps:$4 sm:$0xff]   ;;  %v5324_v53 = vcombine.low %v1141_v46, %v1149_v47  ;;  %v6310_v46 = vld [vmem:[%s8829_s22 + $0x324] ss:$8 sps:$4 sm:$0xff]  }
 0x678   :  { %4704 = vmatprep.subr.bf16.mxu1 %v6268_v54  ;;  %2933 = vmatprep.subr.bf16.mxu0 %v5449_v57  ;;  %v6295_v54 = vld [vmem:[%s8829_s22 + $0x2d4] ss:$8 sps:$4 sm:$0xff]   ;;  %v5341_v57 = vcombine.high %v1157_v29, %v1165_v51 }
 0x67b   :  { %4705 = vmatpush1.bf16.msra.mxu1 %v6266_v21  ;;  %2934 = vmatpush1.bf16.msra.mxu0 %v5448_v61  ;;  %v6293_v21 = vld [vmem:[%s8829_s22 + $0x2d0] ss:$8 sps:$4 sm:$0xff]   ;;  %v5340_v61 = vcombine.low %v1157_v29, %v1165_v51  ;;  %v6313_v29 = vld [vmem:[%s8829_s22 + $0x334] ss:$8 sps:$4 sm:$0xff]  }
 0x67c   :  { %4706 = vmatprep.subr.bf16.mxu1 %v6271_v62  ;;  %2935 = vmatprep.subr.bf16.mxu0 %v5465_v0  ;;  %v1364_v62 = vsub.s32 4, %v7689_v59  ;;  %v6298_v0 = vld [vmem:[%s8829_s22 + $0x2e4] ss:$8 sps:$4 sm:$0xff]  }
 0x67f   :  { %4707 = vmatpush1.bf16.msra.mxu1 %v6269_v6  ;;  %2936 = vmatpush1.bf16.msra.mxu0 %v5464_v7  ;;  %v1189_v6 = vld [vmem:[%s8826_s20 + $0x338] sm:$0xff] }
 0x680   :  { %4708 = vmatprep.subr.bf16.mxu1 %v6274_v8  ;;  %2937 = vmatprep.subr.bf16.mxu0 %v5481_v9  ;;  %v1197_v7 = vld [vmem:[%s8826_s20 + $0x378] sm:$0xff]  ;;  %v1365_v8 = vrot.slane %v7703_v1, %v1364_v62  ;;  %v6296_v9 = vld [vmem:[%s8829_s22 + $0x2e0] ss:$8 sps:$4 sm:$0xff]  }
 0x681   :  { %v5372_v24 = vcombine.low %v1189_v6, %v1197_v7 }
 0x683   :  { %4709 = vmatpush1.bf16.msra.mxu1 %v6272_v12  ;;  %2938 = vmatpush1.bf16.msra.mxu0 %v5480_v13  ;;  %v6301_v12 = vld [vmem:[%s8829_s22 + $0x2f4] ss:$8 sps:$4 sm:$0xff]   ;;  %v5373_v13 = vcombine.high %v1189_v6, %v1197_v7 }
 0x684   :  { %4710 = vmatprep.subr.bf16.mxu1 %v6277_v14  ;;  %2939 = vmatprep.subr.bf16.mxu0 %v5497_v16  ;;  %v1205_v16 = vld [vmem:[%s8826_s20 + $0x3b8] sm:$0xff] }
 0x685   :  { %v6319_v6 = vld [vmem:[%s8829_s22 + $0x354] ss:$8 sps:$4 sm:$0xff]  }
 0x687   :  { %4711 = vmatpush1.bf16.msra.mxu1 %v6275_v18  ;;  %2940 = vmatpush1.bf16.msra.mxu0 %v5496_v19 }
 0x688   :  { %4712 = vmatprep.subr.bf16.mxu1 %v6280_v20  ;;  %2941 = vmatprep.subr.bf16.mxu0 %v5513_v23  ;;  %v6299_v23 = vld [vmem:[%s8829_s22 + $0x2f0] ss:$8 sps:$4 sm:$0xff]  }
 0x68b   :  { %4713 = vmatpush1.bf16.msra.mxu1 %v6278_v28  ;;  %2942 = vmatpush1.bf16.msra.mxu0 %v5512_v4  ;;  %v6304_v4 = vld [vmem:[%s8829_s22 + $0x304] ss:$8 sps:$4 sm:$0xff]  }
 0x68c   :  { %4714 = vmatprep.subr.bf16.mxu1 %v6283_v30  ;;  %2993 = vmatprep.subr.bf16.mxu0 %v5277_v31  ;;  %v5389_v30 = vcombine.high %v1205_v16, %v1213_v22 }
 0x68e   :  { %2944 = vmatmul.mubr.bf16.vlgmr.msra.gmra.mrb[40].mxu0 %v7262_v56 }
 0x68f   :  { %4715 = vmatpush1.bf16.msra.mxu1 %v6281_v34  ;;  %2994 = vmatpush1.bf16.msra.mxu0 %v5276_v35  ;;  %v6302_v35 = vld [vmem:[%s8829_s22 + $0x300] ss:$8 sps:$4 sm:$0xff]  }
 0x690   :  { %3025 = vmatprep.mubr.bf16.mxu0 %v7071_v55  ;;  %4716 = vmatprep.subr.bf16.mxu1 %v6286_v36  ;;  %v6287_v55 = vld [vmem:[%s8829_s22 + $0x2b0] ss:$8 sps:$4 sm:$0xff]   ;;  %v5388_v36 = vcombine.low %v1205_v16, %v1213_v22  ;;  %v6320_v22 = vld [vmem:[%s8829_s22 + $0x360] ss:$8 sps:$4 sm:$0xff]  }
 0x691   :  { %2995 = vmatprep.subr.bf16.mxu0 %v5293_v37  ;;  %v1325_v16 = vld [vmem:[%s8826_s20 + $0x778] sm:$0xff] }
 0x693   :  { %4717 = vmatpush1.bf16.msra.mxu1 %v6284_v40  ;;  %2996 = vmatpush1.bf16.msra.mxu0 %v5292_v41  ;;  %v1237_v40 = vld [vmem:[%s8826_s20 + $0x4b8] sm:$0xff] }
 0x694   :  { %4718 = vmatprep.subr.bf16.mxu1 %v6289_v42  ;;  %2997 = vmatprep.subr.bf16.mxu0 %v5309_v45  ;;  %v1245_v41 = vld [vmem:[%s8826_s20 + $0x4f8] sm:$0xff]  ;;  %v5404_v45 = vcombine.low %v1221_v32, %v1229_v33 }
 0x695   :  { %v6305_v42 = vld [vmem:[%s8829_s22 + $0x310] ss:$8 sps:$4 sm:$0xff]   ;;  %v5421_v47 = vcombine.high %v1237_v40, %v1245_v41  ;;  %v6331_v32 = vld [vmem:[%s8829_s22 + $0x394] ss:$8 sps:$4 sm:$0xff]  }
 0x696   :  { %v6329_v33 = vld [vmem:[%s8829_s22 + $0x390] ss:$8 sps:$4 sm:$0xff]  }
 0x697   :  { %4719 = vmatpush1.bf16.msra.mxu1 %v6287_v55  ;;  %2998 = vmatpush1.bf16.msra.mxu0 %v5308_v48  ;;  %v1253_v55 = vld [vmem:[%s8826_s20 + $0x538] sm:$0xff] }
 0x698   :  { %4720 = vmatprep.subr.bf16.mxu1 %v6292_v49  ;;  %2999 = vmatprep.subr.bf16.mxu0 %v5325_v50  ;;  %v1261_v48 = vld [vmem:[%s8826_s20 + $0x578] sm:$0xff]  ;;  %v6308_v49 = vld [vmem:[%s8829_s22 + $0x320] ss:$8 sps:$4 sm:$0xff]   ;;  %v5420_v50 = vcombine.low %v1237_v40, %v1245_v41  ;;  %v1372_v40 = vsub.s32 6, %v7689_v59 }
 0x699   :  { %v5437_v51 = vcombine.high %v1253_v55, %v1261_v48  ;;  %v6341_v41 = vld [vmem:[%s8829_s22 + $0x3d0] ss:$8 sps:$4 sm:$0xff]  }
 0x69b   :  { %4721 = vmatpush1.bf16.msra.mxu1 %v6290_v52  ;;  %3000 = vmatpush1.bf16.msra.mxu0 %v5324_v53  ;;  %v1269_v52 = vld [vmem:[%s8826_s20 + $0x5b8] sm:$0xff] }
 0x69c   :  { %4722 = vmatprep.subr.bf16.mxu1 %v6295_v54  ;;  %3001 = vmatprep.subr.bf16.mxu0 %v5341_v57  ;;  %v1277_v53 = vld [vmem:[%s8826_s20 + $0x5f8] sm:$0xff]  ;;  %v5436_v57 = vcombine.low %v1253_v55, %v1261_v48 }
 0x69d   :  { %v6311_v54 = vld [vmem:[%s8829_s22 + $0x330] ss:$8 sps:$4 sm:$0xff]   ;;  %v5453_v26 = vcombine.high %v1269_v52, %v1277_v53  ;;  %v6349_v48 = vld [vmem:[%s8829_s22 + $0x3f4] ss:$8 sps:$4 sm:$0xff]  }
 0x69f   :  { %4723 = vmatpush1.bf16.msra.mxu1 %v6293_v21  ;;  %3002 = vmatpush1.bf16.msra.mxu0 %v5340_v61  ;;  %v1285_v21 = vld [vmem:[%s8826_s20 + $0x638] sm:$0xff] }
 0x6a0   :  { %4724 = vmatprep.subr.bf16.mxu1 %v6298_v0  ;;  %3003 = vmatprep.subr.bf16.mxu0 %v5357_v3  ;;  %v1293_v61 = vld [vmem:[%s8826_s20 + $0x678] sm:$0xff]  ;;  %v6314_v0 = vld [vmem:[%s8829_s22 + $0x340] ss:$8 sps:$4 sm:$0xff]   ;;  %v5452_v3 = vcombine.low %v1269_v52, %v1277_v53 }
 0x6a1   :  { %v2822_v14 = vpop.f32.mrb[28].mxu0  ;;  %v5469_v7 = vcombine.high %v1285_v21, %v1293_v61  ;;  %v6347_v53 = vld [vmem:[%s8829_s22 + $0x3f0] ss:$8 sps:$4 sm:$0xff]  }
 0x6a2   :  { %v2823_v17 = vadd.f32 %v2822_v14, %v1365_v8  ;;  %v2824_v18 = vpop.f32.mrb[29].mxu0  ;;  %v1301_v8 = vld [vmem:[%s8826_s20 + $0x6b8] sm:$0xff] }
 0x6a3   :  { %v2825_v19 = vadd.f32 %v2824_v18, %v1369_v10  ;;  %4725 = vmatpush1.bf16.msra.mxu1 %v6296_v9  ;;  %v2826_v20 = vpop.f32.mrb[30].mxu0  ;;  %3004 = vmatpush1.bf16.msra.mxu0 %v5356_v11  ;;  %v1309_v9 = vld [vmem:[%s8826_s20 + $0x6f8] sm:$0xff]  ;;  %v5468_v11 = vcombine.low %v1285_v21, %v1293_v61  ;;  %v6350_v21 = vld [vmem:[%s8829_s22 + $0x400] ss:$8 sps:$4 sm:$0xff]  }
 0x6a4   :  { %v3038_v27 = vmax.f32 %v2823_v17, 0.0  ;;  %v2827_v28 = vpop.f32.mrb[31].mxu0  ;;  %4726 = vmatprep.subr.bf16.mxu1 %v6301_v12  ;;  %3005 = vmatprep.subr.bf16.mxu0 %v5373_v13  ;;  %v6317_v10 = vld [vmem:[%s8829_s22 + $0x350] ss:$8 sps:$4 sm:$0xff]   ;;  %v6322_v12 = vld [vmem:[%s8829_s22 + $0x364] ss:$8 sps:$4 sm:$0xff]   ;;  %v5485_v13 = vcombine.high %v1301_v8, %v1309_v9  ;;  %v5484_v17 = vcombine.low %v1301_v8, %v1309_v9 }
 0x6a5   :  { %v3039_v31 = vmax.f32 %v2825_v19, 0.0  ;;  %v1317_v14 = vld [vmem:[%s8826_s20 + $0x738] sm:$0xff]  ;;  %v6328_v28 = vld [vmem:[%s8829_s22 + $0x384] ss:$8 sps:$4 sm:$0xff]  }
 0x6a6   :  { %v3054_v37 = vpack.c.bf16 %v3038_v27, %v3038_v27  ;;  %v6325_v18 = vld [vmem:[%s8829_s22 + $0x374] ss:$8 sps:$4 sm:$0xff]   ;;  %v5501_v19 = vcombine.high %v1317_v14, %v1325_v16  ;;  %v5500_v27 = vcombine.low %v1317_v14, %v1325_v16  ;;  %v6359_v9 = vld [vmem:[%s8829_s22 + $0x430] ss:$8 sps:$4 sm:$0xff]   ;;  %v6370_v14 = vld [vmem:[%s8829_s22 + $0x464] ss:$8 sps:$4 sm:$0xff]  }
 0x6a7   :  { %v3055_v34 = vpack.c.bf16 %v3039_v31, %v3039_v31  ;;  %4727 = vmatpush1.bf16.msra.mxu1 %v6299_v23  ;;  %3006 = vmatpush1.bf16.msra.mxu0 %v5372_v24  ;;  %v1333_v20 = vld [vmem:[%s8826_s20 + $0x7b8] sm:$0xff]  ;;  %v6368_v16 = vld [vmem:[%s8829_s22 + $0x460] ss:$8 sps:$4 sm:$0xff]  }
 0x6a8   :  { %4737 = vmatprep.subr.bf16.mxu1 %v6304_v4  ;;  %3007 = vmatprep.subr.bf16.mxu0 %v5389_v30  ;;  %v1341_v23 = vld [vmem:[%s8826_s20 + $0x7f8] sm:$0xff]  ;;  %v6326_v30 = vld [vmem:[%s8829_s22 + $0x380] ss:$8 sps:$4 sm:$0xff]  }
 0x6a9   :  { %4728 = vmatprep.mubr.bf16.mxu1 %v3055_v34  ;;  %v6323_v24 = vld [vmem:[%s8829_s22 + $0x370] ss:$8 sps:$4 sm:$0xff]   ;;  %v5517_v4 = vcombine.high %v1333_v20, %v1341_v23  ;;  %v5516_v31 = vcombine.low %v1333_v20, %v1341_v23  ;;  %v6334_v34 = vld [vmem:[%s8829_s22 + $0x3a4] ss:$8 sps:$4 sm:$0xff]   ;;  %v6361_v8 = vld [vmem:[%s8829_s22 + $0x434] ss:$8 sps:$4 sm:$0xff]  }
 0x6aa   :  { %4729 = vmatmul.mubr.bf16.vlgmr.msra.gmra.mrb[24].mxu1 %v3054_v37  ;;  %v6335_v37 = vld [vmem:[%s8829_s22 + $0x3b0] ss:$8 sps:$4 sm:$0xff]   ;;  %v6379_v20 = vld [vmem:[%s8829_s22 + $0x494] ss:$8 sps:$4 sm:$0xff]  }
 0x6ab   :  { %4738 = vmatpush1.bf16.msra.mxu1 %v6302_v35  ;;  %3008 = vmatpush1.bf16.msra.mxu0 %v5388_v36  ;;  %v6332_v35 = vld [vmem:[%s8829_s22 + $0x3a0] ss:$8 sps:$4 sm:$0xff]   ;;  %v6337_v36 = vld [vmem:[%s8829_s22 + $0x3b4] ss:$8 sps:$4 sm:$0xff]   ;;  %v6377_v23 = vld [vmem:[%s8829_s22 + $0x490] ss:$8 sps:$4 sm:$0xff]  }
 0x6ac   :  { %4739 = vmatprep.subr.bf16.mxu1 %v6307_v38  ;;  %3009 = vmatprep.subr.bf16.mxu0 %v5405_v39  ;;  %v6338_v38 = vld [vmem:[%s8829_s22 + $0x3c0] ss:$8 sps:$4 sm:$0xff]   ;;  %v6343_v39 = vld [vmem:[%s8829_s22 + $0x3d4] ss:$8 sps:$4 sm:$0xff]  }
 0x6af   :  { %4740 = vmatpush1.bf16.msra.mxu1 %v6305_v42  ;;  %3010 = vmatpush1.bf16.msra.mxu0 %v5404_v45  ;;  %v1376_v42 = vsub.s32 7, %v7689_v59  ;;  %v6346_v45 = vld [vmem:[%s8829_s22 + $0x3e4] ss:$8 sps:$4 sm:$0xff]   ;;  %v6539_v59 = vld [vmem:[%s8829_s22 + $0x7f0] ss:$8 sps:$4 sm:$0xff]  }
 0x6b0   :  { %4741 = vmatprep.subr.bf16.mxu1 %v6310_v46  ;;  %3011 = vmatprep.subr.bf16.mxu0 %v5421_v47  ;;  %v1373_v46 = vrot.slane %v7703_v1, %v1372_v40  ;;  %v6344_v47 = vld [vmem:[%s8829_s22 + $0x3e0] ss:$8 sps:$4 sm:$0xff]  }
 0x6b1   :  { %v1377_v55 = vrot.slane %v7703_v1, %v1376_v42  ;;  %v6352_v1 = vld [vmem:[%s8829_s22 + $0x404] ss:$8 sps:$4 sm:$0xff]  }
 0x6b3   :  { %4742 = vmatpush1.bf16.msra.mxu1 %v6308_v49  ;;  %3012 = vmatpush1.bf16.msra.mxu0 %v5420_v50 }
 0x6b4   :  { %4743 = vmatprep.subr.bf16.mxu1 %v6313_v29  ;;  %3013 = vmatprep.subr.bf16.mxu0 %v5437_v51 }
 0x6b7   :  { %4744 = vmatpush1.bf16.msra.mxu1 %v6311_v54  ;;  %3014 = vmatpush1.bf16.msra.mxu0 %v5436_v57 }
 0x6b8   :  { %4745 = vmatprep.subr.bf16.mxu1 %v6316_v58  ;;  %3015 = vmatprep.subr.bf16.mxu0 %v5453_v26 }
 0x6bb   :  { %4746 = vmatpush1.bf16.msra.mxu1 %v6314_v0  ;;  %3016 = vmatpush1.bf16.msra.mxu0 %v5452_v3  ;;  %v6355_v0 = vld [vmem:[%s8829_s22 + $0x414] ss:$8 sps:$4 sm:$0xff]   ;;  %v6353_v3 = vld [vmem:[%s8829_s22 + $0x410] ss:$8 sps:$4 sm:$0xff]  }
 0x6bc   :  { %4747 = vmatprep.subr.bf16.mxu1 %v6319_v6  ;;  %3017 = vmatprep.subr.bf16.mxu0 %v5469_v7  ;;  %v6358_v6 = vld [vmem:[%s8829_s22 + $0x424] ss:$8 sps:$4 sm:$0xff]   ;;  %v6356_v7 = vld [vmem:[%s8829_s22 + $0x420] ss:$8 sps:$4 sm:$0xff]  }
 0x6bf   :  { %4748 = vmatpush1.bf16.msra.mxu1 %v6317_v10  ;;  %3018 = vmatpush1.bf16.msra.mxu0 %v5468_v11  ;;  %v6364_v10 = vld [vmem:[%s8829_s22 + $0x444] ss:$8 sps:$4 sm:$0xff]   ;;  %v6362_v11 = vld [vmem:[%s8829_s22 + $0x440] ss:$8 sps:$4 sm:$0xff]  }
 0x6c0   :  { %4749 = vmatprep.subr.bf16.mxu1 %v6322_v12  ;;  %3019 = vmatprep.subr.bf16.mxu0 %v5485_v13  ;;  %v6367_v12 = vld [vmem:[%s8829_s22 + $0x454] ss:$8 sps:$4 sm:$0xff]   ;;  %v6365_v13 = vld [vmem:[%s8829_s22 + $0x450] ss:$8 sps:$4 sm:$0xff]  }
 0x6c3   :  { %4750 = vmatpush1.bf16.msra.mxu1 %v6320_v22  ;;  %3020 = vmatpush1.bf16.msra.mxu0 %v5484_v17  ;;  %v6373_v22 = vld [vmem:[%s8829_s22 + $0x474] ss:$8 sps:$4 sm:$0xff]   ;;  %v6371_v17 = vld [vmem:[%s8829_s22 + $0x470] ss:$8 sps:$4 sm:$0xff]  }
 0x6c4   :  { %4751 = vmatprep.subr.bf16.mxu1 %v6325_v18  ;;  %3021 = vmatprep.subr.bf16.mxu0 %v5501_v19  ;;  %v6376_v18 = vld [vmem:[%s8829_s22 + $0x484] ss:$8 sps:$4 sm:$0xff]   ;;  %v6374_v19 = vld [vmem:[%s8829_s22 + $0x480] ss:$8 sps:$4 sm:$0xff]  }
 0x6c7   :  { %4752 = vmatpush1.bf16.msra.mxu1 %v6323_v24  ;;  %3022 = vmatpush1.bf16.msra.mxu0 %v5500_v27  ;;  %v6382_v24 = vld [vmem:[%s8829_s22 + $0x4a4] ss:$8 sps:$4 sm:$0xff]   ;;  %v6380_v27 = vld [vmem:[%s8829_s22 + $0x4a0] ss:$8 sps:$4 sm:$0xff]  }
 0x6c8   :  { %4753 = vmatprep.subr.bf16.mxu1 %v6328_v28  ;;  %3023 = vmatprep.subr.bf16.mxu0 %v5517_v4  ;;  %v6385_v28 = vld [vmem:[%s8829_s22 + $0x4b4] ss:$8 sps:$4 sm:$0xff]   ;;  %v6383_v4 = vld [vmem:[%s8829_s22 + $0x4b0] ss:$8 sps:$4 sm:$0xff]  }
 0x6cb   :  { %4754 = vmatpush1.bf16.msra.mxu1 %v6326_v30  ;;  %3024 = vmatpush1.bf16.msra.mxu0 %v5516_v31  ;;  %v6388_v30 = vld [vmem:[%s8829_s22 + $0x4c4] ss:$8 sps:$4 sm:$0xff]   ;;  %v6386_v31 = vld [vmem:[%s8829_s22 + $0x4c0] ss:$8 sps:$4 sm:$0xff]  }
 0x6cc   :  { %4755 = vmatprep.subr.bf16.mxu1 %v6331_v32  ;;  %v6391_v32 = vld [vmem:[%s8829_s22 + $0x4d4] ss:$8 sps:$4 sm:$0xff]  }
 0x6ce   :  { %3026 = vmatmul.mubr.bf16.vlgmr.msra.gmra.mrb[44].mxu0 %v7262_v56  ;;  %v6340_v56 = vld [vmem:[%s8829_s22 + $0x3c4] ss:$8 sps:$4 sm:$0xff]  }
 0x6cf   :  { %4756 = vmatpush1.bf16.msra.mxu1 %v6329_v33  ;;  %v6389_v33 = vld [vmem:[%s8829_s22 + $0x4d0] ss:$8 sps:$4 sm:$0xff]  }
 0x6d0   :  { %4757 = vmatprep.subr.bf16.mxu1 %v6334_v34  ;;  %v6394_v34 = vld [vmem:[%s8829_s22 + $0x4e4] ss:$8 sps:$4 sm:$0xff]  }
 0x6d3   :  { %4758 = vmatpush1.bf16.msra.mxu1 %v6332_v35  ;;  %v8372_v35 = vld [vmem:[%s8831_s21 + $0x8] sm:$0xff] }
 0x6d4   :  { %4759 = vmatprep.subr.bf16.mxu1 %v6337_v36  ;;  %v1381_v36 = vrot.slane %v8372_v35, %v7698_v63 }
 0x6d7   :  { %4760 = vmatpush1.bf16.msra.mxu1 %v6335_v37  ;;  %v6392_v37 = vld [vmem:[%s8829_s22 + $0x4e0] ss:$8 sps:$4 sm:$0xff]  }
 0x6d8   :  { %4761 = vmatprep.subr.bf16.mxu1 %v6340_v56  ;;  %v1385_v56 = vrot.slane %v8372_v35, %v7706_v2 }
 0x6db   :  { %4762 = vmatpush1.bf16.msra.mxu1 %v6338_v38  ;;  %v6397_v38 = vld [vmem:[%s8829_s22 + $0x4f4] ss:$8 sps:$4 sm:$0xff]  }
 0x6dc   :  { %4763 = vmatprep.subr.bf16.mxu1 %v6343_v39 }
 0x6df   :  { %4764 = vmatpush1.bf16.msra.mxu1 %v6341_v41 }
 0x6e0   :  { %4765 = vmatprep.subr.bf16.mxu1 %v6346_v45 }
 0x6e1   :  { %v2863_v49 = vpop.f32.mrb[32].mxu0 }
 0x6e2   :  { %v2864_v50 = vadd.f32 %v2863_v49, %v1373_v46  ;;  %v2865_v29 = vpop.f32.mrb[33].mxu0 }
 0x6e3   :  { %v2866_v51 = vadd.f32 %v2865_v29, %v1377_v55  ;;  %4766 = vmatpush1.bf16.msra.mxu1 %v6344_v47  ;;  %v2867_v52 = vpop.f32.mrb[34].mxu0  ;;  %v6395_v55 = vld [vmem:[%s8829_s22 + $0x4f0] ss:$8 sps:$4 sm:$0xff]  }
 0x6e4   :  { %v3040_v54 = vmax.f32 %v2864_v50, 0.0  ;;  %v2868_v57 = vpop.f32.mrb[35].mxu0  ;;  %4767 = vmatprep.subr.bf16.mxu1 %v6349_v48  ;;  %v6400_v50 = vld [vmem:[%s8829_s22 + $0x504] ss:$8 sps:$4 sm:$0xff]   ;;  %v6398_v52 = vld [vmem:[%s8829_s22 + $0x500] ss:$8 sps:$4 sm:$0xff]  }
 0x6e5   :  { %v3041_v58 = vmax.f32 %v2866_v51, 0.0  ;;  %v6401_v57 = vld [vmem:[%s8829_s22 + $0x510] ss:$8 sps:$4 sm:$0xff]  }
 0x6e6   :  { %v3056_v61 = vpack.c.bf16 %v3040_v54, %v3040_v54  ;;  %v6403_v54 = vld [vmem:[%s8829_s22 + $0x514] ss:$8 sps:$4 sm:$0xff]  }
 0x6e7   :  { %v3057_v26 = vpack.c.bf16 %v3041_v58, %v3041_v58  ;;  %4768 = vmatpush1.bf16.msra.mxu1 %v6347_v53  ;;  %v6404_v58 = vld [vmem:[%s8829_s22 + $0x520] ss:$8 sps:$4 sm:$0xff]  }
 0x6e8   :  { %4778 = vmatprep.subr.bf16.mxu1 %v6352_v1  ;;  %v6406_v1 = vld [vmem:[%s8829_s22 + $0x524] ss:$8 sps:$4 sm:$0xff]  }
 0x6e9   :  { %4769 = vmatprep.mubr.bf16.mxu1 %v3057_v26  ;;  %v6409_v26 = vld [vmem:[%s8829_s22 + $0x534] ss:$8 sps:$4 sm:$0xff]  }
 0x6ea   :  { %4770 = vmatmul.mubr.bf16.vlgmr.msra.gmra.mrb[24].mxu1 %v3056_v61  ;;  %v6412_v61 = vld [vmem:[%s8829_s22 + $0x544] ss:$8 sps:$4 sm:$0xff]  }
 0x6eb   :  { %4779 = vmatpush1.bf16.msra.mxu1 %v6350_v21  ;;  %v6407_v21 = vld [vmem:[%s8829_s22 + $0x530] ss:$8 sps:$4 sm:$0xff]  }
 0x6ec   :  { %4780 = vmatprep.subr.bf16.mxu1 %v6355_v0  ;;  %v6410_v0 = vld [vmem:[%s8829_s22 + $0x540] ss:$8 sps:$4 sm:$0xff]  }
 0x6ef   :  { %4781 = vmatpush1.bf16.msra.mxu1 %v6353_v3  ;;  %v6415_v3 = vld [vmem:[%s8829_s22 + $0x554] ss:$8 sps:$4 sm:$0xff]  }
 0x6f0   :  { %4782 = vmatprep.subr.bf16.mxu1 %v6358_v6  ;;  %v6413_v6 = vld [vmem:[%s8829_s22 + $0x550] ss:$8 sps:$4 sm:$0xff]  }
 0x6f3   :  { %4783 = vmatpush1.bf16.msra.mxu1 %v6356_v7  ;;  %v6418_v7 = vld [vmem:[%s8829_s22 + $0x564] ss:$8 sps:$4 sm:$0xff]  }
 0x6f4   :  { %4784 = vmatprep.subr.bf16.mxu1 %v6361_v8  ;;  %v6416_v8 = vld [vmem:[%s8829_s22 + $0x560] ss:$8 sps:$4 sm:$0xff]  }
 0x6f7   :  { %4785 = vmatpush1.bf16.msra.mxu1 %v6359_v9  ;;  %v6421_v9 = vld [vmem:[%s8829_s22 + $0x574] ss:$8 sps:$4 sm:$0xff]  }
 0x6f8   :  { %4786 = vmatprep.subr.bf16.mxu1 %v6364_v10  ;;  %v6419_v10 = vld [vmem:[%s8829_s22 + $0x570] ss:$8 sps:$4 sm:$0xff]  }
 0x6fb   :  { %4787 = vmatpush1.bf16.msra.mxu1 %v6362_v11  ;;  %v6424_v11 = vld [vmem:[%s8829_s22 + $0x584] ss:$8 sps:$4 sm:$0xff]  }
 0x6fc   :  { %4788 = vmatprep.subr.bf16.mxu1 %v6367_v12  ;;  %v6422_v12 = vld [vmem:[%s8829_s22 + $0x580] ss:$8 sps:$4 sm:$0xff]  }
 0x6ff   :  { %4789 = vmatpush1.bf16.msra.mxu1 %v6365_v13  ;;  %v6427_v13 = vld [vmem:[%s8829_s22 + $0x594] ss:$8 sps:$4 sm:$0xff]  }
 0x700   :  { %4790 = vmatprep.subr.bf16.mxu1 %v6370_v14  ;;  %v6425_v14 = vld [vmem:[%s8829_s22 + $0x590] ss:$8 sps:$4 sm:$0xff]  }
 0x703   :  { %4791 = vmatpush1.bf16.msra.mxu1 %v6368_v16  ;;  %v6430_v16 = vld [vmem:[%s8829_s22 + $0x5a4] ss:$8 sps:$4 sm:$0xff]  }
 0x704   :  { %4792 = vmatprep.subr.bf16.mxu1 %v6373_v22  ;;  %v6428_v22 = vld [vmem:[%s8829_s22 + $0x5a0] ss:$8 sps:$4 sm:$0xff]  }
 0x707   :  { %4793 = vmatpush1.bf16.msra.mxu1 %v6371_v17  ;;  %v6433_v17 = vld [vmem:[%s8829_s22 + $0x5b4] ss:$8 sps:$4 sm:$0xff]  }
 0x708   :  { %4794 = vmatprep.subr.bf16.mxu1 %v6376_v18  ;;  %v6431_v18 = vld [vmem:[%s8829_s22 + $0x5b0] ss:$8 sps:$4 sm:$0xff]  }
 0x70b   :  { %4795 = vmatpush1.bf16.msra.mxu1 %v6374_v19  ;;  %v6436_v19 = vld [vmem:[%s8829_s22 + $0x5c4] ss:$8 sps:$4 sm:$0xff]  }
 0x70c   :  { %4796 = vmatprep.subr.bf16.mxu1 %v6379_v20  ;;  %v6434_v20 = vld [vmem:[%s8829_s22 + $0x5c0] ss:$8 sps:$4 sm:$0xff]  }
 0x70f   :  { %4797 = vmatpush1.bf16.msra.mxu1 %v6377_v23  ;;  %v6439_v23 = vld [vmem:[%s8829_s22 + $0x5d4] ss:$8 sps:$4 sm:$0xff]  }
 0x710   :  { %4798 = vmatprep.subr.bf16.mxu1 %v6382_v24  ;;  %v6437_v24 = vld [vmem:[%s8829_s22 + $0x5d0] ss:$8 sps:$4 sm:$0xff]  }
 0x713   :  { %4799 = vmatpush1.bf16.msra.mxu1 %v6380_v27  ;;  %v6442_v27 = vld [vmem:[%s8829_s22 + $0x5e4] ss:$8 sps:$4 sm:$0xff]  }
 0x714   :  { %4800 = vmatprep.subr.bf16.mxu1 %v6385_v28  ;;  %v1401_v28 = vrot.slane %v8372_v35, %v1368_v5 }
 0x716   :  { %v2989_v5 = vadd.f32 %v7756_v44, %v1401_v28  ;;  %v6473_v28 = vld [vmem:[%s8829_s22 + $0x690] ss:$8 sps:$4 sm:$0xff]  }
 0x717   :  { %4801 = vmatpush1.bf16.msra.mxu1 %v6383_v4  ;;  %v1389_v4 = vrot.slane %v8372_v35, %v1356_v25 }
 0x718   :  { %4802 = vmatprep.subr.bf16.mxu1 %v6388_v30  ;;  %v6440_v30 = vld [vmem:[%s8829_s22 + $0x5e0] ss:$8 sps:$4 sm:$0xff]  }
 0x71b   :  { %4803 = vmatpush1.bf16.msra.mxu1 %v6386_v31  ;;  %v1393_v31 = vrot.slane %v8372_v35, %v1360_v60  ;;  %v6448_v60 = vld [vmem:[%s8829_s22 + $0x604] ss:$8 sps:$4 sm:$0xff]  }
 0x71c   :  { %4804 = vmatprep.subr.bf16.mxu1 %v6391_v32  ;;  %v6445_v32 = vld [vmem:[%s8829_s22 + $0x5f4] ss:$8 sps:$4 sm:$0xff]  }
 0x71f   :  { %4805 = vmatpush1.bf16.msra.mxu1 %v6389_v33 }
 0x720   :  { %4806 = vmatprep.subr.bf16.mxu1 %v6394_v34 }
 0x721   :  { %v2904_v39 = vpop.f32.mrb[36].mxu0 }
 0x722   :  { %v2905_v41 = vadd.f32 %v2904_v39, %v1381_v36  ;;  %v2906_v45 = vpop.f32.mrb[37].mxu0 }
 0x723   :  { %v2907_v46 = vadd.f32 %v2906_v45, %v1385_v56  ;;  %4807 = vmatpush1.bf16.msra.mxu1 %v6392_v37  ;;  %v2908_v47 = vpop.f32.mrb[38].mxu0  ;;  %v6443_v56 = vld [vmem:[%s8829_s22 + $0x5f0] ss:$8 sps:$4 sm:$0xff]  }
 0x724   :  { %v3042_v48 = vmax.f32 %v2905_v41, 0.0  ;;  %v2909_v49 = vpop.f32.mrb[39].mxu0  ;;  %4808 = vmatprep.subr.bf16.mxu1 %v6397_v38  ;;  %v3047_v41 = vmax.f32 %v2989_v5, 0.0  ;;  %v6569_v5 = vld [vmem:[%s8832_s24 + $0x90] ss:$8 sps:$4 sm:$0xff]  }
 0x725   :  { %v3043_v29 = vmax.f32 %v2907_v46, 0.0  ;;  %v6446_v46 = vld [vmem:[%s8829_s22 + $0x600] ss:$8 sps:$4 sm:$0xff]   ;;  %v6449_v49 = vld [vmem:[%s8829_s22 + $0x610] ss:$8 sps:$4 sm:$0xff]  }
 0x726   :  { %v3058_v53 = vpack.c.bf16 %v3042_v48, %v3042_v48  ;;  %v3063_v48 = vpack.c.bf16 %v3047_v41, %v3047_v41  ;;  %v6580_v41 = vld [vmem:[%s8832_s24 + $0xc4] ss:$8 sps:$4 sm:$0xff]  }
 0x727   :  { %v3059_v51 = vpack.c.bf16 %v3043_v29, %v3043_v29  ;;  %4809 = vmatpush1.bf16.msra.mxu1 %v6395_v55  ;;  %v6451_v55 = vld [vmem:[%s8829_s22 + $0x614] ss:$8 sps:$4 sm:$0xff]   ;;  %v6542_v29 = vld [vmem:[%s8832_s24] ss:$8 sps:$4 sm:$0xff]  }
 0x728   :  { %4819 = vmatprep.subr.bf16.mxu1 %v6400_v50  ;;  %v6454_v50 = vld [vmem:[%s8829_s22 + $0x624] ss:$8 sps:$4 sm:$0xff]  }
 0x729   :  { %4810 = vmatprep.mubr.bf16.mxu1 %v3059_v51  ;;  %v6544_v51 = vld [vmem:[%s8832_s24 + $0x4] ss:$8 sps:$4 sm:$0xff]  }
 0x72a   :  { %4811 = vmatmul.mubr.bf16.vlgmr.msra.gmra.mrb[24].mxu1 %v3058_v53  ;;  %v6452_v53 = vld [vmem:[%s8829_s22 + $0x620] ss:$8 sps:$4 sm:$0xff]   ;;  %5136 = vmatprep.subr.bf16.mxu0 %v6544_v51  ;;  %v6586_v51 = vld [vmem:[%s8832_s24 + $0xe4] ss:$8 sps:$4 sm:$0xff]  }
 0x72b   :  { %4820 = vmatpush1.bf16.msra.mxu1 %v6398_v52  ;;  %v6547_v52 = vld [vmem:[%s8832_s24 + $0x14] ss:$8 sps:$4 sm:$0xff]   ;;  %5137 = vmatpush1.bf16.msra.mxu0 %v6542_v29 }
 0x72c   :  { %4821 = vmatprep.subr.bf16.mxu1 %v6403_v54  ;;  %v6457_v54 = vld [vmem:[%s8829_s22 + $0x634] ss:$8 sps:$4 sm:$0xff]   ;;  %5138 = vmatprep.subr.bf16.mxu0 %v6547_v52 }
 0x72d   :  { %v6493_v29 = vld [vmem:[%s8829_s22 + $0x6f4] ss:$8 sps:$4 sm:$0xff]  }
 0x72f   :  { %4822 = vmatpush1.bf16.msra.mxu1 %v6401_v57  ;;  %v6545_v57 = vld [vmem:[%s8832_s24 + $0x10] ss:$8 sps:$4 sm:$0xff]  }
 0x730   :  { %4823 = vmatprep.subr.bf16.mxu1 %v6406_v1  ;;  %v6550_v1 = vld [vmem:[%s8832_s24 + $0x24] ss:$8 sps:$4 sm:$0xff]   ;;  %5139 = vmatpush1.bf16.msra.mxu0 %v6545_v57  ;;  %v6584_v57 = vld [vmem:[%s8832_s24 + $0xe0] ss:$8 sps:$4 sm:$0xff]  }
 0x731   :  { %5140 = vmatprep.subr.bf16.mxu0 %v6550_v1 }
 0x733   :  { %4824 = vmatpush1.bf16.msra.mxu1 %v6404_v58  ;;  %v6455_v58 = vld [vmem:[%s8829_s22 + $0x630] ss:$8 sps:$4 sm:$0xff]  }
 0x734   :  { %4825 = vmatprep.subr.bf16.mxu1 %v6409_v26  ;;  %v6460_v26 = vld [vmem:[%s8829_s22 + $0x644] ss:$8 sps:$4 sm:$0xff]  }
 0x737   :  { %4826 = vmatpush1.bf16.msra.mxu1 %v6407_v21  ;;  %v6548_v21 = vld [vmem:[%s8832_s24 + $0x20] ss:$8 sps:$4 sm:$0xff]  }
 0x738   :  { %4827 = vmatprep.subr.bf16.mxu1 %v6412_v61  ;;  %v6553_v61 = vld [vmem:[%s8832_s24 + $0x34] ss:$8 sps:$4 sm:$0xff]   ;;  %5141 = vmatpush1.bf16.msra.mxu0 %v6548_v21 }
 0x739   :  { %5142 = vmatprep.subr.bf16.mxu0 %v6553_v61 }
 0x73b   :  { %4828 = vmatpush1.bf16.msra.mxu1 %v6410_v0  ;;  %v6458_v0 = vld [vmem:[%s8829_s22 + $0x640] ss:$8 sps:$4 sm:$0xff]  }
 0x73c   :  { %4829 = vmatprep.subr.bf16.mxu1 %v6415_v3  ;;  %v6463_v3 = vld [vmem:[%s8829_s22 + $0x654] ss:$8 sps:$4 sm:$0xff]  }
 0x73f   :  { %4830 = vmatpush1.bf16.msra.mxu1 %v6413_v6  ;;  %v6551_v6 = vld [vmem:[%s8832_s24 + $0x30] ss:$8 sps:$4 sm:$0xff]  }
 0x740   :  { %4831 = vmatprep.subr.bf16.mxu1 %v6418_v7  ;;  %v6556_v7 = vld [vmem:[%s8832_s24 + $0x44] ss:$8 sps:$4 sm:$0xff]   ;;  %5143 = vmatpush1.bf16.msra.mxu0 %v6551_v6  ;;  %v6499_v6 = vld [vmem:[%s8829_s22 + $0x714] ss:$8 sps:$4 sm:$0xff]  }
 0x741   :  { %5144 = vmatprep.subr.bf16.mxu0 %v6556_v7  ;;  %v6497_v7 = vld [vmem:[%s8829_s22 + $0x710] ss:$8 sps:$4 sm:$0xff]  }
 0x743   :  { %4832 = vmatpush1.bf16.msra.mxu1 %v6416_v8  ;;  %v6461_v8 = vld [vmem:[%s8829_s22 + $0x650] ss:$8 sps:$4 sm:$0xff]  }
 0x744   :  { %4833 = vmatprep.subr.bf16.mxu1 %v6421_v9  ;;  %v6466_v9 = vld [vmem:[%s8829_s22 + $0x664] ss:$8 sps:$4 sm:$0xff]  }
 0x747   :  { %4834 = vmatpush1.bf16.msra.mxu1 %v6419_v10  ;;  %v6554_v10 = vld [vmem:[%s8832_s24 + $0x40] ss:$8 sps:$4 sm:$0xff]  }
 0x748   :  { %4835 = vmatprep.subr.bf16.mxu1 %v6424_v11  ;;  %v6559_v11 = vld [vmem:[%s8832_s24 + $0x54] ss:$8 sps:$4 sm:$0xff]   ;;  %5145 = vmatpush1.bf16.msra.mxu0 %v6554_v10 }
 0x749   :  { %5146 = vmatprep.subr.bf16.mxu0 %v6559_v11  ;;  %v6505_v10 = vld [vmem:[%s8829_s22 + $0x734] ss:$8 sps:$4 sm:$0xff]   ;;  %v6503_v11 = vld [vmem:[%s8829_s22 + $0x730] ss:$8 sps:$4 sm:$0xff]  }
 0x74b   :  { %4836 = vmatpush1.bf16.msra.mxu1 %v6422_v12  ;;  %v6464_v12 = vld [vmem:[%s8829_s22 + $0x660] ss:$8 sps:$4 sm:$0xff]  }
 0x74c   :  { %4837 = vmatprep.subr.bf16.mxu1 %v6427_v13  ;;  %v6557_v13 = vld [vmem:[%s8832_s24 + $0x50] ss:$8 sps:$4 sm:$0xff]  }
 0x74d   :  { %5147 = vmatpush1.bf16.msra.mxu0 %v6557_v13  ;;  %v6506_v13 = vld [vmem:[%s8829_s22 + $0x740] ss:$8 sps:$4 sm:$0xff]  }
 0x74f   :  { %4838 = vmatpush1.bf16.msra.mxu1 %v6425_v14  ;;  %v6469_v14 = vld [vmem:[%s8829_s22 + $0x674] ss:$8 sps:$4 sm:$0xff]  }
 0x750   :  { %4839 = vmatprep.subr.bf16.mxu1 %v6430_v16  ;;  %v6562_v16 = vld [vmem:[%s8832_s24 + $0x64] ss:$8 sps:$4 sm:$0xff]  }
 0x751   :  { %5148 = vmatprep.subr.bf16.mxu0 %v6562_v16  ;;  %v6509_v16 = vld [vmem:[%s8829_s22 + $0x750] ss:$8 sps:$4 sm:$0xff]  }
 0x753   :  { %4840 = vmatpush1.bf16.msra.mxu1 %v6428_v22  ;;  %v6467_v22 = vld [vmem:[%s8829_s22 + $0x670] ss:$8 sps:$4 sm:$0xff]  }
 0x754   :  { %4841 = vmatprep.subr.bf16.mxu1 %v6433_v17  ;;  %v6560_v17 = vld [vmem:[%s8832_s24 + $0x60] ss:$8 sps:$4 sm:$0xff]  }
 0x755   :  { %5149 = vmatpush1.bf16.msra.mxu0 %v6560_v17  ;;  %v6512_v17 = vld [vmem:[%s8829_s22 + $0x760] ss:$8 sps:$4 sm:$0xff]  }
 0x757   :  { %4842 = vmatpush1.bf16.msra.mxu1 %v6431_v18  ;;  %v6472_v18 = vld [vmem:[%s8829_s22 + $0x684] ss:$8 sps:$4 sm:$0xff]  }
 0x758   :  { %4843 = vmatprep.subr.bf16.mxu1 %v6436_v19  ;;  %v6565_v19 = vld [vmem:[%s8832_s24 + $0x74] ss:$8 sps:$4 sm:$0xff]  }
 0x759   :  { %5150 = vmatprep.subr.bf16.mxu0 %v6565_v19  ;;  %v6515_v19 = vld [vmem:[%s8829_s22 + $0x770] ss:$8 sps:$4 sm:$0xff]  }
 0x75b   :  { %4844 = vmatpush1.bf16.msra.mxu1 %v6434_v20  ;;  %v6470_v20 = vld [vmem:[%s8829_s22 + $0x680] ss:$8 sps:$4 sm:$0xff]  }
 0x75c   :  { %4845 = vmatprep.subr.bf16.mxu1 %v6439_v23  ;;  %v6563_v23 = vld [vmem:[%s8832_s24 + $0x70] ss:$8 sps:$4 sm:$0xff]  }
 0x75d   :  { %5151 = vmatpush1.bf16.msra.mxu0 %v6563_v23  ;;  %v6518_v23 = vld [vmem:[%s8829_s22 + $0x780] ss:$8 sps:$4 sm:$0xff]  }
 0x75f   :  { %4846 = vmatpush1.bf16.msra.mxu1 %v6437_v24  ;;  %v6475_v24 = vld [vmem:[%s8829_s22 + $0x694] ss:$8 sps:$4 sm:$0xff]  }
 0x760   :  { %4847 = vmatprep.subr.bf16.mxu1 %v6442_v27  ;;  %v6568_v27 = vld [vmem:[%s8832_s24 + $0x84] ss:$8 sps:$4 sm:$0xff]  }
 0x761   :  { %v2945_v33 = vpop.f32.mrb[40].mxu0  ;;  %5152 = vmatprep.subr.bf16.mxu0 %v6568_v27  ;;  %v6521_v27 = vld [vmem:[%s8829_s22 + $0x790] ss:$8 sps:$4 sm:$0xff]  }
 0x762   :  { %v2946_v34 = vadd.f32 %v2945_v33, %v1389_v4  ;;  %v2947_v36 = vpop.f32.mrb[41].mxu0  ;;  %v6566_v4 = vld [vmem:[%s8832_s24 + $0x80] ss:$8 sps:$4 sm:$0xff]   ;;  %v6481_v33 = vld [vmem:[%s8829_s22 + $0x6b4] ss:$8 sps:$4 sm:$0xff]  }
 0x763   :  { %v2948_v25 = vadd.f32 %v2947_v36, %v1393_v31  ;;  %4848 = vmatpush1.bf16.msra.mxu1 %v6440_v30  ;;  %v2949_v37 = vpop.f32.mrb[42].mxu0  ;;  %v6478_v30 = vld [vmem:[%s8829_s22 + $0x6a4] ss:$8 sps:$4 sm:$0xff]   ;;  %v6571_v31 = vld [vmem:[%s8832_s24 + $0x94] ss:$8 sps:$4 sm:$0xff]   ;;  %5153 = vmatpush1.bf16.msra.mxu0 %v6566_v4 }
 0x764   :  { %v3044_v38 = vmax.f32 %v2946_v34, 0.0  ;;  %v2950_v39 = vpop.f32.mrb[43].mxu0  ;;  %4849 = vmatprep.subr.bf16.mxu1 %v6445_v32  ;;  %v6476_v32 = vld [vmem:[%s8829_s22 + $0x6a0] ss:$8 sps:$4 sm:$0xff]   ;;  %5154 = vmatprep.subr.bf16.mxu0 %v6571_v31  ;;  %v6574_v34 = vld [vmem:[%s8832_s24 + $0xa4] ss:$8 sps:$4 sm:$0xff]  }
 0x765   :  { %v3045_v45 = vmax.f32 %v2948_v25, 0.0  ;;  %v6479_v36 = vld [vmem:[%s8829_s22 + $0x6b0] ss:$8 sps:$4 sm:$0xff]   ;;  %v6572_v25 = vld [vmem:[%s8832_s24 + $0xa0] ss:$8 sps:$4 sm:$0xff]  }
 0x766   :  { %v3060_v47 = vpack.c.bf16 %v3044_v38, %v3044_v38  ;;  %v6484_v37 = vld [vmem:[%s8829_s22 + $0x6c4] ss:$8 sps:$4 sm:$0xff]   ;;  %v6482_v38 = vld [vmem:[%s8829_s22 + $0x6c0] ss:$8 sps:$4 sm:$0xff]   ;;  %v6575_v39 = vld [vmem:[%s8832_s24 + $0xb0] ss:$8 sps:$4 sm:$0xff]  }
 0x767   :  { %v3061_v44 = vpack.c.bf16 %v3045_v45, %v3045_v45  ;;  %4850 = vmatpush1.bf16.msra.mxu1 %v6443_v56  ;;  %5155 = vmatpush1.bf16.msra.mxu0 %v6569_v5  ;;  %v6577_v56 = vld [vmem:[%s8832_s24 + $0xb4] ss:$8 sps:$4 sm:$0xff]   ;;  %v6485_v45 = vld [vmem:[%s8829_s22 + $0x6d0] ss:$8 sps:$4 sm:$0xff]   ;;  %v6524_v4 = vld [vmem:[%s8829_s22 + $0x7a0] ss:$8 sps:$4 sm:$0xff]  }
 0x768   :  { %4860 = vmatprep.subr.bf16.mxu1 %v6448_v60  ;;  %5156 = vmatprep.subr.bf16.mxu0 %v6574_v34  ;;  %v6487_v60 = vld [vmem:[%s8829_s22 + $0x6d4] ss:$8 sps:$4 sm:$0xff]   ;;  %v6527_v31 = vld [vmem:[%s8829_s22 + $0x7b0] ss:$8 sps:$4 sm:$0xff]   ;;  %v6530_v5 = vld [vmem:[%s8829_s22 + $0x7c0] ss:$8 sps:$4 sm:$0xff]  }
 0x769   :  { %4851 = vmatprep.mubr.bf16.mxu1 %v3061_v44  ;;  %v6578_v44 = vld [vmem:[%s8832_s24 + $0xc0] ss:$8 sps:$4 sm:$0xff]   ;;  %v6533_v34 = vld [vmem:[%s8829_s22 + $0x7d0] ss:$8 sps:$4 sm:$0xff]  }
 0x76a   :  { %4852 = vmatmul.mubr.bf16.vlgmr.msra.gmra.mrb[24].mxu1 %v3060_v47  ;;  %v6490_v47 = vld [vmem:[%s8829_s22 + $0x6e4] ss:$8 sps:$4 sm:$0xff]  }
 0x76b   :  { %4861 = vmatpush1.bf16.msra.mxu1 %v6446_v46  ;;  %4892 = vmatprep.mubr.bf16.mxu1 %v3063_v48  ;;  %v1397_v46 = vrot.slane %v8372_v35, %v1364_v62  ;;  %v6488_v48 = vld [vmem:[%s8829_s22 + $0x6e0] ss:$8 sps:$4 sm:$0xff]   ;;  %v6581_v62 = vld [vmem:[%s8832_s24 + $0xd0] ss:$8 sps:$4 sm:$0xff]  }
 0x76c   :  { %4862 = vmatprep.subr.bf16.mxu1 %v6451_v55  ;;  %5157 = vmatpush1.bf16.msra.mxu0 %v6572_v25  ;;  %v6583_v55 = vld [vmem:[%s8832_s24 + $0xd4] ss:$8 sps:$4 sm:$0xff]   ;;  %v6538_v25 = vld [vmem:[%s8829_s22 + $0x7e4] ss:$8 sps:$4 sm:$0xff]  }
 0x76d   :  { %5158 = vmatprep.subr.bf16.mxu0 %v6577_v56 }
 0x76f   :  { %4863 = vmatpush1.bf16.msra.mxu1 %v6449_v49  ;;  %v1409_v49 = vrot.slane %v8372_v35, %v1376_v42 }
 0x770   :  { %4864 = vmatprep.subr.bf16.mxu1 %v6454_v50  ;;  %5159 = vmatpush1.bf16.msra.mxu0 %v6575_v39  ;;  %v2987_v50 = vadd.f32 %v7754_v43, %v1397_v46  ;;  %v6491_v43 = vld [vmem:[%s8829_s22 + $0x6f0] ss:$8 sps:$4 sm:$0xff]   ;;  %v6589_v39 = vld [vmem:[%s8832_s24 + $0xf4] ss:$8 sps:$4 sm:$0xff]  }
 0x771   :  { %5160 = vmatprep.subr.bf16.mxu0 %v6580_v41  ;;  %v3322_v41 = vld [vmem:[%s8833_s23] sm:$0x3] }
 0x772   :  { %v3046_v1 = vmax.f32 %v2987_v50, 0.0 }
 0x773   :  { %4865 = vmatpush1.bf16.msra.mxu1 %v6452_v53 }
 0x774   :  { %4866 = vmatprep.subr.bf16.mxu1 %v6457_v54  ;;  %5161 = vmatpush1.bf16.msra.mxu0 %v6578_v44  ;;  %v3331_v44 = vrot.slane %v3322_v41, %v7706_v2  ;;  %v5260_v2 = vld [vmem:[%s8834_s17] ss:$0 sm:$0xff] }
 0x775   :  { %5162 = vmatprep.subr.bf16.mxu0 %v6583_v55 }
 0x777   :  { %4867 = vmatpush1.bf16.msra.mxu1 %v6455_v58 }
 0x778   :  { %4868 = vmatprep.subr.bf16.mxu1 %v6460_v26  ;;  %5163 = vmatpush1.bf16.msra.mxu0 %v6581_v62  ;;  %v6496_v26 = vld [vmem:[%s8829_s22 + $0x704] ss:$8 sps:$4 sm:$0xff]  }
 0x779   :  { %5164 = vmatprep.subr.bf16.mxu0 %v6586_v51 }
 0x77b   :  { %4869 = vmatpush1.bf16.msra.mxu1 %v6458_v0  ;;  %v6494_v0 = vld [vmem:[%s8829_s22 + $0x700] ss:$8 sps:$4 sm:$0xff]  }
 0x77c   :  { %4870 = vmatprep.subr.bf16.mxu1 %v6463_v3  ;;  %5165 = vmatpush1.bf16.msra.mxu0 %v6584_v57  ;;  %v3062_v3 = vpack.c.bf16 %v3046_v1, %v3046_v1 }
 0x77d   :  { %5166 = vmatprep.subr.bf16.mxu0 %v6589_v39 }
 0x77f   :  { %4871 = vmatpush1.bf16.msra.mxu1 %v6461_v8  ;;  %v6502_v8 = vld [vmem:[%s8829_s22 + $0x724] ss:$8 sps:$4 sm:$0xff]  }
 0x780   :  { %4872 = vmatprep.subr.bf16.mxu1 %v6466_v9  ;;  %v6500_v9 = vld [vmem:[%s8829_s22 + $0x720] ss:$8 sps:$4 sm:$0xff]  }
 0x783   :  { %4873 = vmatpush1.bf16.msra.mxu1 %v6464_v12  ;;  %v6508_v12 = vld [vmem:[%s8829_s22 + $0x744] ss:$8 sps:$4 sm:$0xff]  }
 0x784   :  { %4874 = vmatprep.subr.bf16.mxu1 %v6469_v14  ;;  %v6511_v14 = vld [vmem:[%s8829_s22 + $0x754] ss:$8 sps:$4 sm:$0xff]  }
 0x787   :  { %4875 = vmatpush1.bf16.msra.mxu1 %v6467_v22  ;;  %v6514_v22 = vld [vmem:[%s8829_s22 + $0x764] ss:$8 sps:$4 sm:$0xff]  }
 0x788   :  { %4876 = vmatprep.subr.bf16.mxu1 %v6472_v18  ;;  %v6517_v18 = vld [vmem:[%s8829_s22 + $0x774] ss:$8 sps:$4 sm:$0xff]  }
 0x78b   :  { %4877 = vmatpush1.bf16.msra.mxu1 %v6470_v20  ;;  %v6520_v20 = vld [vmem:[%s8829_s22 + $0x784] ss:$8 sps:$4 sm:$0xff]  }
 0x78c   :  { %4878 = vmatprep.subr.bf16.mxu1 %v6475_v24  ;;  %v6523_v24 = vld [vmem:[%s8829_s22 + $0x794] ss:$8 sps:$4 sm:$0xff]  }
 0x78f   :  { %4879 = vmatpush1.bf16.msra.mxu1 %v6473_v28  ;;  %v6526_v28 = vld [vmem:[%s8829_s22 + $0x7a4] ss:$8 sps:$4 sm:$0xff]  }
 0x790   :  { %4880 = vmatprep.subr.bf16.mxu1 %v6478_v30  ;;  %v6529_v30 = vld [vmem:[%s8829_s22 + $0x7b4] ss:$8 sps:$4 sm:$0xff]  }
 0x793   :  { %4881 = vmatpush1.bf16.msra.mxu1 %v6476_v32  ;;  %v6532_v32 = vld [vmem:[%s8829_s22 + $0x7c4] ss:$8 sps:$4 sm:$0xff]  }
 0x794   :  { %4882 = vmatprep.subr.bf16.mxu1 %v6481_v33  ;;  %v6535_v33 = vld [vmem:[%s8829_s22 + $0x7d4] ss:$8 sps:$4 sm:$0xff]  }
 0x797   :  { %4883 = vmatpush1.bf16.msra.mxu1 %v6479_v36  ;;  %v1405_v36 = vrot.slane %v8372_v35, %v1372_v40 }
 0x798   :  { %4884 = vmatprep.subr.bf16.mxu1 %v6484_v37  ;;  %v6536_v37 = vld [vmem:[%s8829_s22 + $0x7e0] ss:$8 sps:$4 sm:$0xff]  }
 0x79b   :  { %4885 = vmatpush1.bf16.msra.mxu1 %v6482_v38  ;;  %v6541_v38 = vld [vmem:[%s8829_s22 + $0x7f4] ss:$8 sps:$4 sm:$0xff]  }
 0x79c   :  { %4886 = vmatprep.subr.bf16.mxu1 %v6487_v60  ;;  %v6587_v60 = vld [vmem:[%s8832_s24 + $0xf0] ss:$8 sps:$4 sm:$0xff]  }
 0x79d   :  { %5167 = vmatpush1.bf16.msra.mxu0 %v6587_v60 }
 0x79f   :  { %4887 = vmatpush1.bf16.msra.mxu1 %v6485_v45  ;;  %v3327_v45 = vrot.slane %v3322_v41, %v7698_v63 }
 0x7a0   :  { %4888 = vmatprep.subr.bf16.mxu1 %v6490_v47 }
 0x7a1   :  { %v8680_v52 = vpop.f32.mrb[44].mxu0 }
 0x7a2   :  { %v3029_v42 = vpop.f32.mrb[45].mxu0  ;;  %v3028_v56 = vadd.f32 %v8680_v52, %v1405_v36 }
 0x7a3   :  { %v3030_v53 = vadd.f32 %v3029_v42, %v1409_v49  ;;  %4889 = vmatpush1.bf16.msra.mxu1 %v6488_v48  ;;  %v3031_v54 = vpop.f32.mrb[46].mxu0 }
 0x7a4   :  { %v3032_v58 = vpop.f32.mrb[47].mxu0  ;;  %4890 = vmatprep.subr.bf16.mxu1 %v6493_v29  ;;  %v3048_v40 = vmax.f32 %v3028_v56, 0.0  ;;  %v1002_v54 = vadd.f32 %v7625_v15, %v5260_v2 }
 0x7a5   :  { %v3049_v21 = vmax.f32 %v3030_v53, 0.0  ;;  %v5179_v53 = vpop.permute.xlu1 %5178 }
 0x7a6   :  { %v3064_v35 = vpack.c.bf16 %v3048_v40, %v3048_v40  ;;  %v5191_v1 = vsel %vm5190_vm10, %v1002_v54, %v5179_v53 }
 0x7a7   :  { %v3065_v61 = vpack.c.bf16 %v3049_v21, %v3049_v21  ;;  %4891 = vmatpush1.bf16.msra.mxu1 %v6491_v43 }
 0x7a8   :  { %4901 = vmatprep.subr.bf16.mxu1 %v6496_v26 }
 0x7aa   :  { %4893 = vmatmul.mubr.bf16.vlgmr.msra.gmra.mrb[24].mxu1 %v3062_v3 }
 0x7ab   :  { %4902 = vmatpush1.bf16.msra.mxu1 %v6494_v0  ;;  %4933 = vmatprep.mubr.bf16.mxu1 %v3065_v61 }
 0x7ac   :  { %4903 = vmatprep.subr.bf16.mxu1 %v6499_v6 }
 0x7af   :  { %4904 = vmatpush1.bf16.msra.mxu1 %v6497_v7 }
 0x7b0   :  { %4905 = vmatprep.subr.bf16.mxu1 %v6502_v8 }
 0x7b3   :  { %4906 = vmatpush1.bf16.msra.mxu1 %v6500_v9 }
 0x7b4   :  { %4907 = vmatprep.subr.bf16.mxu1 %v6505_v10 }
 0x7b7   :  { %4908 = vmatpush1.bf16.msra.mxu1 %v6503_v11 }
 0x7b8   :  { %4909 = vmatprep.subr.bf16.mxu1 %v6508_v12 }
 0x7bb   :  { %4910 = vmatpush1.bf16.msra.mxu1 %v6506_v13 }
 0x7bc   :  { %4911 = vmatprep.subr.bf16.mxu1 %v6511_v14 }
 0x7bf   :  { %4912 = vmatpush1.bf16.msra.mxu1 %v6509_v16 }
 0x7c0   :  { %4913 = vmatprep.subr.bf16.mxu1 %v6514_v22 }
 0x7c3   :  { %4914 = vmatpush1.bf16.msra.mxu1 %v6512_v17 }
 0x7c4   :  { %4915 = vmatprep.subr.bf16.mxu1 %v6517_v18 }
 0x7c7   :  { %4916 = vmatpush1.bf16.msra.mxu1 %v6515_v19 }
 0x7c8   :  { %4917 = vmatprep.subr.bf16.mxu1 %v6520_v20 }
 0x7cb   :  { %4918 = vmatpush1.bf16.msra.mxu1 %v6518_v23 }
 0x7cc   :  { %4919 = vmatprep.subr.bf16.mxu1 %v6523_v24 }
 0x7cf   :  { %4920 = vmatpush1.bf16.msra.mxu1 %v6521_v27 }
 0x7d0   :  { %4921 = vmatprep.subr.bf16.mxu1 %v6526_v28 }
 0x7d3   :  { %4922 = vmatpush1.bf16.msra.mxu1 %v6524_v4 }
 0x7d4   :  { %4923 = vmatprep.subr.bf16.mxu1 %v6529_v30 }
 0x7d7   :  { %4924 = vmatpush1.bf16.msra.mxu1 %v6527_v31 }
 0x7d8   :  { %4925 = vmatprep.subr.bf16.mxu1 %v6532_v32 }
 0x7db   :  { %4926 = vmatpush1.bf16.msra.mxu1 %v6530_v5 }
 0x7dc   :  { %4927 = vmatprep.subr.bf16.mxu1 %v6535_v33 }
 0x7df   :  { %4928 = vmatpush1.bf16.msra.mxu1 %v6533_v34 }
 0x7e0   :  { %4929 = vmatprep.subr.bf16.mxu1 %v6538_v25 }
 0x7e3   :  { %4930 = vmatpush1.bf16.msra.mxu1 %v6536_v37 }
 0x7e4   :  { %4931 = vmatprep.subr.bf16.mxu1 %v6541_v38 }
 0x7e7   :  { %4932 = vmatpush1.bf16.msra.mxu1 %v6539_v59 }
 0x7ea   :  { %4934 = vmatmul.mubr.bf16.vlgmr.msra.gmra.mrb[24].mxu1 %v3064_v35 }
 0x8bd   :  { %v4935_v46 = vpop.f32.mrb[24].mxu1 }
 0x8be   :  { %v6078_v47 = vadd.f32 %v4935_v46, %v3327_v45  ;;  %v4937_v55 = vpop.f32.mrb[25].mxu1 }
 0x8bf   :  { %v6079_v48 = vadd.f32 %v4937_v55, %v3331_v44  ;;  %v4939_v49 = vpop.f32.mrb[26].mxu1 }
 0x8c0   :  { %v4940_v62 = vpop.f32.mrb[27].mxu1  ;;  %v4942_v29 = vpack.c.bf16 %v6078_v47, %v6078_v47 }
 0x8c1   :  { %v4943_v50 = vpack.c.bf16 %v6079_v48, %v6079_v48 }
 0x8c3   :  { %5168 = vmatprep.mubr.bf16.mxu0 %v4943_v50 }
 0x8c4   :  { %5169 = vmatmul.mubr.bf16.vlgmr.msra.gmra.mrb[48].mxu0 %v4942_v29 }
 0x997   :  { %v5170_v51 = vpop.f32.mrb[48].mxu0 }
 0x998   :  { %v5172_v52 = vpop.f32.mrb[49].mxu0  ;;  %5183 = vrot.lane.b32.xlu1 %v5170_v51, %s6598_s3 }
 0x999   :  { %5185 = vrot.lane.b32.xlu0 %v5172_v52, %s6598_s3  ;;  %v5174_v42 = vpop.f32.mrb[50].mxu0 }
 0x99a   :  { %v5175_v63 = vpop.f32.mrb[51].mxu0 }
 0xa0a   :  { %v5184_v43 = vpop.permute.xlu1 %5183 }
 0xa0b   :  { %v5186_v57 = vpop.permute.xlu0 %5185  ;;  %v5192_v26 = vsel %vm373_vm6, %v5191_v1, %v5184_v43 }
 0xa0c   :  { %v5187_v58 = vsel %vm373_vm6, %v5184_v43, %v5186_v57 }
 0xa0d   :  { %v5194_v21 = vsel %vm5193_vm11, %v5187_v58, 0.0 }
 0xa0e   :  { %v5197_v61 = vcombine.low %v5192_v26, %v5194_v21 }
 0xa10   :  { %5806 = vst.sshfl [vmem:[%s8835_s25] sm:$0x33 pattern:$0x76325410] %v5197_v61 }

</bundles_post_ra>
